<compile_context>
chip_gen: v7x
topology: tpu7x:2x2x1
jax: 0.10.0
libtpu: 0.0.40
codegen_flags: <defaults>
</compile_context>

<pallas_src>
import functools
import math

import jax
import jax.numpy as jnp
from jax import lax
from jax.experimental import pallas as pl
from jax.experimental.pallas import tpu as pltpu

PAD_IDX = 0
LN_EPS = 1e-5

# Per-layer (stacked) parameter order fed to the fused decoder-stack kernel.
W_ORDER = [
    "wqkv1", "bqkv1", "wz1", "bz1", "g1", "be1",
    "wq2", "bq2", "wkv2", "bkv2", "wz2", "bz2", "g2", "be2",
    "wf1", "bf1", "wf2", "bf2", "g3", "be3",
]


# ----------------------------------------------------------------------------
# Kernels
# ----------------------------------------------------------------------------
def _layernorm(x, gamma, beta):
    # f32 math
    mu = jnp.mean(x, axis=-1, keepdims=True)
    xc = x - mu
    var = jnp.mean(xc * xc, axis=-1, keepdims=True)
    return xc * lax.rsqrt(var + LN_EPS) * gamma + beta


def _softmax(s):
    # f32 math; approx reciprocal goes to the EUP slot (free under MXU phase)
    m = jnp.max(s, axis=-1, keepdims=True)
    e = jnp.exp(s - m)
    return e * pl.reciprocal(jnp.sum(e, axis=-1, keepdims=True), approx=True)


def decoder_stack_kernel(
    x_ref, enc_ref, dpad_ref, epad_ref,
    wqkv1, bqkv1, wz1, bz1, g1, be1,
    wq2, bq2, wkv2, bkv2, wz2, bz2, g2, be2,
    wf1, bf1, wf2, bf2, g3, be3,
    out_ref,
    x_scr, attn_scr,
    *, head_num, qk_size, v_size,
):
    layer = pl.program_id(1)
    n_layers = pl.num_programs(1)

    S = x_ref.shape[0]
    Se = enc_ref.shape[0]
    H, dk, dv = head_num, qk_size, v_size
    Hqk = H * dk

    # Residual stream lives in f32 VMEM scratch across all layers.
    @pl.when(layer == 0)
    def _():
        x_scr[...] = x_ref[...]

    x = x_scr[...]                                   # [S, E] f32

    # ---- build additive attention masks in-kernel (no dense HBM masks) ----
    neg = jnp.float32(-1e9)
    dpad = dpad_ref[...] > 0.5                       # [1, S]  True = pad
    epad = epad_ref[...] > 0.5                       # [1, Se]
    row = lax.broadcasted_iota(jnp.int32, (S, S), 0)
    col = lax.broadcasted_iota(jnp.int32, (S, S), 1)
    self_bias = jnp.where((col > row) | dpad, neg, jnp.float32(0.0))   # [S, S]
    cross_bias = jnp.where(epad, neg, jnp.float32(0.0))                # [1, Se]
    scale = jnp.float32(1.0 / math.sqrt(dk))

    def heads_attention(q_all, k_all, v_all, bias):
        # q_all [S, H*dk] f32, k_all [Sk, H*dk] f32, v_all [Sk, H*dv] f32
        # Per-head results go straight into VMEM scratch slices (no concat).
        for h in range(H):                           # small static loop
            qh = q_all[:, h * dk:(h + 1) * dk].astype(jnp.bfloat16)
            kh = k_all[:, h * dk:(h + 1) * dk].astype(jnp.bfloat16)
            vh = v_all[:, h * dv:(h + 1) * dv].astype(jnp.bfloat16)
            s = lax.dot_general(
                qh, kh, (((1,), (1,)), ((), ())),
                preferred_element_type=jnp.float32)   # [S, Sk]
            p = _softmax(s * scale + bias)
            oh = jnp.dot(p.astype(jnp.bfloat16), vh,
                         preferred_element_type=jnp.float32)
            attn_scr[:, h * dv:(h + 1) * dv] = oh.astype(attn_scr.dtype)
        return attn_scr[...]                         # [S, H*dv] bf16

    # ---- masked self attention + add & norm ----
    xb = x.astype(jnp.bfloat16)
    qkv = jnp.dot(xb, wqkv1[...], preferred_element_type=jnp.float32) + bqkv1[...]
    a = heads_attention(qkv[:, :Hqk], qkv[:, Hqk:2 * Hqk], qkv[:, 2 * Hqk:],
                        self_bias)
    z = jnp.dot(a, wz1[...], preferred_element_type=jnp.float32) + bz1[...]
    x = _layernorm(z + x, g1[...], be1[...])

    # ---- cross attention + add & norm ----
    xb = x.astype(jnp.bfloat16)
    q = jnp.dot(xb, wq2[...], preferred_element_type=jnp.float32) + bq2[...]
    kv = jnp.dot(enc_ref[...], wkv2[...],
                 preferred_element_type=jnp.float32) + bkv2[...]
    a = heads_attention(q, kv[:, :Hqk], kv[:, Hqk:], cross_bias)
    z = jnp.dot(a, wz2[...], preferred_element_type=jnp.float32) + bz2[...]
    x = _layernorm(z + x, g2[...], be2[...])

    # ---- feedforward + add & norm ----
    xb = x.astype(jnp.bfloat16)
    h1 = jnp.dot(xb, wf1[...], preferred_element_type=jnp.float32) + bf1[...]
    h1 = jnp.maximum(h1, 0.0).astype(jnp.bfloat16)
    z = jnp.dot(h1, wf2[...], preferred_element_type=jnp.float32) + bf2[...]
    x = _layernorm(z + x, g3[...], be3[...])

    x_scr[...] = x

    @pl.when(layer == n_layers - 1)
    def _():
        out_ref[...] = x.astype(out_ref.dtype)


def final_linear_kernel(x_ref, w_ref, b_ref, o_ref):
    o_ref[...] = (
        jnp.dot(x_ref[...], w_ref[...], preferred_element_type=jnp.float32)
        + b_ref[...]
    )


# ----------------------------------------------------------------------------
# Wrappers
# ----------------------------------------------------------------------------
def decoder_stack_pallas(x, enc_z, dec_pad, enc_pad, params,
                         *, head_num, qk_size, v_size):
    B, S, E = x.shape
    Se = enc_z.shape[1]
    L = params["wqkv1"].shape[0]

    def act_spec(s1, s2):
        return pl.BlockSpec((None, s1, s2), lambda b, l: (b, 0, 0))

    def w_spec(w):  # stacked per-layer weight: stream layer l each grid step
        return pl.BlockSpec((None,) + w.shape[1:], lambda b, l: (l, 0, 0))

    weights = [params[k] for k in W_ORDER]
    in_specs = [act_spec(S, E), act_spec(Se, E), act_spec(1, S), act_spec(1, Se)]
    in_specs += [w_spec(w) for w in weights]

    kernel = functools.partial(
        decoder_stack_kernel, head_num=head_num, qk_size=qk_size, v_size=v_size
    )
    grid_spec = pltpu.PrefetchScalarGridSpec(
        num_scalar_prefetch=0,
        grid=(B, L),
        in_specs=in_specs,
        out_specs=act_spec(S, E),
        scratch_shapes=[
            pltpu.VMEM((S, E), jnp.float32),                  # residual stream
            pltpu.VMEM((S, head_num * v_size), jnp.bfloat16),  # head outputs
        ],
    )
    return pl.pallas_call(
        kernel,
        out_shape=jax.ShapeDtypeStruct((B, S, E), jnp.bfloat16),
        grid_spec=grid_spec,
        compiler_params=pltpu.CompilerParams(
            dimension_semantics=("parallel", "arbitrary"),
            vmem_limit_bytes=48 * 1024 * 1024,
        ),
    )(x, enc_z, dec_pad, enc_pad, *weights)


def final_linear_pallas(x, w, b, *, tile_v=256):
    B, S, E = x.shape
    V = w.shape[1]
    tv = tile_v if (V % tile_v == 0) else V
    return pl.pallas_call(
        final_linear_kernel,
        out_shape=jax.ShapeDtypeStruct((B, S, V), jnp.float32),
        grid=(B, V // tv),
        in_specs=[
            pl.BlockSpec((None, S, E), lambda i, j: (i, 0, 0)),
            pl.BlockSpec((E, tv), lambda i, j: (0, j)),
            pl.BlockSpec((1, tv), lambda i, j: (0, j)),
        ],
        out_specs=pl.BlockSpec((None, S, tv), lambda i, j: (i, 0, j)),
        compiler_params=pltpu.CompilerParams(
            dimension_semantics=("parallel", "parallel"),
        ),
    )(x, w, b)


# ----------------------------------------------------------------------------
# Parameter construction / glue (plain JAX)
# ----------------------------------------------------------------------------
def make_pos_encoding(max_len, emb_size):
    pos = jnp.arange(max_len, dtype=jnp.float32)[:, None]
    div = jnp.exp(
        -jnp.arange(0, emb_size, 2, dtype=jnp.float32) * math.log(10000.0) / emb_size
    )
    ang = pos * div[None, :]
    pe = jnp.zeros((max_len, emb_size), dtype=jnp.float32)
    pe = pe.at[:, 0::2].set(jnp.sin(ang))
    pe = pe.at[:, 1::2].set(jnp.cos(ang))
    return pe


def init_decoder_params(key, vocab_size, emb_size, qk_size, v_size,
                        hidden_size, head_num, block_num):
    keys = iter(jax.random.split(key, 4 + 16 * block_num))
    Hqk, Hv = head_num * qk_size, head_num * v_size

    def w_init(in_f, out_f):  # weight stored [in, out]
        return jax.random.normal(next(keys), (in_f, out_f), jnp.float32) * 0.02

    params = {
        "emb_table": jax.random.normal(
            next(keys), (vocab_size, emb_size), jnp.float32) * 0.02
    }

    stacks = {k: [] for k in W_ORDER}
    for _ in range(block_num):
        # self-attn: packed QKV weight [E, 2*Hqk + Hv]
        wq1, wk1, wv1 = w_init(emb_size, Hqk), w_init(emb_size, Hqk), w_init(emb_size, Hv)
        stacks["wqkv1"].append(jnp.concatenate([wq1, wk1, wv1], axis=1))
        stacks["bqkv1"].append(jnp.zeros((1, 2 * Hqk + Hv), jnp.float32))
        stacks["wz1"].append(w_init(Hv, emb_size))
        stacks["bz1"].append(jnp.zeros((1, emb_size), jnp.float32))
        stacks["g1"].append(jnp.ones((1, emb_size), jnp.float32))
        stacks["be1"].append(jnp.zeros((1, emb_size), jnp.float32))
        # cross-attn: Q from decoder, packed KV from encoder [E, Hqk + Hv]
        stacks["wq2"].append(w_init(emb_size, Hqk))
        stacks["bq2"].append(jnp.zeros((1, Hqk), jnp.float32))
        wk2, wv2 = w_init(emb_size, Hqk), w_init(emb_size, Hv)
        stacks["wkv2"].append(jnp.concatenate([wk2, wv2], axis=1))
        stacks["bkv2"].append(jnp.zeros((1, Hqk + Hv), jnp.float32))
        stacks["wz2"].append(w_init(Hv, emb_size))
        stacks["bz2"].append(jnp.zeros((1, emb_size), jnp.float32))
        stacks["g2"].append(jnp.ones((1, emb_size), jnp.float32))
        stacks["be2"].append(jnp.zeros((1, emb_size), jnp.float32))
        # FFN
        stacks["wf1"].append(w_init(emb_size, hidden_size))
        stacks["bf1"].append(jnp.zeros((1, hidden_size), jnp.float32))
        stacks["wf2"].append(w_init(hidden_size, emb_size))
        stacks["bf2"].append(jnp.zeros((1, emb_size), jnp.float32))
        stacks["g3"].append(jnp.ones((1, emb_size), jnp.float32))
        stacks["be3"].append(jnp.zeros((1, emb_size), jnp.float32))

    for k, lst in stacks.items():
        arr = jnp.stack(lst, axis=0)           # [L, ...]
        if k.startswith("w"):                  # weights in bf16, biases/LN in f32
            arr = arr.astype(jnp.bfloat16)
        params[k] = arr

    params["w_out"] = w_init(emb_size, vocab_size).astype(jnp.bfloat16)
    params["b_out"] = jnp.zeros((1, vocab_size), jnp.float32)
    return params


def decoder_forward(params, tokens, encoder_z, encoder_x, pos_enc,
                    *, head_num, qk_size, v_size):
    B, S = tokens.shape

    # only per-token pad flags leave the host graph; masks are built in-kernel
    dec_pad = (tokens == PAD_IDX).astype(jnp.float32)[:, None, :]      # [B,1,S]
    enc_pad = (encoder_x == PAD_IDX).astype(jnp.float32)[:, None, :]   # [B,1,Se]

    # embedding + positional encoding (dropout = identity in eval), f32 residual
    x = jnp.take(params["emb_table"], tokens, axis=0) + pos_enc[None, :S, :]

    x = decoder_stack_pallas(
        x, encoder_z.astype(jnp.bfloat16), dec_pad, enc_pad, params,
        head_num=head_num, qk_size=qk_size, v_size=v_size,
    )
    return final_linear_pallas(x, params["w_out"], params["b_out"])


# ----------------------------------------------------------------------------
if __name__ == "__main__":
    vocab_size, emb_size = 512, 128
    qk_size, v_size = 32, 32
    hidden_size, head_num, block_num = 256, 4, 2
    B, S_dec, S_enc = 2, 16, 16

    key = jax.random.PRNGKey(0)
    k_par, k_tok, k_enc_tok, k_enc_z = jax.random.split(key, 4)

    params = init_decoder_params(
        k_par, vocab_size, emb_size, qk_size, v_size,
        hidden_size, head_num, block_num,
    )
    pos_enc = make_pos_encoding(64, emb_size)

    tokens = jax.random.randint(k_tok, (B, S_dec), 1, vocab_size, jnp.int32)
    tokens = tokens.at[:, -2:].set(PAD_IDX)  # some padding at the tail
    encoder_x = jax.random.randint(k_enc_tok, (B, S_enc), 1, vocab_size, jnp.int32)
    encoder_x = encoder_x.at[:, -1:].set(PAD_IDX)
    encoder_z = jax.random.normal(k_enc_z, (B, S_enc, emb_size), jnp.float32)

    logits = decoder_forward(
        params, tokens, encoder_z, encoder_x, pos_enc,
        head_num=head_num, qk_size=qk_size, v_size=v_size,
    )
    jax.block_until_ready(logits)
    assert logits.shape == (B, S_dec, vocab_size)
    assert bool(jnp.all(jnp.isfinite(logits)))
    print("KERNEL_OK")
</pallas_src>

<mosaic_0001>
module attributes {stable_mosaic.version = 11 : i64} {
  func.func @decoder_stack_kernel(%arg0: i32, %arg1: i32, %arg2: memref<1x16x128xf32, #tpu.memory_space<vmem>>, %arg3: memref<1x16x128xbf16, #tpu.memory_space<vmem>>, %arg4: memref<1x1x16xf32, #tpu.memory_space<vmem>>, %arg5: memref<1x1x16xf32, #tpu.memory_space<vmem>>, %arg6: memref<1x128x384xbf16, #tpu.memory_space<vmem>>, %arg7: memref<1x1x384xf32, #tpu.memory_space<vmem>>, %arg8: memref<1x128x128xbf16, #tpu.memory_space<vmem>>, %arg9: memref<1x1x128xf32, #tpu.memory_space<vmem>>, %arg10: memref<1x1x128xf32, #tpu.memory_space<vmem>>, %arg11: memref<1x1x128xf32, #tpu.memory_space<vmem>>, %arg12: memref<1x128x128xbf16, #tpu.memory_space<vmem>>, %arg13: memref<1x1x128xf32, #tpu.memory_space<vmem>>, %arg14: memref<1x128x256xbf16, #tpu.memory_space<vmem>>, %arg15: memref<1x1x256xf32, #tpu.memory_space<vmem>>, %arg16: memref<1x128x128xbf16, #tpu.memory_space<vmem>>, %arg17: memref<1x1x128xf32, #tpu.memory_space<vmem>>, %arg18: memref<1x1x128xf32, #tpu.memory_space<vmem>>, %arg19: memref<1x1x128xf32, #tpu.memory_space<vmem>>, %arg20: memref<1x128x256xbf16, #tpu.memory_space<vmem>>, %arg21: memref<1x1x256xf32, #tpu.memory_space<vmem>>, %arg22: memref<1x256x128xbf16, #tpu.memory_space<vmem>>, %arg23: memref<1x1x128xf32, #tpu.memory_space<vmem>>, %arg24: memref<1x1x128xf32, #tpu.memory_space<vmem>>, %arg25: memref<1x1x128xf32, #tpu.memory_space<vmem>>, %arg26: memref<1x16x128xbf16, #tpu.memory_space<vmem>>, %arg27: memref<16x128xf32, #tpu.memory_space<vmem>>, %arg28: memref<16x128xbf16, #tpu.memory_space<vmem>>) attributes {dimension_semantics = [#tpu.dimension_semantics<parallel>, #tpu.dimension_semantics<arbitrary>], iteration_bounds = array<i64: 2, 2>, scalar_prefetch = 0 : i64, scratch_operands = 2 : i64, tpu.core_type = #tpu.core_type<tc>, window_params = [{transform_indices = @transform_0, window_bounds = array<i64: 1, 16, 128>}, {transform_indices = @transform_1, window_bounds = array<i64: 1, 16, 128>}, {transform_indices = @transform_2, window_bounds = array<i64: 1, 1, 16>}, {transform_indices = @transform_3, window_bounds = array<i64: 1, 1, 16>}, {transform_indices = @transform_4, window_bounds = array<i64: 1, 128, 384>}, {transform_indices = @transform_5, window_bounds = array<i64: 1, 1, 384>}, {transform_indices = @transform_6, window_bounds = array<i64: 1, 128, 128>}, {transform_indices = @transform_7, window_bounds = array<i64: 1, 1, 128>}, {transform_indices = @transform_8, window_bounds = array<i64: 1, 1, 128>}, {transform_indices = @transform_9, window_bounds = array<i64: 1, 1, 128>}, {transform_indices = @transform_10, window_bounds = array<i64: 1, 128, 128>}, {transform_indices = @transform_11, window_bounds = array<i64: 1, 1, 128>}, {transform_indices = @transform_12, window_bounds = array<i64: 1, 128, 256>}, {transform_indices = @transform_13, window_bounds = array<i64: 1, 1, 256>}, {transform_indices = @transform_14, window_bounds = array<i64: 1, 128, 128>}, {transform_indices = @transform_15, window_bounds = array<i64: 1, 1, 128>}, {transform_indices = @transform_16, window_bounds = array<i64: 1, 1, 128>}, {transform_indices = @transform_17, window_bounds = array<i64: 1, 1, 128>}, {transform_indices = @transform_18, window_bounds = array<i64: 1, 128, 256>}, {transform_indices = @transform_19, window_bounds = array<i64: 1, 1, 256>}, {transform_indices = @transform_20, window_bounds = array<i64: 1, 256, 128>}, {transform_indices = @transform_21, window_bounds = array<i64: 1, 1, 128>}, {transform_indices = @transform_22, window_bounds = array<i64: 1, 1, 128>}, {transform_indices = @transform_23, window_bounds = array<i64: 1, 1, 128>}, {transform_indices = @transform_24, window_bounds = array<i64: 1, 16, 128>}]} {
    %c0_i32 = arith.constant 0 : i32
    %0 = arith.cmpi eq, %arg1, %c0_i32 : i32
    %1 = arith.extui %0 : i1 to i32
    %c0_i32_0 = arith.constant 0 : i32
    %2 = arith.cmpi ne, %1, %c0_i32_0 : i32
    scf.if %2 {
      %c0_159 = arith.constant 0 : index
      %c0_160 = arith.constant 0 : index
      %c0_161 = arith.constant 0 : index
      %362 = vector.load %arg2[%c0_159, %c0_160, %c0_161] : memref<1x16x128xf32, #tpu.memory_space<vmem>>, vector<1x16x128xf32>
      %363 = vector.shape_cast %362 : vector<1x16x128xf32> to vector<16x128xf32>
      %c0_162 = arith.constant 0 : index
      %c0_163 = arith.constant 0 : index
      %364 = vector.load %arg27[%c0_162, %c0_163] : memref<16x128xf32, #tpu.memory_space<vmem>>, vector<16x128xf32>
      tpu.vector_store %arg27[%c0_162, %c0_163], %363 {strides = array<i32>} : memref<16x128xf32, #tpu.memory_space<vmem>>, vector<16x128xf32>,
    } else {
    }
    %c0 = arith.constant 0 : index
    %c0_1 = arith.constant 0 : index
    %3 = vector.load %arg27[%c0, %c0_1] : memref<16x128xf32, #tpu.memory_space<vmem>>, vector<16x128xf32>
    %c0_2 = arith.constant 0 : index
    %c0_3 = arith.constant 0 : index
    %c0_4 = arith.constant 0 : index
    %4 = vector.load %arg4[%c0_2, %c0_3, %c0_4] : memref<1x1x16xf32, #tpu.memory_space<vmem>>, vector<1x1x16xf32>
    %5 = vector.shape_cast %4 : vector<1x1x16xf32> to vector<1x16xf32>
    %cst = arith.constant 5.000000e-01 : f32
    %6 = vector.broadcast %cst : f32 to vector<1x16xf32>
    %7 = arith.cmpf ogt, %5, %6 : vector<1x16xf32>
    %c0_5 = arith.constant 0 : index
    %c0_6 = arith.constant 0 : index
    %c0_7 = arith.constant 0 : index
    %8 = vector.load %arg5[%c0_5, %c0_6, %c0_7] : memref<1x1x16xf32, #tpu.memory_space<vmem>>, vector<1x1x16xf32>
    %9 = vector.shape_cast %8 : vector<1x1x16xf32> to vector<1x16xf32>
    %cst_8 = arith.constant 5.000000e-01 : f32
    %10 = vector.broadcast %cst_8 : f32 to vector<1x16xf32>
    %11 = arith.cmpf ogt, %9, %10 : vector<1x16xf32>
    %12 = tpu.iota {dimensions = array<i32: 0>} : vector<16x16xi32>
    %13 = tpu.iota {dimensions = array<i32: 1>} : vector<16x16xi32>
    %14 = arith.cmpi sgt, %13, %12 : vector<16x16xi32>
    %15 = vector.broadcast %7 : vector<1x16xi1> to vector<16x16xi1>
    %16 = arith.ori %14, %15 : vector<16x16xi1>
    %cst_9 = arith.constant -1.000000e+09 : f32
    %cst_10 = arith.constant 0.000000e+00 : f32
    %17 = vector.broadcast %cst_9 : f32 to vector<16x16xf32>
    %18 = vector.broadcast %cst_10 : f32 to vector<16x16xf32>
    %19 = arith.select %16, %17, %18 : vector<16x16xi1>, vector<16x16xf32>
    %cst_11 = arith.constant -1.000000e+09 : f32
    %cst_12 = arith.constant 0.000000e+00 : f32
    %20 = vector.broadcast %cst_11 : f32 to vector<1x16xf32>
    %21 = vector.broadcast %cst_12 : f32 to vector<1x16xf32>
    %22 = arith.select %11, %20, %21 : vector<1x16xi1>, vector<1x16xf32>
    %23 = arith.truncf %3 : vector<16x128xf32> to vector<16x128xbf16>
    %c0_13 = arith.constant 0 : index
    %c0_14 = arith.constant 0 : index
    %c0_15 = arith.constant 0 : index
    %24 = vector.load %arg6[%c0_13, %c0_14, %c0_15] : memref<1x128x384xbf16, #tpu.memory_space<vmem>>, vector<1x128x384xbf16>
    %25 = vector.shape_cast %24 : vector<1x128x384xbf16> to vector<128x384xbf16>
    %cst_16 = arith.constant dense<0.000000e+00> : vector<16x384xf32>
    %26 = tpu.matmul %23, %25, %cst_16 {dimension_numbers = #tpu.dot_dimension_numbers<[1], [0], [0], [1], [0, 0, 1, 1], [], []>} : vector<16x128xbf16>, vector<128x384xbf16>, vector<16x384xf32> -> vector<16x384xf32>
    %c0_17 = arith.constant 0 : index
    %c0_18 = arith.constant 0 : index
    %c0_19 = arith.constant 0 : index
    %27 = vector.load %arg7[%c0_17, %c0_18, %c0_19] : memref<1x1x384xf32, #tpu.memory_space<vmem>>, vector<1x1x384xf32>
    %28 = vector.shape_cast %27 : vector<1x1x384xf32> to vector<1x384xf32>
    %29 = vector.broadcast %28 : vector<1x384xf32> to vector<16x384xf32>
    %30 = arith.addf %26, %29 : vector<16x384xf32>
    %31 = vector.extract_strided_slice %30 {offsets = [0, 0], sizes = [16, 128], strides = [1, 1]} : vector<16x384xf32> to vector<16x128xf32>
    %32 = vector.extract_strided_slice %30 {offsets = [0, 128], sizes = [16, 128], strides = [1, 1]} : vector<16x384xf32> to vector<16x128xf32>
    %33 = vector.extract_strided_slice %30 {offsets = [0, 256], sizes = [16, 128], strides = [1, 1]} : vector<16x384xf32> to vector<16x128xf32>
    %34 = vector.extract_strided_slice %31 {offsets = [0, 0], sizes = [16, 32], strides = [1, 1]} : vector<16x128xf32> to vector<16x32xf32>
    %35 = arith.truncf %34 : vector<16x32xf32> to vector<16x32xbf16>
    %36 = vector.extract_strided_slice %32 {offsets = [0, 0], sizes = [16, 32], strides = [1, 1]} : vector<16x128xf32> to vector<16x32xf32>
    %37 = arith.truncf %36 : vector<16x32xf32> to vector<16x32xbf16>
    %38 = vector.extract_strided_slice %33 {offsets = [0, 0], sizes = [16, 32], strides = [1, 1]} : vector<16x128xf32> to vector<16x32xf32>
    %39 = arith.truncf %38 : vector<16x32xf32> to vector<16x32xbf16>
    %cst_20 = arith.constant dense<0.000000e+00> : vector<16x16xf32>
    %40 = tpu.matmul %35, %37, %cst_20 {dimension_numbers = #tpu.dot_dimension_numbers<[1], [1], [0], [0], [0, 0, 1, 0], [], []>} : vector<16x32xbf16>, vector<16x32xbf16>, vector<16x16xf32> -> vector<16x16xf32>
    %cst_21 = arith.constant 0.176776692 : f32
    %41 = vector.broadcast %cst_21 : f32 to vector<16x16xf32>
    %42 = arith.mulf %40, %41 : vector<16x16xf32>
    %43 = arith.addf %42, %19 : vector<16x16xf32>
    %cst_22 = arith.constant dense<0xFF800000> : vector<16xf32>
    %44 = vector.multi_reduction <maximumf>, %43, %cst_22 [1] : vector<16x16xf32> to vector<16xf32>
    %45 = vector.shape_cast %44 : vector<16xf32> to vector<16x1xf32>
    %46 = vector.broadcast %45 : vector<16x1xf32> to vector<16x16xf32>
    %47 = arith.subf %43, %46 : vector<16x16xf32>
    %48 = math.exp %47 : vector<16x16xf32>
    %cst_23 = arith.constant dense<0.000000e+00> : vector<16xf32>
    %49 = vector.multi_reduction <add>, %48, %cst_23 [1] : vector<16x16xf32> to vector<16xf32>
    %50 = vector.shape_cast %49 : vector<16xf32> to vector<16x1xf32>
    %51 = tpu.reciprocal %50 {approx = true} : vector<16x1xf32> -> vector<16x1xf32>
    %52 = vector.broadcast %51 : vector<16x1xf32> to vector<16x16xf32>
    %53 = arith.mulf %48, %52 : vector<16x16xf32>
    %54 = arith.truncf %53 : vector<16x16xf32> to vector<16x16xbf16>
    %cst_24 = arith.constant dense<0.000000e+00> : vector<16x32xf32>
    %55 = tpu.matmul %54, %39, %cst_24 {dimension_numbers = #tpu.dot_dimension_numbers<[1], [0], [0], [1], [0, 0, 1, 1], [], []>} : vector<16x16xbf16>, vector<16x32xbf16>, vector<16x32xf32> -> vector<16x32xf32>
    %56 = arith.truncf %55 : vector<16x32xf32> to vector<16x32xbf16>
    %c0_25 = arith.constant 0 : index
    %c0_26 = arith.constant 0 : index
    %57 = vector.load %arg28[%c0_25, %c0_26] : memref<16x128xbf16, #tpu.memory_space<vmem>>, vector<16x32xbf16>
    tpu.vector_store %arg28[%c0_25, %c0_26], %56 {strides = array<i32>} : memref<16x128xbf16, #tpu.memory_space<vmem>>, vector<16x32xbf16>,
    %58 = vector.extract_strided_slice %31 {offsets = [0, 32], sizes = [16, 32], strides = [1, 1]} : vector<16x128xf32> to vector<16x32xf32>
    %59 = arith.truncf %58 : vector<16x32xf32> to vector<16x32xbf16>
    %60 = vector.extract_strided_slice %32 {offsets = [0, 32], sizes = [16, 32], strides = [1, 1]} : vector<16x128xf32> to vector<16x32xf32>
    %61 = arith.truncf %60 : vector<16x32xf32> to vector<16x32xbf16>
    %62 = vector.extract_strided_slice %33 {offsets = [0, 32], sizes = [16, 32], strides = [1, 1]} : vector<16x128xf32> to vector<16x32xf32>
    %63 = arith.truncf %62 : vector<16x32xf32> to vector<16x32xbf16>
    %cst_27 = arith.constant dense<0.000000e+00> : vector<16x16xf32>
    %64 = tpu.matmul %59, %61, %cst_27 {dimension_numbers = #tpu.dot_dimension_numbers<[1], [1], [0], [0], [0, 0, 1, 0], [], []>} : vector<16x32xbf16>, vector<16x32xbf16>, vector<16x16xf32> -> vector<16x16xf32>
    %cst_28 = arith.constant 0.176776692 : f32
    %65 = vector.broadcast %cst_28 : f32 to vector<16x16xf32>
    %66 = arith.mulf %64, %65 : vector<16x16xf32>
    %67 = arith.addf %66, %19 : vector<16x16xf32>
    %cst_29 = arith.constant dense<0xFF800000> : vector<16xf32>
    %68 = vector.multi_reduction <maximumf>, %67, %cst_29 [1] : vector<16x16xf32> to vector<16xf32>
    %69 = vector.shape_cast %68 : vector<16xf32> to vector<16x1xf32>
    %70 = vector.broadcast %69 : vector<16x1xf32> to vector<16x16xf32>
    %71 = arith.subf %67, %70 : vector<16x16xf32>
    %72 = math.exp %71 : vector<16x16xf32>
    %cst_30 = arith.constant dense<0.000000e+00> : vector<16xf32>
    %73 = vector.multi_reduction <add>, %72, %cst_30 [1] : vector<16x16xf32> to vector<16xf32>
    %74 = vector.shape_cast %73 : vector<16xf32> to vector<16x1xf32>
    %75 = tpu.reciprocal %74 {approx = true} : vector<16x1xf32> -> vector<16x1xf32>
    %76 = vector.broadcast %75 : vector<16x1xf32> to vector<16x16xf32>
    %77 = arith.mulf %72, %76 : vector<16x16xf32>
    %78 = arith.truncf %77 : vector<16x16xf32> to vector<16x16xbf16>
    %cst_31 = arith.constant dense<0.000000e+00> : vector<16x32xf32>
    %79 = tpu.matmul %78, %63, %cst_31 {dimension_numbers = #tpu.dot_dimension_numbers<[1], [0], [0], [1], [0, 0, 1, 1], [], []>} : vector<16x16xbf16>, vector<16x32xbf16>, vector<16x32xf32> -> vector<16x32xf32>
    %80 = arith.truncf %79 : vector<16x32xf32> to vector<16x32xbf16>
    %c0_32 = arith.constant 0 : index
    %c32 = arith.constant 32 : index
    %81 = vector.load %arg28[%c0_32, %c32] : memref<16x128xbf16, #tpu.memory_space<vmem>>, vector<16x32xbf16>
    tpu.vector_store %arg28[%c0_32, %c32], %80 {strides = array<i32>} : memref<16x128xbf16, #tpu.memory_space<vmem>>, vector<16x32xbf16>,
    %82 = vector.extract_strided_slice %31 {offsets = [0, 64], sizes = [16, 32], strides = [1, 1]} : vector<16x128xf32> to vector<16x32xf32>
    %83 = arith.truncf %82 : vector<16x32xf32> to vector<16x32xbf16>
    %84 = vector.extract_strided_slice %32 {offsets = [0, 64], sizes = [16, 32], strides = [1, 1]} : vector<16x128xf32> to vector<16x32xf32>
    %85 = arith.truncf %84 : vector<16x32xf32> to vector<16x32xbf16>
    %86 = vector.extract_strided_slice %33 {offsets = [0, 64], sizes = [16, 32], strides = [1, 1]} : vector<16x128xf32> to vector<16x32xf32>
    %87 = arith.truncf %86 : vector<16x32xf32> to vector<16x32xbf16>
    %cst_33 = arith.constant dense<0.000000e+00> : vector<16x16xf32>
    %88 = tpu.matmul %83, %85, %cst_33 {dimension_numbers = #tpu.dot_dimension_numbers<[1], [1], [0], [0], [0, 0, 1, 0], [], []>} : vector<16x32xbf16>, vector<16x32xbf16>, vector<16x16xf32> -> vector<16x16xf32>
    %cst_34 = arith.constant 0.176776692 : f32
    %89 = vector.broadcast %cst_34 : f32 to vector<16x16xf32>
    %90 = arith.mulf %88, %89 : vector<16x16xf32>
    %91 = arith.addf %90, %19 : vector<16x16xf32>
    %cst_35 = arith.constant dense<0xFF800000> : vector<16xf32>
    %92 = vector.multi_reduction <maximumf>, %91, %cst_35 [1] : vector<16x16xf32> to vector<16xf32>
    %93 = vector.shape_cast %92 : vector<16xf32> to vector<16x1xf32>
    %94 = vector.broadcast %93 : vector<16x1xf32> to vector<16x16xf32>
    %95 = arith.subf %91, %94 : vector<16x16xf32>
    %96 = math.exp %95 : vector<16x16xf32>
    %cst_36 = arith.constant dense<0.000000e+00> : vector<16xf32>
    %97 = vector.multi_reduction <add>, %96, %cst_36 [1] : vector<16x16xf32> to vector<16xf32>
    %98 = vector.shape_cast %97 : vector<16xf32> to vector<16x1xf32>
    %99 = tpu.reciprocal %98 {approx = true} : vector<16x1xf32> -> vector<16x1xf32>
    %100 = vector.broadcast %99 : vector<16x1xf32> to vector<16x16xf32>
    %101 = arith.mulf %96, %100 : vector<16x16xf32>
    %102 = arith.truncf %101 : vector<16x16xf32> to vector<16x16xbf16>
    %cst_37 = arith.constant dense<0.000000e+00> : vector<16x32xf32>
    %103 = tpu.matmul %102, %87, %cst_37 {dimension_numbers = #tpu.dot_dimension_numbers<[1], [0], [0], [1], [0, 0, 1, 1], [], []>} : vector<16x16xbf16>, vector<16x32xbf16>, vector<16x32xf32> -> vector<16x32xf32>
    %104 = arith.truncf %103 : vector<16x32xf32> to vector<16x32xbf16>
    %c0_38 = arith.constant 0 : index
    %c64 = arith.constant 64 : index
    %105 = vector.load %arg28[%c0_38, %c64] : memref<16x128xbf16, #tpu.memory_space<vmem>>, vector<16x32xbf16>
    tpu.vector_store %arg28[%c0_38, %c64], %104 {strides = array<i32>} : memref<16x128xbf16, #tpu.memory_space<vmem>>, vector<16x32xbf16>,
    %106 = vector.extract_strided_slice %31 {offsets = [0, 96], sizes = [16, 32], strides = [1, 1]} : vector<16x128xf32> to vector<16x32xf32>
    %107 = arith.truncf %106 : vector<16x32xf32> to vector<16x32xbf16>
    %108 = vector.extract_strided_slice %32 {offsets = [0, 96], sizes = [16, 32], strides = [1, 1]} : vector<16x128xf32> to vector<16x32xf32>
    %109 = arith.truncf %108 : vector<16x32xf32> to vector<16x32xbf16>
    %110 = vector.extract_strided_slice %33 {offsets = [0, 96], sizes = [16, 32], strides = [1, 1]} : vector<16x128xf32> to vector<16x32xf32>
    %111 = arith.truncf %110 : vector<16x32xf32> to vector<16x32xbf16>
    %cst_39 = arith.constant dense<0.000000e+00> : vector<16x16xf32>
    %112 = tpu.matmul %107, %109, %cst_39 {dimension_numbers = #tpu.dot_dimension_numbers<[1], [1], [0], [0], [0, 0, 1, 0], [], []>} : vector<16x32xbf16>, vector<16x32xbf16>, vector<16x16xf32> -> vector<16x16xf32>
    %cst_40 = arith.constant 0.176776692 : f32
    %113 = vector.broadcast %cst_40 : f32 to vector<16x16xf32>
    %114 = arith.mulf %112, %113 : vector<16x16xf32>
    %115 = arith.addf %114, %19 : vector<16x16xf32>
    %cst_41 = arith.constant dense<0xFF800000> : vector<16xf32>
    %116 = vector.multi_reduction <maximumf>, %115, %cst_41 [1] : vector<16x16xf32> to vector<16xf32>
    %117 = vector.shape_cast %116 : vector<16xf32> to vector<16x1xf32>
    %118 = vector.broadcast %117 : vector<16x1xf32> to vector<16x16xf32>
    %119 = arith.subf %115, %118 : vector<16x16xf32>
    %120 = math.exp %119 : vector<16x16xf32>
    %cst_42 = arith.constant dense<0.000000e+00> : vector<16xf32>
    %121 = vector.multi_reduction <add>, %120, %cst_42 [1] : vector<16x16xf32> to vector<16xf32>
    %122 = vector.shape_cast %121 : vector<16xf32> to vector<16x1xf32>
    %123 = tpu.reciprocal %122 {approx = true} : vector<16x1xf32> -> vector<16x1xf32>
    %124 = vector.broadcast %123 : vector<16x1xf32> to vector<16x16xf32>
    %125 = arith.mulf %120, %124 : vector<16x16xf32>
    %126 = arith.truncf %125 : vector<16x16xf32> to vector<16x16xbf16>
    %cst_43 = arith.constant dense<0.000000e+00> : vector<16x32xf32>
    %127 = tpu.matmul %126, %111, %cst_43 {dimension_numbers = #tpu.dot_dimension_numbers<[1], [0], [0], [1], [0, 0, 1, 1], [], []>} : vector<16x16xbf16>, vector<16x32xbf16>, vector<16x32xf32> -> vector<16x32xf32>
    %128 = arith.truncf %127 : vector<16x32xf32> to vector<16x32xbf16>
    %c0_44 = arith.constant 0 : index
    %c96 = arith.constant 96 : index
    %129 = vector.load %arg28[%c0_44, %c96] : memref<16x128xbf16, #tpu.memory_space<vmem>>, vector<16x32xbf16>
    tpu.vector_store %arg28[%c0_44, %c96], %128 {strides = array<i32>} : memref<16x128xbf16, #tpu.memory_space<vmem>>, vector<16x32xbf16>,
    %c0_45 = arith.constant 0 : index
    %c0_46 = arith.constant 0 : index
    %130 = vector.load %arg28[%c0_45, %c0_46] : memref<16x128xbf16, #tpu.memory_space<vmem>>, vector<16x128xbf16>
    %c0_47 = arith.constant 0 : index
    %c0_48 = arith.constant 0 : index
    %c0_49 = arith.constant 0 : index
    %131 = vector.load %arg8[%c0_47, %c0_48, %c0_49] : memref<1x128x128xbf16, #tpu.memory_space<vmem>>, vector<1x128x128xbf16>
    %132 = vector.shape_cast %131 : vector<1x128x128xbf16> to vector<128x128xbf16>
    %cst_50 = arith.constant dense<0.000000e+00> : vector<16x128xf32>
    %133 = tpu.matmul %130, %132, %cst_50 {dimension_numbers = #tpu.dot_dimension_numbers<[1], [0], [0], [1], [0, 0, 1, 1], [], []>} : vector<16x128xbf16>, vector<128x128xbf16>, vector<16x128xf32> -> vector<16x128xf32>
    %c0_51 = arith.constant 0 : index
    %c0_52 = arith.constant 0 : index
    %c0_53 = arith.constant 0 : index
    %134 = vector.load %arg9[%c0_51, %c0_52, %c0_53] : memref<1x1x128xf32, #tpu.memory_space<vmem>>, vector<1x1x128xf32>
    %135 = vector.shape_cast %134 : vector<1x1x128xf32> to vector<1x128xf32>
    %136 = vector.broadcast %135 : vector<1x128xf32> to vector<16x128xf32>
    %137 = arith.addf %133, %136 : vector<16x128xf32>
    %138 = arith.addf %137, %3 : vector<16x128xf32>
    %c0_54 = arith.constant 0 : index
    %c0_55 = arith.constant 0 : index
    %c0_56 = arith.constant 0 : index
    %139 = vector.load %arg10[%c0_54, %c0_55, %c0_56] : memref<1x1x128xf32, #tpu.memory_space<vmem>>, vector<1x1x128xf32>
    %140 = vector.shape_cast %139 : vector<1x1x128xf32> to vector<1x128xf32>
    %c0_57 = arith.constant 0 : index
    %c0_58 = arith.constant 0 : index
    %c0_59 = arith.constant 0 : index
    %141 = vector.load %arg11[%c0_57, %c0_58, %c0_59] : memref<1x1x128xf32, #tpu.memory_space<vmem>>, vector<1x1x128xf32>
    %142 = vector.shape_cast %141 : vector<1x1x128xf32> to vector<1x128xf32>
    %cst_60 = arith.constant dense<0.000000e+00> : vector<16xf32>
    %143 = vector.multi_reduction <add>, %138, %cst_60 [1] : vector<16x128xf32> to vector<16xf32>
    %144 = vector.shape_cast %143 : vector<16xf32> to vector<16x1xf32>
    %cst_61 = arith.constant 1.280000e+02 : f32
    %145 = vector.broadcast %cst_61 : f32 to vector<16x1xf32>
    %146 = arith.divf %144, %145 : vector<16x1xf32>
    %147 = vector.broadcast %146 : vector<16x1xf32> to vector<16x128xf32>
    %148 = arith.subf %138, %147 : vector<16x128xf32>
    %149 = arith.mulf %148, %148 : vector<16x128xf32>
    %cst_62 = arith.constant dense<0.000000e+00> : vector<16xf32>
    %150 = vector.multi_reduction <add>, %149, %cst_62 [1] : vector<16x128xf32> to vector<16xf32>
    %151 = vector.shape_cast %150 : vector<16xf32> to vector<16x1xf32>
    %cst_63 = arith.constant 1.280000e+02 : f32
    %152 = vector.broadcast %cst_63 : f32 to vector<16x1xf32>
    %153 = arith.divf %151, %152 : vector<16x1xf32>
    %cst_64 = arith.constant 9.99999974E-6 : f32
    %154 = vector.broadcast %cst_64 : f32 to vector<16x1xf32>
    %155 = arith.addf %153, %154 : vector<16x1xf32>
    %156 = math.rsqrt %155 : vector<16x1xf32>
    %157 = vector.broadcast %156 : vector<16x1xf32> to vector<16x128xf32>
    %158 = arith.mulf %148, %157 : vector<16x128xf32>
    %159 = vector.broadcast %140 : vector<1x128xf32> to vector<16x128xf32>
    %160 = arith.mulf %158, %159 : vector<16x128xf32>
    %161 = vector.broadcast %142 : vector<1x128xf32> to vector<16x128xf32>
    %162 = arith.addf %160, %161 : vector<16x128xf32>
    %163 = arith.truncf %162 : vector<16x128xf32> to vector<16x128xbf16>
    %c0_65 = arith.constant 0 : index
    %c0_66 = arith.constant 0 : index
    %c0_67 = arith.constant 0 : index
    %164 = vector.load %arg12[%c0_65, %c0_66, %c0_67] : memref<1x128x128xbf16, #tpu.memory_space<vmem>>, vector<1x128x128xbf16>
    %165 = vector.shape_cast %164 : vector<1x128x128xbf16> to vector<128x128xbf16>
    %cst_68 = arith.constant dense<0.000000e+00> : vector<16x128xf32>
    %166 = tpu.matmul %163, %165, %cst_68 {dimension_numbers = #tpu.dot_dimension_numbers<[1], [0], [0], [1], [0, 0, 1, 1], [], []>} : vector<16x128xbf16>, vector<128x128xbf16>, vector<16x128xf32> -> vector<16x128xf32>
    %c0_69 = arith.constant 0 : index
    %c0_70 = arith.constant 0 : index
    %c0_71 = arith.constant 0 : index
    %167 = vector.load %arg13[%c0_69, %c0_70, %c0_71] : memref<1x1x128xf32, #tpu.memory_space<vmem>>, vector<1x1x128xf32>
    %168 = vector.shape_cast %167 : vector<1x1x128xf32> to vector<1x128xf32>
    %169 = vector.broadcast %168 : vector<1x128xf32> to vector<16x128xf32>
    %170 = arith.addf %166, %169 : vector<16x128xf32>
    %c0_72 = arith.constant 0 : index
    %c0_73 = arith.constant 0 : index
    %c0_74 = arith.constant 0 : index
    %171 = vector.load %arg3[%c0_72, %c0_73, %c0_74] : memref<1x16x128xbf16, #tpu.memory_space<vmem>>, vector<1x16x128xbf16>
    %172 = vector.shape_cast %171 : vector<1x16x128xbf16> to vector<16x128xbf16>
    %c0_75 = arith.constant 0 : index
    %c0_76 = arith.constant 0 : index
    %c0_77 = arith.constant 0 : index
    %173 = vector.load %arg14[%c0_75, %c0_76, %c0_77] : memref<1x128x256xbf16, #tpu.memory_space<vmem>>, vector<1x128x256xbf16>
    %174 = vector.shape_cast %173 : vector<1x128x256xbf16> to vector<128x256xbf16>
    %cst_78 = arith.constant dense<0.000000e+00> : vector<16x256xf32>
    %175 = tpu.matmul %172, %174, %cst_78 {dimension_numbers = #tpu.dot_dimension_numbers<[1], [0], [0], [1], [0, 0, 1, 1], [], []>} : vector<16x128xbf16>, vector<128x256xbf16>, vector<16x256xf32> -> vector<16x256xf32>
    %c0_79 = arith.constant 0 : index
    %c0_80 = arith.constant 0 : index
    %c0_81 = arith.constant 0 : index
    %176 = vector.load %arg15[%c0_79, %c0_80, %c0_81] : memref<1x1x256xf32, #tpu.memory_space<vmem>>, vector<1x1x256xf32>
    %177 = vector.shape_cast %176 : vector<1x1x256xf32> to vector<1x256xf32>
    %178 = vector.broadcast %177 : vector<1x256xf32> to vector<16x256xf32>
    %179 = arith.addf %175, %178 : vector<16x256xf32>
    %180 = vector.extract_strided_slice %179 {offsets = [0, 0], sizes = [16, 128], strides = [1, 1]} : vector<16x256xf32> to vector<16x128xf32>
    %181 = vector.extract_strided_slice %179 {offsets = [0, 128], sizes = [16, 128], strides = [1, 1]} : vector<16x256xf32> to vector<16x128xf32>
    %182 = vector.extract_strided_slice %170 {offsets = [0, 0], sizes = [16, 32], strides = [1, 1]} : vector<16x128xf32> to vector<16x32xf32>
    %183 = arith.truncf %182 : vector<16x32xf32> to vector<16x32xbf16>
    %184 = vector.extract_strided_slice %180 {offsets = [0, 0], sizes = [16, 32], strides = [1, 1]} : vector<16x128xf32> to vector<16x32xf32>
    %185 = arith.truncf %184 : vector<16x32xf32> to vector<16x32xbf16>
    %186 = vector.extract_strided_slice %181 {offsets = [0, 0], sizes = [16, 32], strides = [1, 1]} : vector<16x128xf32> to vector<16x32xf32>
    %187 = arith.truncf %186 : vector<16x32xf32> to vector<16x32xbf16>
    %cst_82 = arith.constant dense<0.000000e+00> : vector<16x16xf32>
    %188 = tpu.matmul %183, %185, %cst_82 {dimension_numbers = #tpu.dot_dimension_numbers<[1], [1], [0], [0], [0, 0, 1, 0], [], []>} : vector<16x32xbf16>, vector<16x32xbf16>, vector<16x16xf32> -> vector<16x16xf32>
    %cst_83 = arith.constant 0.176776692 : f32
    %189 = vector.broadcast %cst_83 : f32 to vector<16x16xf32>
    %190 = arith.mulf %188, %189 : vector<16x16xf32>
    %191 = vector.broadcast %22 : vector<1x16xf32> to vector<16x16xf32>
    %192 = arith.addf %190, %191 : vector<16x16xf32>
    %cst_84 = arith.constant dense<0xFF800000> : vector<16xf32>
    %193 = vector.multi_reduction <maximumf>, %192, %cst_84 [1] : vector<16x16xf32> to vector<16xf32>
    %194 = vector.shape_cast %193 : vector<16xf32> to vector<16x1xf32>
    %195 = vector.broadcast %194 : vector<16x1xf32> to vector<16x16xf32>
    %196 = arith.subf %192, %195 : vector<16x16xf32>
    %197 = math.exp %196 : vector<16x16xf32>
    %cst_85 = arith.constant dense<0.000000e+00> : vector<16xf32>
    %198 = vector.multi_reduction <add>, %197, %cst_85 [1] : vector<16x16xf32> to vector<16xf32>
    %199 = vector.shape_cast %198 : vector<16xf32> to vector<16x1xf32>
    %200 = tpu.reciprocal %199 {approx = true} : vector<16x1xf32> -> vector<16x1xf32>
    %201 = vector.broadcast %200 : vector<16x1xf32> to vector<16x16xf32>
    %202 = arith.mulf %197, %201 : vector<16x16xf32>
    %203 = arith.truncf %202 : vector<16x16xf32> to vector<16x16xbf16>
    %cst_86 = arith.constant dense<0.000000e+00> : vector<16x32xf32>
    %204 = tpu.matmul %203, %187, %cst_86 {dimension_numbers = #tpu.dot_dimension_numbers<[1], [0], [0], [1], [0, 0, 1, 1], [], []>} : vector<16x16xbf16>, vector<16x32xbf16>, vector<16x32xf32> -> vector<16x32xf32>
    %205 = arith.truncf %204 : vector<16x32xf32> to vector<16x32xbf16>
    %c0_87 = arith.constant 0 : index
    %c0_88 = arith.constant 0 : index
    %206 = vector.load %arg28[%c0_87, %c0_88] : memref<16x128xbf16, #tpu.memory_space<vmem>>, vector<16x32xbf16>
    tpu.vector_store %arg28[%c0_87, %c0_88], %205 {strides = array<i32>} : memref<16x128xbf16, #tpu.memory_space<vmem>>, vector<16x32xbf16>,
    %207 = vector.extract_strided_slice %170 {offsets = [0, 32], sizes = [16, 32], strides = [1, 1]} : vector<16x128xf32> to vector<16x32xf32>
    %208 = arith.truncf %207 : vector<16x32xf32> to vector<16x32xbf16>
    %209 = vector.extract_strided_slice %180 {offsets = [0, 32], sizes = [16, 32], strides = [1, 1]} : vector<16x128xf32> to vector<16x32xf32>
    %210 = arith.truncf %209 : vector<16x32xf32> to vector<16x32xbf16>
    %211 = vector.extract_strided_slice %181 {offsets = [0, 32], sizes = [16, 32], strides = [1, 1]} : vector<16x128xf32> to vector<16x32xf32>
    %212 = arith.truncf %211 : vector<16x32xf32> to vector<16x32xbf16>
    %cst_89 = arith.constant dense<0.000000e+00> : vector<16x16xf32>
    %213 = tpu.matmul %208, %210, %cst_89 {dimension_numbers = #tpu.dot_dimension_numbers<[1], [1], [0], [0], [0, 0, 1, 0], [], []>} : vector<16x32xbf16>, vector<16x32xbf16>, vector<16x16xf32> -> vector<16x16xf32>
    %cst_90 = arith.constant 0.176776692 : f32
    %214 = vector.broadcast %cst_90 : f32 to vector<16x16xf32>
    %215 = arith.mulf %213, %214 : vector<16x16xf32>
    %216 = vector.broadcast %22 : vector<1x16xf32> to vector<16x16xf32>
    %217 = arith.addf %215, %216 : vector<16x16xf32>
    %cst_91 = arith.constant dense<0xFF800000> : vector<16xf32>
    %218 = vector.multi_reduction <maximumf>, %217, %cst_91 [1] : vector<16x16xf32> to vector<16xf32>
    %219 = vector.shape_cast %218 : vector<16xf32> to vector<16x1xf32>
    %220 = vector.broadcast %219 : vector<16x1xf32> to vector<16x16xf32>
    %221 = arith.subf %217, %220 : vector<16x16xf32>
    %222 = math.exp %221 : vector<16x16xf32>
    %cst_92 = arith.constant dense<0.000000e+00> : vector<16xf32>
    %223 = vector.multi_reduction <add>, %222, %cst_92 [1] : vector<16x16xf32> to vector<16xf32>
    %224 = vector.shape_cast %223 : vector<16xf32> to vector<16x1xf32>
    %225 = tpu.reciprocal %224 {approx = true} : vector<16x1xf32> -> vector<16x1xf32>
    %226 = vector.broadcast %225 : vector<16x1xf32> to vector<16x16xf32>
    %227 = arith.mulf %222, %226 : vector<16x16xf32>
    %228 = arith.truncf %227 : vector<16x16xf32> to vector<16x16xbf16>
    %cst_93 = arith.constant dense<0.000000e+00> : vector<16x32xf32>
    %229 = tpu.matmul %228, %212, %cst_93 {dimension_numbers = #tpu.dot_dimension_numbers<[1], [0], [0], [1], [0, 0, 1, 1], [], []>} : vector<16x16xbf16>, vector<16x32xbf16>, vector<16x32xf32> -> vector<16x32xf32>
    %230 = arith.truncf %229 : vector<16x32xf32> to vector<16x32xbf16>
    %c0_94 = arith.constant 0 : index
    %c32_95 = arith.constant 32 : index
    %231 = vector.load %arg28[%c0_94, %c32_95] : memref<16x128xbf16, #tpu.memory_space<vmem>>, vector<16x32xbf16>
    tpu.vector_store %arg28[%c0_94, %c32_95], %230 {strides = array<i32>} : memref<16x128xbf16, #tpu.memory_space<vmem>>, vector<16x32xbf16>,
    %232 = vector.extract_strided_slice %170 {offsets = [0, 64], sizes = [16, 32], strides = [1, 1]} : vector<16x128xf32> to vector<16x32xf32>
    %233 = arith.truncf %232 : vector<16x32xf32> to vector<16x32xbf16>
    %234 = vector.extract_strided_slice %180 {offsets = [0, 64], sizes = [16, 32], strides = [1, 1]} : vector<16x128xf32> to vector<16x32xf32>
    %235 = arith.truncf %234 : vector<16x32xf32> to vector<16x32xbf16>
    %236 = vector.extract_strided_slice %181 {offsets = [0, 64], sizes = [16, 32], strides = [1, 1]} : vector<16x128xf32> to vector<16x32xf32>
    %237 = arith.truncf %236 : vector<16x32xf32> to vector<16x32xbf16>
    %cst_96 = arith.constant dense<0.000000e+00> : vector<16x16xf32>
    %238 = tpu.matmul %233, %235, %cst_96 {dimension_numbers = #tpu.dot_dimension_numbers<[1], [1], [0], [0], [0, 0, 1, 0], [], []>} : vector<16x32xbf16>, vector<16x32xbf16>, vector<16x16xf32> -> vector<16x16xf32>
    %cst_97 = arith.constant 0.176776692 : f32
    %239 = vector.broadcast %cst_97 : f32 to vector<16x16xf32>
    %240 = arith.mulf %238, %239 : vector<16x16xf32>
    %241 = vector.broadcast %22 : vector<1x16xf32> to vector<16x16xf32>
    %242 = arith.addf %240, %241 : vector<16x16xf32>
    %cst_98 = arith.constant dense<0xFF800000> : vector<16xf32>
    %243 = vector.multi_reduction <maximumf>, %242, %cst_98 [1] : vector<16x16xf32> to vector<16xf32>
    %244 = vector.shape_cast %243 : vector<16xf32> to vector<16x1xf32>
    %245 = vector.broadcast %244 : vector<16x1xf32> to vector<16x16xf32>
    %246 = arith.subf %242, %245 : vector<16x16xf32>
    %247 = math.exp %246 : vector<16x16xf32>
    %cst_99 = arith.constant dense<0.000000e+00> : vector<16xf32>
    %248 = vector.multi_reduction <add>, %247, %cst_99 [1] : vector<16x16xf32> to vector<16xf32>
    %249 = vector.shape_cast %248 : vector<16xf32> to vector<16x1xf32>
    %250 = tpu.reciprocal %249 {approx = true} : vector<16x1xf32> -> vector<16x1xf32>
    %251 = vector.broadcast %250 : vector<16x1xf32> to vector<16x16xf32>
    %252 = arith.mulf %247, %251 : vector<16x16xf32>
    %253 = arith.truncf %252 : vector<16x16xf32> to vector<16x16xbf16>
    %cst_100 = arith.constant dense<0.000000e+00> : vector<16x32xf32>
    %254 = tpu.matmul %253, %237, %cst_100 {dimension_numbers = #tpu.dot_dimension_numbers<[1], [0], [0], [1], [0, 0, 1, 1], [], []>} : vector<16x16xbf16>, vector<16x32xbf16>, vector<16x32xf32> -> vector<16x32xf32>
    %255 = arith.truncf %254 : vector<16x32xf32> to vector<16x32xbf16>
    %c0_101 = arith.constant 0 : index
    %c64_102 = arith.constant 64 : index
    %256 = vector.load %arg28[%c0_101, %c64_102] : memref<16x128xbf16, #tpu.memory_space<vmem>>, vector<16x32xbf16>
    tpu.vector_store %arg28[%c0_101, %c64_102], %255 {strides = array<i32>} : memref<16x128xbf16, #tpu.memory_space<vmem>>, vector<16x32xbf16>,
    %257 = vector.extract_strided_slice %170 {offsets = [0, 96], sizes = [16, 32], strides = [1, 1]} : vector<16x128xf32> to vector<16x32xf32>
    %258 = arith.truncf %257 : vector<16x32xf32> to vector<16x32xbf16>
    %259 = vector.extract_strided_slice %180 {offsets = [0, 96], sizes = [16, 32], strides = [1, 1]} : vector<16x128xf32> to vector<16x32xf32>
    %260 = arith.truncf %259 : vector<16x32xf32> to vector<16x32xbf16>
    %261 = vector.extract_strided_slice %181 {offsets = [0, 96], sizes = [16, 32], strides = [1, 1]} : vector<16x128xf32> to vector<16x32xf32>
    %262 = arith.truncf %261 : vector<16x32xf32> to vector<16x32xbf16>
    %cst_103 = arith.constant dense<0.000000e+00> : vector<16x16xf32>
    %263 = tpu.matmul %258, %260, %cst_103 {dimension_numbers = #tpu.dot_dimension_numbers<[1], [1], [0], [0], [0, 0, 1, 0], [], []>} : vector<16x32xbf16>, vector<16x32xbf16>, vector<16x16xf32> -> vector<16x16xf32>
    %cst_104 = arith.constant 0.176776692 : f32
    %264 = vector.broadcast %cst_104 : f32 to vector<16x16xf32>
    %265 = arith.mulf %263, %264 : vector<16x16xf32>
    %266 = vector.broadcast %22 : vector<1x16xf32> to vector<16x16xf32>
    %267 = arith.addf %265, %266 : vector<16x16xf32>
    %cst_105 = arith.constant dense<0xFF800000> : vector<16xf32>
    %268 = vector.multi_reduction <maximumf>, %267, %cst_105 [1] : vector<16x16xf32> to vector<16xf32>
    %269 = vector.shape_cast %268 : vector<16xf32> to vector<16x1xf32>
    %270 = vector.broadcast %269 : vector<16x1xf32> to vector<16x16xf32>
    %271 = arith.subf %267, %270 : vector<16x16xf32>
    %272 = math.exp %271 : vector<16x16xf32>
    %cst_106 = arith.constant dense<0.000000e+00> : vector<16xf32>
    %273 = vector.multi_reduction <add>, %272, %cst_106 [1] : vector<16x16xf32> to vector<16xf32>
    %274 = vector.shape_cast %273 : vector<16xf32> to vector<16x1xf32>
    %275 = tpu.reciprocal %274 {approx = true} : vector<16x1xf32> -> vector<16x1xf32>
    %276 = vector.broadcast %275 : vector<16x1xf32> to vector<16x16xf32>
    %277 = arith.mulf %272, %276 : vector<16x16xf32>
    %278 = arith.truncf %277 : vector<16x16xf32> to vector<16x16xbf16>
    %cst_107 = arith.constant dense<0.000000e+00> : vector<16x32xf32>
    %279 = tpu.matmul %278, %262, %cst_107 {dimension_numbers = #tpu.dot_dimension_numbers<[1], [0], [0], [1], [0, 0, 1, 1], [], []>} : vector<16x16xbf16>, vector<16x32xbf16>, vector<16x32xf32> -> vector<16x32xf32>
    %280 = arith.truncf %279 : vector<16x32xf32> to vector<16x32xbf16>
    %c0_108 = arith.constant 0 : index
    %c96_109 = arith.constant 96 : index
    %281 = vector.load %arg28[%c0_108, %c96_109] : memref<16x128xbf16, #tpu.memory_space<vmem>>, vector<16x32xbf16>
    tpu.vector_store %arg28[%c0_108, %c96_109], %280 {strides = array<i32>} : memref<16x128xbf16, #tpu.memory_space<vmem>>, vector<16x32xbf16>,
    %c0_110 = arith.constant 0 : index
    %c0_111 = arith.constant 0 : index
    %282 = vector.load %arg28[%c0_110, %c0_111] : memref<16x128xbf16, #tpu.memory_space<vmem>>, vector<16x128xbf16>
    %c0_112 = arith.constant 0 : index
    %c0_113 = arith.constant 0 : index
    %c0_114 = arith.constant 0 : index
    %283 = vector.load %arg16[%c0_112, %c0_113, %c0_114] : memref<1x128x128xbf16, #tpu.memory_space<vmem>>, vector<1x128x128xbf16>
    %284 = vector.shape_cast %283 : vector<1x128x128xbf16> to vector<128x128xbf16>
    %cst_115 = arith.constant dense<0.000000e+00> : vector<16x128xf32>
    %285 = tpu.matmul %282, %284, %cst_115 {dimension_numbers = #tpu.dot_dimension_numbers<[1], [0], [0], [1], [0, 0, 1, 1], [], []>} : vector<16x128xbf16>, vector<128x128xbf16>, vector<16x128xf32> -> vector<16x128xf32>
    %c0_116 = arith.constant 0 : index
    %c0_117 = arith.constant 0 : index
    %c0_118 = arith.constant 0 : index
    %286 = vector.load %arg17[%c0_116, %c0_117, %c0_118] : memref<1x1x128xf32, #tpu.memory_space<vmem>>, vector<1x1x128xf32>
    %287 = vector.shape_cast %286 : vector<1x1x128xf32> to vector<1x128xf32>
    %288 = vector.broadcast %287 : vector<1x128xf32> to vector<16x128xf32>
    %289 = arith.addf %285, %288 : vector<16x128xf32>
    %290 = arith.addf %289, %162 : vector<16x128xf32>
    %c0_119 = arith.constant 0 : index
    %c0_120 = arith.constant 0 : index
    %c0_121 = arith.constant 0 : index
    %291 = vector.load %arg18[%c0_119, %c0_120, %c0_121] : memref<1x1x128xf32, #tpu.memory_space<vmem>>, vector<1x1x128xf32>
    %292 = vector.shape_cast %291 : vector<1x1x128xf32> to vector<1x128xf32>
    %c0_122 = arith.constant 0 : index
    %c0_123 = arith.constant 0 : index
    %c0_124 = arith.constant 0 : index
    %293 = vector.load %arg19[%c0_122, %c0_123, %c0_124] : memref<1x1x128xf32, #tpu.memory_space<vmem>>, vector<1x1x128xf32>
    %294 = vector.shape_cast %293 : vector<1x1x128xf32> to vector<1x128xf32>
    %cst_125 = arith.constant dense<0.000000e+00> : vector<16xf32>
    %295 = vector.multi_reduction <add>, %290, %cst_125 [1] : vector<16x128xf32> to vector<16xf32>
    %296 = vector.shape_cast %295 : vector<16xf32> to vector<16x1xf32>
    %cst_126 = arith.constant 1.280000e+02 : f32
    %297 = vector.broadcast %cst_126 : f32 to vector<16x1xf32>
    %298 = arith.divf %296, %297 : vector<16x1xf32>
    %299 = vector.broadcast %298 : vector<16x1xf32> to vector<16x128xf32>
    %300 = arith.subf %290, %299 : vector<16x128xf32>
    %301 = arith.mulf %300, %300 : vector<16x128xf32>
    %cst_127 = arith.constant dense<0.000000e+00> : vector<16xf32>
    %302 = vector.multi_reduction <add>, %301, %cst_127 [1] : vector<16x128xf32> to vector<16xf32>
    %303 = vector.shape_cast %302 : vector<16xf32> to vector<16x1xf32>
    %cst_128 = arith.constant 1.280000e+02 : f32
    %304 = vector.broadcast %cst_128 : f32 to vector<16x1xf32>
    %305 = arith.divf %303, %304 : vector<16x1xf32>
    %cst_129 = arith.constant 9.99999974E-6 : f32
    %306 = vector.broadcast %cst_129 : f32 to vector<16x1xf32>
    %307 = arith.addf %305, %306 : vector<16x1xf32>
    %308 = math.rsqrt %307 : vector<16x1xf32>
    %309 = vector.broadcast %308 : vector<16x1xf32> to vector<16x128xf32>
    %310 = arith.mulf %300, %309 : vector<16x128xf32>
    %311 = vector.broadcast %292 : vector<1x128xf32> to vector<16x128xf32>
    %312 = arith.mulf %310, %311 : vector<16x128xf32>
    %313 = vector.broadcast %294 : vector<1x128xf32> to vector<16x128xf32>
    %314 = arith.addf %312, %313 : vector<16x128xf32>
    %315 = arith.truncf %314 : vector<16x128xf32> to vector<16x128xbf16>
    %c0_130 = arith.constant 0 : index
    %c0_131 = arith.constant 0 : index
    %c0_132 = arith.constant 0 : index
    %316 = vector.load %arg20[%c0_130, %c0_131, %c0_132] : memref<1x128x256xbf16, #tpu.memory_space<vmem>>, vector<1x128x256xbf16>
    %317 = vector.shape_cast %316 : vector<1x128x256xbf16> to vector<128x256xbf16>
    %cst_133 = arith.constant dense<0.000000e+00> : vector<16x256xf32>
    %318 = tpu.matmul %315, %317, %cst_133 {dimension_numbers = #tpu.dot_dimension_numbers<[1], [0], [0], [1], [0, 0, 1, 1], [], []>} : vector<16x128xbf16>, vector<128x256xbf16>, vector<16x256xf32> -> vector<16x256xf32>
    %c0_134 = arith.constant 0 : index
    %c0_135 = arith.constant 0 : index
    %c0_136 = arith.constant 0 : index
    %319 = vector.load %arg21[%c0_134, %c0_135, %c0_136] : memref<1x1x256xf32, #tpu.memory_space<vmem>>, vector<1x1x256xf32>
    %320 = vector.shape_cast %319 : vector<1x1x256xf32> to vector<1x256xf32>
    %321 = vector.broadcast %320 : vector<1x256xf32> to vector<16x256xf32>
    %322 = arith.addf %318, %321 : vector<16x256xf32>
    %cst_137 = arith.constant 0.000000e+00 : f32
    %323 = vector.broadcast %cst_137 : f32 to vector<16x256xf32>
    %324 = arith.maximumf %322, %323 : vector<16x256xf32>
    %325 = arith.truncf %324 : vector<16x256xf32> to vector<16x256xbf16>
    %c0_138 = arith.constant 0 : index
    %c0_139 = arith.constant 0 : index
    %c0_140 = arith.constant 0 : index
    %326 = vector.load %arg22[%c0_138, %c0_139, %c0_140] : memref<1x256x128xbf16, #tpu.memory_space<vmem>>, vector<1x256x128xbf16>
    %327 = vector.shape_cast %326 : vector<1x256x128xbf16> to vector<256x128xbf16>
    %cst_141 = arith.constant dense<0.000000e+00> : vector<16x128xf32>
    %328 = tpu.matmul %325, %327, %cst_141 {dimension_numbers = #tpu.dot_dimension_numbers<[1], [0], [0], [1], [0, 0, 1, 1], [], []>} : vector<16x256xbf16>, vector<256x128xbf16>, vector<16x128xf32> -> vector<16x128xf32>
    %c0_142 = arith.constant 0 : index
    %c0_143 = arith.constant 0 : index
    %c0_144 = arith.constant 0 : index
    %329 = vector.load %arg23[%c0_142, %c0_143, %c0_144] : memref<1x1x128xf32, #tpu.memory_space<vmem>>, vector<1x1x128xf32>
    %330 = vector.shape_cast %329 : vector<1x1x128xf32> to vector<1x128xf32>
    %331 = vector.broadcast %330 : vector<1x128xf32> to vector<16x128xf32>
    %332 = arith.addf %328, %331 : vector<16x128xf32>
    %333 = arith.addf %332, %314 : vector<16x128xf32>
    %c0_145 = arith.constant 0 : index
    %c0_146 = arith.constant 0 : index
    %c0_147 = arith.constant 0 : index
    %334 = vector.load %arg24[%c0_145, %c0_146, %c0_147] : memref<1x1x128xf32, #tpu.memory_space<vmem>>, vector<1x1x128xf32>
    %335 = vector.shape_cast %334 : vector<1x1x128xf32> to vector<1x128xf32>
    %c0_148 = arith.constant 0 : index
    %c0_149 = arith.constant 0 : index
    %c0_150 = arith.constant 0 : index
    %336 = vector.load %arg25[%c0_148, %c0_149, %c0_150] : memref<1x1x128xf32, #tpu.memory_space<vmem>>, vector<1x1x128xf32>
    %337 = vector.shape_cast %336 : vector<1x1x128xf32> to vector<1x128xf32>
    %cst_151 = arith.constant dense<0.000000e+00> : vector<16xf32>
    %338 = vector.multi_reduction <add>, %333, %cst_151 [1] : vector<16x128xf32> to vector<16xf32>
    %339 = vector.shape_cast %338 : vector<16xf32> to vector<16x1xf32>
    %cst_152 = arith.constant 1.280000e+02 : f32
    %340 = vector.broadcast %cst_152 : f32 to vector<16x1xf32>
    %341 = arith.divf %339, %340 : vector<16x1xf32>
    %342 = vector.broadcast %341 : vector<16x1xf32> to vector<16x128xf32>
    %343 = arith.subf %333, %342 : vector<16x128xf32>
    %344 = arith.mulf %343, %343 : vector<16x128xf32>
    %cst_153 = arith.constant dense<0.000000e+00> : vector<16xf32>
    %345 = vector.multi_reduction <add>, %344, %cst_153 [1] : vector<16x128xf32> to vector<16xf32>
    %346 = vector.shape_cast %345 : vector<16xf32> to vector<16x1xf32>
    %cst_154 = arith.constant 1.280000e+02 : f32
    %347 = vector.broadcast %cst_154 : f32 to vector<16x1xf32>
    %348 = arith.divf %346, %347 : vector<16x1xf32>
    %cst_155 = arith.constant 9.99999974E-6 : f32
    %349 = vector.broadcast %cst_155 : f32 to vector<16x1xf32>
    %350 = arith.addf %348, %349 : vector<16x1xf32>
    %351 = math.rsqrt %350 : vector<16x1xf32>
    %352 = vector.broadcast %351 : vector<16x1xf32> to vector<16x128xf32>
    %353 = arith.mulf %343, %352 : vector<16x128xf32>
    %354 = vector.broadcast %335 : vector<1x128xf32> to vector<16x128xf32>
    %355 = arith.mulf %353, %354 : vector<16x128xf32>
    %356 = vector.broadcast %337 : vector<1x128xf32> to vector<16x128xf32>
    %357 = arith.addf %355, %356 : vector<16x128xf32>
    %c0_156 = arith.constant 0 : index
    %c0_157 = arith.constant 0 : index
    %358 = vector.load %arg27[%c0_156, %c0_157] : memref<16x128xf32, #tpu.memory_space<vmem>>, vector<16x128xf32>
    tpu.vector_store %arg27[%c0_156, %c0_157], %357 {strides = array<i32>} : memref<16x128xf32, #tpu.memory_space<vmem>>, vector<16x128xf32>,
    %c1_i32 = arith.constant 1 : i32
    %359 = arith.cmpi eq, %arg1, %c1_i32 : i32
    %360 = arith.extui %359 : i1 to i32
    %c0_i32_158 = arith.constant 0 : i32
    %361 = arith.cmpi ne, %360, %c0_i32_158 : i32
    scf.if %361 {
      %362 = arith.truncf %357 : vector<16x128xf32> to vector<16x128xbf16>
      %c0_159 = arith.constant 0 : index
      %c0_160 = arith.constant 0 : index
      %c0_161 = arith.constant 0 : index
      %363 = vector.load %arg26[%c0_159, %c0_160, %c0_161] : memref<1x16x128xbf16, #tpu.memory_space<vmem>>, vector<1x16x128xbf16>
      %364 = vector.shape_cast %363 : vector<1x16x128xbf16> to vector<16x128xbf16>
      %365 = vector.shape_cast %362 : vector<16x128xbf16> to vector<1x16x128xbf16>
      tpu.vector_store %arg26[%c0_159, %c0_160, %c0_161], %365 {strides = array<i32>} : memref<1x16x128xbf16, #tpu.memory_space<vmem>>, vector<1x16x128xbf16>,
    } else {
    }
    return
  }
  func.func @transform_0(%arg0: i32, %arg1: i32) -> (i32, i32, i32) {
    %c0_i32 = arith.constant 0 : i32
    %c0_i32_0 = arith.constant 0 : i32
    %c0_i32_1 = arith.constant 0 : i32
    return %arg0, %c0_i32, %c0_i32_0 : i32, i32, i32
  }
  func.func @transform_1(%arg0: i32, %arg1: i32) -> (i32, i32, i32) {
    %c0_i32 = arith.constant 0 : i32
    %c0_i32_0 = arith.constant 0 : i32
    %c0_i32_1 = arith.constant 0 : i32
    return %arg0, %c0_i32, %c0_i32_0 : i32, i32, i32
  }
  func.func @transform_2(%arg0: i32, %arg1: i32) -> (i32, i32, i32) {
    %c0_i32 = arith.constant 0 : i32
    %c0_i32_0 = arith.constant 0 : i32
    %c0_i32_1 = arith.constant 0 : i32
    return %arg0, %c0_i32, %c0_i32_0 : i32, i32, i32
  }
  func.func @transform_3(%arg0: i32, %arg1: i32) -> (i32, i32, i32) {
    %c0_i32 = arith.constant 0 : i32
    %c0_i32_0 = arith.constant 0 : i32
    %c0_i32_1 = arith.constant 0 : i32
    return %arg0, %c0_i32, %c0_i32_0 : i32, i32, i32
  }
  func.func @transform_4(%arg0: i32, %arg1: i32) -> (i32, i32, i32) {
    %c0_i32 = arith.constant 0 : i32
    %c0_i32_0 = arith.constant 0 : i32
    %c0_i32_1 = arith.constant 0 : i32
    return %arg1, %c0_i32, %c0_i32_0 : i32, i32, i32
  }
  func.func @transform_5(%arg0: i32, %arg1: i32) -> (i32, i32, i32) {
    %c0_i32 = arith.constant 0 : i32
    %c0_i32_0 = arith.constant 0 : i32
    %c0_i32_1 = arith.constant 0 : i32
    return %arg1, %c0_i32, %c0_i32_0 : i32, i32, i32
  }
  func.func @transform_6(%arg0: i32, %arg1: i32) -> (i32, i32, i32) {
    %c0_i32 = arith.constant 0 : i32
    %c0_i32_0 = arith.constant 0 : i32
    %c0_i32_1 = arith.constant 0 : i32
    return %arg1, %c0_i32, %c0_i32_0 : i32, i32, i32
  }
  func.func @transform_7(%arg0: i32, %arg1: i32) -> (i32, i32, i32) {
    %c0_i32 = arith.constant 0 : i32
    %c0_i32_0 = arith.constant 0 : i32
    %c0_i32_1 = arith.constant 0 : i32
    return %arg1, %c0_i32, %c0_i32_0 : i32, i32, i32
  }
  func.func @transform_8(%arg0: i32, %arg1: i32) -> (i32, i32, i32) {
    %c0_i32 = arith.constant 0 : i32
    %c0_i32_0 = arith.constant 0 : i32
    %c0_i32_1 = arith.constant 0 : i32
    return %arg1, %c0_i32, %c0_i32_0 : i32, i32, i32
  }
  func.func @transform_9(%arg0: i32, %arg1: i32) -> (i32, i32, i32) {
    %c0_i32 = arith.constant 0 : i32
    %c0_i32_0 = arith.constant 0 : i32
    %c0_i32_1 = arith.constant 0 : i32
    return %arg1, %c0_i32, %c0_i32_0 : i32, i32, i32
  }
  func.func @transform_10(%arg0: i32, %arg1: i32) -> (i32, i32, i32) {
    %c0_i32 = arith.constant 0 : i32
    %c0_i32_0 = arith.constant 0 : i32
    %c0_i32_1 = arith.constant 0 : i32
    return %arg1, %c0_i32, %c0_i32_0 : i32, i32, i32
  }
  func.func @transform_11(%arg0: i32, %arg1: i32) -> (i32, i32, i32) {
    %c0_i32 = arith.constant 0 : i32
    %c0_i32_0 = arith.constant 0 : i32
    %c0_i32_1 = arith.constant 0 : i32
    return %arg1, %c0_i32, %c0_i32_0 : i32, i32, i32
  }
  func.func @transform_12(%arg0: i32, %arg1: i32) -> (i32, i32, i32) {
    %c0_i32 = arith.constant 0 : i32
    %c0_i32_0 = arith.constant 0 : i32
    %c0_i32_1 = arith.constant 0 : i32
    return %arg1, %c0_i32, %c0_i32_0 : i32, i32, i32
  }
  func.func @transform_13(%arg0: i32, %arg1: i32) -> (i32, i32, i32) {
    %c0_i32 = arith.constant 0 : i32
    %c0_i32_0 = arith.constant 0 : i32
    %c0_i32_1 = arith.constant 0 : i32
    return %arg1, %c0_i32, %c0_i32_0 : i32, i32, i32
  }
  func.func @transform_14(%arg0: i32, %arg1: i32) -> (i32, i32, i32) {
    %c0_i32 = arith.constant 0 : i32
    %c0_i32_0 = arith.constant 0 : i32
    %c0_i32_1 = arith.constant 0 : i32
    return %arg1, %c0_i32, %c0_i32_0 : i32, i32, i32
  }
  func.func @transform_15(%arg0: i32, %arg1: i32) -> (i32, i32, i32) {
    %c0_i32 = arith.constant 0 : i32
    %c0_i32_0 = arith.constant 0 : i32
    %c0_i32_1 = arith.constant 0 : i32
    return %arg1, %c0_i32, %c0_i32_0 : i32, i32, i32
  }
  func.func @transform_16(%arg0: i32, %arg1: i32) -> (i32, i32, i32) {
    %c0_i32 = arith.constant 0 : i32
    %c0_i32_0 = arith.constant 0 : i32
    %c0_i32_1 = arith.constant 0 : i32
    return %arg1, %c0_i32, %c0_i32_0 : i32, i32, i32
  }
  func.func @transform_17(%arg0: i32, %arg1: i32) -> (i32, i32, i32) {
    %c0_i32 = arith.constant 0 : i32
    %c0_i32_0 = arith.constant 0 : i32
    %c0_i32_1 = arith.constant 0 : i32
    return %arg1, %c0_i32, %c0_i32_0 : i32, i32, i32
  }
  func.func @transform_18(%arg0: i32, %arg1: i32) -> (i32, i32, i32) {
    %c0_i32 = arith.constant 0 : i32
    %c0_i32_0 = arith.constant 0 : i32
    %c0_i32_1 = arith.constant 0 : i32
    return %arg1, %c0_i32, %c0_i32_0 : i32, i32, i32
  }
  func.func @transform_19(%arg0: i32, %arg1: i32) -> (i32, i32, i32) {
    %c0_i32 = arith.constant 0 : i32
    %c0_i32_0 = arith.constant 0 : i32
    %c0_i32_1 = arith.constant 0 : i32
    return %arg1, %c0_i32, %c0_i32_0 : i32, i32, i32
  }
  func.func @transform_20(%arg0: i32, %arg1: i32) -> (i32, i32, i32) {
    %c0_i32 = arith.constant 0 : i32
    %c0_i32_0 = arith.constant 0 : i32
    %c0_i32_1 = arith.constant 0 : i32
    return %arg1, %c0_i32, %c0_i32_0 : i32, i32, i32
  }
  func.func @transform_21(%arg0: i32, %arg1: i32) -> (i32, i32, i32) {
    %c0_i32 = arith.constant 0 : i32
    %c0_i32_0 = arith.constant 0 : i32
    %c0_i32_1 = arith.constant 0 : i32
    return %arg1, %c0_i32, %c0_i32_0 : i32, i32, i32
  }
  func.func @transform_22(%arg0: i32, %arg1: i32) -> (i32, i32, i32) {
    %c0_i32 = arith.constant 0 : i32
    %c0_i32_0 = arith.constant 0 : i32
    %c0_i32_1 = arith.constant 0 : i32
    return %arg1, %c0_i32, %c0_i32_0 : i32, i32, i32
  }
  func.func @transform_23(%arg0: i32, %arg1: i32) -> (i32, i32, i32) {
    %c0_i32 = arith.constant 0 : i32
    %c0_i32_0 = arith.constant 0 : i32
    %c0_i32_1 = arith.constant 0 : i32
    return %arg1, %c0_i32, %c0_i32_0 : i32, i32, i32
  }
  func.func @transform_24(%arg0: i32, %arg1: i32) -> (i32, i32, i32) {
    %c0_i32 = arith.constant 0 : i32
    %c0_i32_0 = arith.constant 0 : i32
    %c0_i32_1 = arith.constant 0 : i32
    return %arg0, %c0_i32, %c0_i32_0 : i32, i32, i32
  }
}

</mosaic_0001>

<bundles_post_ra>
// kernel: tpu_custom_call.1
= control target key start
LH: loop header
LB: loop body
LE: loop exit
PB: predicated region body
PF: predicated region fallthrough
CT: control target
= control target key end

     0   :  { %s6697_s0 = inlined_call_operand.hbm [shape: f32[2,16,128], index: 0, kind: input, shape index: {}]   ;;  %s6698_s1 = inlined_call_operand.hbm [shape: bf16[2,16,128], index: 1, kind: input, shape index: {}]   ;;  %s6699_s2 = inlined_call_operand.hbm [shape: f32[2,1,16], index: 2, kind: input, shape index: {}]   ;;  %s6700_s3 = inlined_call_operand.hbm [shape: f32[2,1,16], index: 3, kind: input, shape index: {}]   ;;  %s6701_s4 = inlined_call_operand.hbm [shape: bf16[2,128,384], index: 4, kind: input, shape index: {}]   ;;  %s6702_s5 = inlined_call_operand.vmem [shape: f32[2,1,384], index: 5, kind: input, shape index: {}]   ;;  %s6703_s6 = inlined_call_operand.hbm [shape: bf16[2,128,128], index: 6, kind: input, shape index: {}]   ;;  %s6704_s7 = inlined_call_operand.vmem [shape: f32[2,1,128], index: 7, kind: input, shape index: {}]   ;;  %s6705_s8 = inlined_call_operand.vmem [shape: f32[2,1,128], index: 8, kind: input, shape index: {}]   ;;  %s6706_s9 = inlined_call_operand.vmem [shape: f32[2,1,128], index: 9, kind: input, shape index: {}]   ;;  %s6707_s10 = inlined_call_operand.hbm [shape: bf16[2,128,128], index: 10, kind: input, shape index: {}]   ;;  %s6708_s11 = inlined_call_operand.vmem [shape: f32[2,1,128], index: 11, kind: input, shape index: {}]   ;;  %s6709_s12 = inlined_call_operand.hbm [shape: bf16[2,128,256], index: 12, kind: input, shape index: {}]   ;;  %s6710_s13 = inlined_call_operand.vmem [shape: f32[2,1,256], index: 13, kind: input, shape index: {}]   ;;  %s6711_s14 = inlined_call_operand.hbm [shape: bf16[2,128,128], index: 14, kind: input, shape index: {}]   ;;  %s6712_s15 = inlined_call_operand.vmem [shape: f32[2,1,128], index: 15, kind: input, shape index: {}]   ;;  %s6713_s16 = inlined_call_operand.vmem [shape: f32[2,1,128], index: 16, kind: input, shape index: {}]   ;;  %s6714_s17 = inlined_call_operand.vmem [shape: f32[2,1,128], index: 17, kind: input, shape index: {}]   ;;  %s6715_s18 = inlined_call_operand.hbm [shape: bf16[2,128,256], index: 18, kind: input, shape index: {}]   ;;  %s6716_s19 = inlined_call_operand.vmem [shape: f32[2,1,256], index: 19, kind: input, shape index: {}]   ;;  %s6717_s20 = inlined_call_operand.hbm [shape: bf16[2,256,128], index: 20, kind: input, shape index: {}]   ;;  %s6718_s21 = inlined_call_operand.vmem [shape: f32[2,1,128], index: 21, kind: input, shape index: {}]   ;;  %s6719_s22 = inlined_call_operand.vmem [shape: f32[2,1,128], index: 22, kind: input, shape index: {}]   ;;  %s6720_s23 = inlined_call_operand.vmem [shape: f32[2,1,128], index: 23, kind: input, shape index: {}]   ;;  %s6721_s24 = inlined_call_operand.hbm [shape: bf16[2,16,128], index: 24, kind: output, shape index: {}]  }
   0x1   :  { %6787 = sst [smem:[#allocation58_spill]] %s6697_s0 }
   0x2   :  { %6788 = sst [smem:[#allocation59_spill]] %s6698_s1 }
   0x3   :  { %6789 = sst [smem:[#allocation60_spill]] %s6699_s2 }
   0x4   :  { %6790 = sst [smem:[#allocation61_spill]] %s6700_s3 }
   0x5   :  { %6791 = sst [smem:[#allocation62_spill]] %s6701_s4 }
   0x6   :  { %6792 = sst [smem:[#allocation63_spill]] %s6702_s5 }
   0x7   :  { %6793 = sst [smem:[#allocation64_spill]] %s6703_s6 }
   0x8   :  { %6794 = sst [smem:[#allocation65_spill]] %s6704_s7 }
   0x9   :  { %6795 = sst [smem:[#allocation66_spill]] %s6705_s8 }
   0xa   :  { %6796 = sst [smem:[#allocation67_spill]] %s6706_s9 }
   0xb   :  { %6797 = sst [smem:[#allocation68_spill]] %s6707_s10 }
   0xc   :  { %6798 = sst [smem:[#allocation69_spill]] %s6708_s11 }
   0xd   :  { %6799 = sst [smem:[#allocation70_spill]] %s6709_s12 }
   0xe   :  { %6800 = sst [smem:[#allocation71_spill]] %s6710_s13 }
   0xf   :  { %6801 = sst [smem:[#allocation72_spill]] %s6711_s14 }
  0x10   :  { %6802 = sst [smem:[#allocation73_spill]] %s6712_s15 }
  0x11   :  { %6803 = sst [smem:[#allocation74_spill]] %s6713_s16 }
  0x12   :  { %6804 = sst [smem:[#allocation75_spill]] %s6714_s17 }
  0x13   :  { %6805 = sst [smem:[#allocation76_spill]] %s6715_s18 }
  0x14   :  { %6806 = sst [smem:[#allocation77_spill]] %s6716_s19 }
  0x15   :  { %6807 = sst [smem:[#allocation78_spill]] %s6717_s20 }
  0x16   :  { %6808 = sst [smem:[#allocation79_spill]] %s6718_s21 }
  0x17   :  { %6809 = sst [smem:[#allocation80_spill]] %s6719_s22 }
  0x18   :  { %6810 = sst [smem:[#allocation81_spill]] %s6720_s23 }
  0x19   :  { %6811 = sst [smem:[#allocation82_spill]] %s6721_s24 }
  0x1a   :  { %29 = vsyncpa [#allocation5], 0 }
  0x1b   :  { %31 = vsyncpa [#allocation5 + $0x1], 0 }
  0x1c   :  { %32 = vsyncpa [#allocation8], 0 }
  0x1d   :  { %34 = vsyncpa [#allocation8 + $0x1], 0 }
  0x1e   :  { %35 = vsyncpa [#allocation11], 0 }
  0x1f   :  { %37 = vsyncpa [#allocation11 + $0x1], 0 }
  0x20   :  { %38 = vsyncpa [#allocation14], 0 }
  0x21   :  { %40 = vsyncpa [#allocation14 + $0x1], 0 }
  0x22   :  { %41 = vsyncpa [#allocation17], 0 }
  0x23   :  { %43 = vsyncpa [#allocation17 + $0x1], 0 }
  0x24   :  { %44 = vsyncpa [#allocation20], 0 }
  0x25   :  { %46 = vsyncpa [#allocation20 + $0x1], 0 }
  0x26   :  { %47 = vsyncpa [#allocation6], 0 }
  0x27   :  { %49 = vsyncpa [#allocation6 + $0x1], 0  ;;  %s5535_s5 = smov 0   ;;  %s5537_s26 = smov 0  }
  0x28   :  { %s5539_s27 = smov 0   ;;  %s5541_s28 = smov 0  }
  0x29   :  { %s5543_s6 = smov 0   ;;  %s5545_s2 = smov 0  }
  0x2a   :  { %s5547_s29 = smov 0   ;;  %s5549_s0 = smov 0  }
  0x2b   :  { %s5551_s7 = smov 0   ;;  %s5553_s30 = smov 0  }
  0x2c   :  { %s5555_s3 = smov 0  }
  0x2d LB: > { %6812 = sst [smem:[#allocation31_spill]] %s5347_s26  ;;  %s5591_s25 = sadd.s32 4294967295, %s5383_s3   ;;  %s5383_s3 = sphi %s5555_s3, %s55_s3   ;;  %s5379_s30 = sphi %s5553_s30, %s6949_s30   ;;  %s5375_s7 = sphi %s5551_s7, %s6948_s7   ;;  %s5371_s0 = sphi %s5549_s0, %s6947_s0   ;;  %s5367_s29 = sphi %s5547_s29, %s6946_s29   ;;  %s5363_s2 = sphi %s5545_s2, %s6945_s2   ;;  %s5359_s6 = sphi %s5543_s6, %s6944_s6   ;;  %s5355_s28 = sphi %s5541_s28, %s6943_s28   ;;  %s5351_s27 = sphi %s5539_s27, %s6942_s27   ;;  %s5347_s26 = sphi %s5537_s26, %s6941_s26   ;;  %s5343_s5 = sphi %s5535_s5, %s6940_s5  }
  0x2e   : > { %6813 = sst [smem:[#allocation32_spill]] %s5351_s27  ;;  %s4085_s8 = sadd.s32 4294967294, %s5383_s3  }
  0x2f   : > { %6814 = sst [smem:[#allocation33_spill]] %s5355_s28  ;;  %p81_p0 = scmp.ne.s32.totalorder %s5363_s2, %s5359_s6 }
  0x30   : > { %6815 = sst [smem:[#allocation34_spill]] %s5359_s6  ;;  %p6735_p1 = scmp.eq.s32.totalorder %s5383_s3, 0 }
  0x31   : > { %6816 = sst [smem:[#allocation35_spill]] %s5363_s2  ;;  %p87_p2 = scmp.ne.s32.totalorder %s5359_s6, %s5355_s28 }
  0x32   : > { %6817 = sst [smem:[#allocation36_spill]] %s5367_s29  ;;  %p6734_p3 = scmp.eq.s32.totalorder %s5591_s25, 0 }
  0x33   : > { %6818 = sst [smem:[#allocation37_spill]] %s5371_s0  ;;  %p83_p4 = por %p6735_p1, %p81_p0 }
  0x34   : > { %6819 = sst [smem:[#allocation38_spill]] %s5375_s7  ;;  %p709_p5 = scmp.eq.s32.totalorder %s5591_s25, 3 }
  0x35   : > { %6820 = sst [smem:[#allocation39_spill]] %s5379_s30  ;;  %p5607_p6 = por %p6734_p3, %p87_p2 }
  0x36   : > { %6821 = sst [smem:[#allocation40_spill]] %s5383_s3  ;;  %p715_p7 = scmp.eq.s32.totalorder %s4085_s8, 3 }
  0x37   : > { %6822 = sst [smem:[#allocation41_spill]] %s5591_s25  ;;  %p5611_p8 = por %p709_p5, %p81_p0 }
  0x38   : > { %s6823_s24 = scalar_select %p5607_p6, 1, 0 }
  0x39   : > { %s6825_s0 = scalar_select %p5611_p8, 1, 0 }
  0x3a   : > { %6824 = sst [smem:[#allocation42_spill]] %s6823_s24  ;;  %p5615_p9 = por %p715_p7, %p87_p2 }
  0x3b   : > { %6826 = sst [smem:[#allocation43_spill]] %s6825_s0  ;;  %p6733_p10 = scmp.lt.s32.totalorder %s5383_s3, 4 }
  0x3c   : > { %s6827_s1 = scalar_select %p5615_p9, 1, 0 }
  0x3d   : > { %s5621_s4 = sand.u32 1, %s5363_s2   ;;  %s5624_s28 = sand.u32 1, %s5383_s3  }
  0x3e   : > { %6828 = sst [smem:[#allocation44_spill]] %s6827_s1  ;;  %p5628_p11 = pnand %p6733_p10, %p83_p4 }
  0x3f   : > { %s4091_s8 = sshll.u32 %s5621_s4, 3  ;;  %s4260_s22 = sshll.u32 %s5379_s30, 7 }
  0x40   : > { %s6829_s23 = scalar_select %p5628_p11, 1, 0 }
  0x41   : > { %s6830_s19 = sld [smem:[#allocation59_spill]]  ;;  %s760_s1 = scalar_lea.vmem [#allocation7], %s4091_s8 }
  0x42   : > { %s767_s16 = sshll.u32 %s760_s1, 4  ;;  %p5647_p0 = pneg %p5628_p11  ;;  %s5639_s16 = int_to_ptr.vmem [resolvable:$true] %s767_s16 }
  0x44   : > { %s6831_s11 = scalar_select %p5647_p0, 1, 0 }
  0x47   : > { %s5637_s17 = scalar_lea.hbm %s6830_s19, %s4260_s22  ;;  %s4912_s0 = scalar_lea.hbm %s6830_s19, 256 }
  0x48   : > { %s4907_s15 = scalar_lea.hbm %s5637_s17, 128  ;;  %p4913_p5 = scmp.lt.u32.totalorder %s5637_s17, %s6830_s19 }
  0x49   : > { %p4908_p13 = scmp.ne.s32.totalorder %s5637_s17, %s4907_s15  ;;  %p4914_p7 = scmp.lt.u32.totalorder %s4912_s0, %s4907_s15 }
  0x4a   : > { %p4916_p3 = scmp.lt.u32.totalorder %s4907_s15, %s5637_s17 }
  0x4b   : > { %p4910_p2 = pnand %p5647_p0, %p4908_p13  ;;  %p4915_p10 = por %p4914_p7, %p4913_p5 }
  0x4d   : > { %p4911_p4 = pneg %p4910_p2  ;;  %p4917_p1 = por %p4916_p3, %p4915_p10 }
  0x4f   : > { %p4918_p12 = pnand %p4917_p1, %p4911_p4 }
  0x51   : > { %4921 = shalt.err (!%p4918_p12)
}
  0x52   : > { %s4922_s13 = scalar_lea.vmem %s5639_s16, 128  ;;  %s5385_s21 = smov [#allocation7]  }
  0x53   : > { %p4923_p13 = scmp.ne.s32.totalorder %s5639_s16, %s4922_s13  ;;  %s4927_s22 = sshll.u32 %s5385_s21, 4  ;;  %s4928_s22 = int_to_ptr.vmem [resolvable:$false] %s4927_s22 }
  0x54   : > { %s4929_s1 = scalar_lea.vmem %s4928_s22, 256  ;;  %p4930_p8 = scmp.lt.s32.totalorder %s5639_s16, %s4928_s22 }
  0x55   : > { %p4925_p2 = pnand %p4923_p13, %p5647_p0  ;;  %p4931_p6 = scmp.lt.s32.totalorder %s4929_s1, %s4922_s13 }
  0x57   : > { %p4926_p9 = pneg %p4925_p2  ;;  %p4932_p5 = por %p4931_p6, %p4930_p8 }
  0x59   : > { %p4933_p7 = pnand %p4932_p5, %p4926_p9 }
  0x5b   : > { %4936 = shalt.err (!%p4933_p7)
}
  0x5c   : > { %s6745_s15 = smov 64   ;;  %s6747_s0 = smov 4  }
  0x5d   : > { %s6832_s13 = scalar_lea.sflag [#allocation8], %s5624_s28  ;;  %p1037_p1 = scmp.lt.s32.totalorder %s5383_s3, 5 }
  0x5e   : > { %4575 = dma.hbm_to_vmem [thread:$0]  (!%p5628_p11), %s5637_s17, 128, %s5639_s16, %s6832_s13, %s6745_s15, %s6745_s15, %s6747_s0  }
  0x5f   : > { %s4094_s8 = sshll.u32 %s5379_s30, 4  ;;  %s6833_s1 = sld [smem:[#allocation60_spill]] }
  0x60   : > { %p6834_p3 = scmp.ge.s32.totalorder %s5383_s3, 1  ;;  %s6837_s6 = sld [smem:[#allocation61_spill]] }
  0x61   : > { %s797_s16 = scalar_lea.vmem [#allocation10], %s5621_s4  ;;  %s6751_s13 = scalar_lea.sflag [#allocation11], %s5624_s28 }
  0x62   : > { %p5684_p6 = pnand %p6834_p3, %p1037_p1  ;;  %s804_s17 = sshll.u32 %s797_s16, 4  ;;  %s805_s17 = int_to_ptr.vmem [resolvable:$true] %s804_s17 }
  0x64   : > { %s6835_s9 = scalar_select %p5684_p6, 1, 0 }
  0x65   : > { %s5680_s19 = scalar_lea.hbm %s6833_s1, %s4094_s8 }
  0x66   : > { %6836 = sst [smem:[#allocation45_spill]] %s6835_s9  ;;  %s6838_s20 = smov %s6837_s6 }
  0x67   : > { %s5691_s14 = scalar_lea.hbm %s6837_s6, %s4094_s8  ;;  %s4942_s0 = scalar_lea.hbm %s6838_s20, 32 }
  0x68   : > { %s4937_s21 = scalar_lea.hbm %s5691_s14, 16  ;;  %p4943_p12 = scmp.lt.u32.totalorder %s5691_s14, %s6838_s20 }
  0x69   : > { %p4938_p8 = scmp.ne.s32.totalorder %s5691_s14, %s4937_s21  ;;  %p4944_p4 = scmp.lt.u32.totalorder %s4942_s0, %s4937_s21 }
  0x6a   : > { %p4946_p2 = scmp.lt.u32.totalorder %s4937_s21, %s5691_s14 }
  0x6b   : > { %p4940_p9 = pnand %p4938_p8, %p5647_p0  ;;  %p4945_p13 = por %p4944_p4, %p4943_p12 }
  0x6d   : > { %p4941_p10 = pneg %p4940_p9  ;;  %p4947_p5 = por %p4946_p2, %p4945_p13 }
  0x6f   : > { %p4948_p7 = pnand %p4947_p5, %p4941_p10 }
  0x71   : > { %4951 = shalt.err (!%p4948_p7)
}
  0x72   : > { %s4952_s29 = scalar_lea.vmem %s805_s17, 16  ;;  %s5388_s8 = smov [#allocation10]  }
  0x73   : > { %p4953_p1 = scmp.ne.s32.totalorder %s805_s17, %s4952_s29  ;;  %s4957_s16 = sshll.u32 %s5388_s8, 4  ;;  %s4958_s16 = int_to_ptr.vmem [resolvable:$false] %s4957_s16 }
  0x74   : > { %s4959_s15 = scalar_lea.vmem %s4958_s16, 32  ;;  %p4960_p9 = scmp.lt.s32.totalorder %s805_s17, %s4958_s16 }
  0x75   : > { %p4955_p3 = pnand %p4953_p1, %p5647_p0  ;;  %p4961_p6 = scmp.lt.s32.totalorder %s4959_s15, %s4952_s29 }
  0x77   : > { %p4956_p8 = pneg %p4955_p3  ;;  %p4962_p11 = por %p4961_p6, %p4960_p9 }
  0x79   : > { %p4963_p4 = pnand %p4962_p11, %p4956_p8 }
  0x7b   : > { %4966 = shalt.err (!%p4963_p4)
}
  0x7c   : > { %p6839_p12 = scmp.ne.s32.totalorder %s6829_s23, 0  ;;  %s64_s0 = sadd.s32 1, %s5375_s7 }
  0x7d   : > { %p65_p11 = scmp.ge.s32.totalorder %s64_s0, 2  ;;  %s178_s21 = sadd.s32 1, %s5351_s27 }
  0x7e   : > { %4581 = dma.hbm_to_vmem [thread:$0]  (!%p6839_p12), %s5691_s14, 16, %s805_s17, %s6751_s13  }
  0x7f   : > { %p185_p6 = scmp.ne.s32.totalorder %s5351_s27, %s5347_s26  ;;  %p191_p10 = scmp.ne.s32.totalorder %s5347_s26, %s5343_s5 }
  0x80   : > { %s6951_s0 = smov (%p65_p11, %s64_s0), 0  ;;  %s6841_s22 = sadd.s32 1, %s5379_s30 }
  0x81   : > { %6840 = sst [smem:[#allocation46_spill]] %s6951_s0  ;;  %s6953_s22 = smov (!%p65_p11, %s6841_s22), %s5379_s30 }
  0x82   : > { %s175_s24 = ssub.s32 %s5375_s7, %s6951_s0  ;;  %p6842_p13 = scmp.eq.s32.totalorder %s5383_s3, 0 }
  0x83   : > { %p69_p5 = scmp.ge.s32.totalorder %s6953_s22, 2  ;;  %p176_p7 = scmp.eq.s32.totalorder %s175_s24, 0 }
  0x84   : > { %p187_p2 = por %p185_p6, %p6842_p13  ;;  %p6843_p1 = scmp.eq.s32.totalorder %s5591_s25, 0 }
  0x85   : > { %s5736_s17 = sand.u32 1, %s5351_s27   ;;  %s6955_s22 = smov (%p69_p5, %s6953_s22), 0 }
  0x86   : > { %p5731_p3 = por %p191_p10, %p6843_p1  ;;  %6846 = sst [smem:[#allocation48_spill]] %s6955_s22 }
  0x87   : > { %s5741_s5 = scalar_select %p176_p7, %s5351_s27, %s178_s21  }
  0x88   : > { %s6844_s14 = scalar_select %p5731_p3, 1, 0 }
  0x89   : > { %6847 = sst [smem:[#allocation49_spill]] %s5741_s5  ;;  %s71_s6 = ssub.s32 %s5379_s30, %s6955_s22 }
  0x8a   : > { %6845 = sst [smem:[#allocation47_spill]] %s6844_s14  ;;  %p6848_p8 = scmp.lt.s32.totalorder %s5383_s3, 4 }
  0x8b   : > { %p72_p4 = scmp.eq.s32.totalorder %s71_s6, 0  ;;  %s5752_s8 = sshll.u32 %s5736_s17, 6 }
  0x8c   : > { %p5747_p9 = pnand %p6848_p8, %p187_p2  ;;  %s6850_s16 = sadd.s32 1, %s5363_s2 }
  0x8d   : > { %s5757_s15 = scalar_select %p72_p4, %s5363_s2, %s6850_s16  }
  0x8e   : > { %s6849_s29 = scalar_select %p5747_p9, 1, 0 }
  0x8f   : > { %6851 = sst [smem:[#allocation50_spill]] %s5757_s15  ;;  %s5760_s24 = sshll.u32 %s5375_s7, 10 }
  0x90   : > { %s6852_s20 = sld [smem:[#allocation64_spill]]  ;;  %s843_s0 = scalar_lea.vmem [#allocation13], %s5752_s8 }
  0x91   : > { %s850_s6 = sshll.u32 %s843_s0, 4  ;;  %p5776_p6 = pneg %p5747_p9  ;;  %s5769_s6 = int_to_ptr.vmem [resolvable:$true] %s850_s6 }
  0x93   : > { %s6853_s16 = scalar_select %p5776_p6, 1, 0 }
  0x96   : > { %s5766_s22 = scalar_lea.hbm %s6852_s20, %s5760_s24  ;;  %s4972_s15 = scalar_lea.hbm %s6852_s20, 2048 }
  0x97   : > { %s4967_s27 = scalar_lea.hbm %s5766_s22, 1024  ;;  %p4973_p2 = scmp.lt.u32.totalorder %s5766_s22, %s6852_s20 }
  0x98   : > { %p4968_p11 = scmp.ne.s32.totalorder %s5766_s22, %s4967_s27  ;;  %p4974_p5 = scmp.lt.u32.totalorder %s4972_s15, %s4967_s27 }
  0x99   : > { %p4976_p1 = scmp.lt.u32.totalorder %s4967_s27, %s5766_s22 }
  0x9a   : > { %p4970_p10 = pnand %p5776_p6, %p4968_p11  ;;  %p4975_p7 = por %p4974_p5, %p4973_p2 }
  0x9c   : > { %p4971_p13 = pneg %p4970_p10  ;;  %p4977_p8 = por %p4976_p1, %p4975_p7 }
  0x9e   : > { %p4978_p4 = pnand %p4977_p8, %p4971_p13 }
  0xa0   : > { %4981 = shalt.err (!%p4978_p4)
}
  0xa1   : > { %s4982_s5 = scalar_lea.vmem %s5769_s6, 1024  ;;  %s5389_s13 = smov [#allocation13]  }
  0xa2   : > { %p4983_p11 = scmp.ne.s32.totalorder %s5769_s6, %s4982_s5  ;;  %s4987_s21 = sshll.u32 %s5389_s13, 4  ;;  %s4988_s21 = int_to_ptr.vmem [resolvable:$false] %s4987_s21 }
  0xa3   : > { %s4989_s2 = scalar_lea.vmem %s4988_s21, 2048  ;;  %p4990_p12 = scmp.lt.s32.totalorder %s5769_s6, %s4988_s21 }
  0xa4   : > { %p4985_p10 = pnand %p4983_p11, %p5776_p6  ;;  %p4991_p0 = scmp.lt.s32.totalorder %s4989_s2, %s4982_s5 }
  0xa6   : > { %p4986_p3 = pneg %p4985_p10  ;;  %p4992_p2 = por %p4991_p0, %p4990_p12 }
  0xa8   : > { %p4993_p5 = pnand %p4992_p2, %p4986_p3 }
  0xaa   : > { %4996 = shalt.err (!%p4993_p5)
}
  0xab   : > { %s6854_s27 = smov 4   ;;  %s6855_s15 = smov 64  }
  0xac   : > { %s6856_s0 = scalar_lea.sflag [#allocation14], %s5624_s28  ;;  %s5805_s13 = sshll.u32 %s5736_s17, 7 }
  0xad   : > { %4587 = dma.hbm_to_vmem [thread:$0]  (!%p5747_p9), %s5766_s22, 1024, %s5769_s6, %s6856_s0, %s6855_s15, %s6855_s15, %s6854_s27  }
  0xae   : > { %6857 = sst [smem:[#allocation51_spill]] %s5805_s13  ;;  %s5808_s5 = sshll.u32 %s5375_s7, 11 }
  0xaf   : > { %6858 = sst [smem:[#allocation52_spill]] %s5808_s5  ;;  %s6859_s12 = sld [smem:[#allocation70_spill]] }
  0xb0   : > { %s909_s3 = scalar_lea.vmem [#allocation16], %s5805_s13  ;;  %s6768_s22 = scalar_lea.sflag [#allocation17], %s5624_s28 }
  0xb1   : > { %s916_s14 = sshll.u32 %s909_s3, 4  ;;  %s5817_s14 = int_to_ptr.vmem [resolvable:$true] %s916_s14 }
  0xb5   : > { %s5814_s20 = scalar_lea.hbm %s6859_s12, %s5808_s5  ;;  %s5002_s21 = scalar_lea.hbm %s6859_s12, 4096 }
  0xb6   : > { %s4997_s6 = scalar_lea.hbm %s5814_s20, 2048  ;;  %p5003_p13 = scmp.lt.u32.totalorder %s5814_s20, %s6859_s12 }
  0xb7   : > { %p4998_p0 = scmp.ne.s32.totalorder %s5814_s20, %s4997_s6  ;;  %p5004_p7 = scmp.lt.u32.totalorder %s5002_s21, %s4997_s6 }
  0xb8   : > { %p5006_p8 = scmp.lt.u32.totalorder %s4997_s6, %s5814_s20 }
  0xb9   : > { %p5000_p12 = pnand %p4998_p0, %p5776_p6  ;;  %p5005_p1 = por %p5004_p7, %p5003_p13 }
  0xbb   : > { %p5001_p3 = pneg %p5000_p12  ;;  %p5007_p4 = por %p5006_p8, %p5005_p1 }
  0xbd   : > { %p5008_p11 = pnand %p5007_p4, %p5001_p3 }
  0xbf   : > { %5011 = shalt.err (!%p5008_p11)
}
  0xc0   : > { %s5012_s3 = scalar_lea.vmem %s5817_s14, 2048  ;;  %s5390_s26 = smov [#allocation16]  }
  0xc1   : > { %p5013_p10 = scmp.ne.s32.totalorder %s5817_s14, %s5012_s3  ;;  %s5017_s0 = sshll.u32 %s5390_s26, 4  ;;  %s5018_s0 = int_to_ptr.vmem [resolvable:$false] %s5017_s0 }
  0xc2   : > { %s5019_s25 = scalar_lea.vmem %s5018_s0, 4096  ;;  %p5020_p0 = scmp.lt.s32.totalorder %s5817_s14, %s5018_s0 }
  0xc3   : > { %p5015_p2 = pnand %p5013_p10, %p5776_p6  ;;  %p5021_p12 = scmp.lt.s32.totalorder %s5019_s25, %s5012_s3 }
  0xc5   : > { %p5016_p5 = pneg %p5015_p2  ;;  %p5022_p13 = por %p5021_p12, %p5020_p0 }
  0xc7   : > { %p5023_p7 = pnand %p5022_p13, %p5016_p5 }
  0xc9   : > { %5026 = shalt.err (!%p5023_p7)
}
  0xca   : > { %s5391_s6 = smov 128   ;;  %s5392_s21 = smov 8  }
  0xcb   : > { %4593 = dma.hbm_to_vmem [thread:$0]  (!%p5747_p9), %s5814_s20, 2048, %s5817_s14, %s6768_s22, %s5391_s6, %s5391_s6, %s5392_s21  }
  0xcc   : > { %s6860_s18 = sld [smem:[#allocation76_spill]]  ;;  %s976_s0 = scalar_lea.vmem [#allocation19], %s5805_s13 }
  0xcd   : > { %s983_s25 = sshll.u32 %s976_s0, 4  ;;  %s6771_s12 = scalar_lea.sflag [#allocation20], %s5624_s28  ;;  %s5853_s25 = int_to_ptr.vmem [resolvable:$true] %s983_s25 }
  0xd2   : > { %s5850_s26 = scalar_lea.hbm %s6860_s18, %s5808_s5  ;;  %s5032_s2 = scalar_lea.hbm %s6860_s18, 4096 }
  0xd3   : > { %s5027_s9 = scalar_lea.hbm %s5850_s26, 2048  ;;  %p5033_p4 = scmp.lt.u32.totalorder %s5850_s26, %s6860_s18 }
  0xd4   : > { %p5028_p3 = scmp.ne.s32.totalorder %s5850_s26, %s5027_s9  ;;  %p5034_p11 = scmp.lt.u32.totalorder %s5032_s2, %s5027_s9 }
  0xd5   : > { %p5036_p2 = scmp.lt.u32.totalorder %s5027_s9, %s5850_s26 }
  0xd6   : > { %p5030_p1 = pnand %p5028_p3, %p5776_p6  ;;  %p5035_p10 = por %p5034_p11, %p5033_p4 }
  0xd8   : > { %p5031_p8 = pneg %p5030_p1  ;;  %p5037_p5 = por %p5036_p2, %p5035_p10 }
  0xda   : > { %p5038_p0 = pnand %p5037_p5, %p5031_p8 }
  0xdc   : > { %5041 = shalt.err (!%p5038_p0)
}
  0xdd   : > { %s5042_s0 = scalar_lea.vmem %s5853_s25, 2048  ;;  %s5393_s20 = smov [#allocation19]  }
  0xde   : > { %p5043_p12 = scmp.ne.s32.totalorder %s5853_s25, %s5042_s0  ;;  %s5047_s14 = sshll.u32 %s5393_s20, 4  ;;  %s5048_s14 = int_to_ptr.vmem [resolvable:$false] %s5047_s14 }
  0xdf   : > { %s5049_s22 = scalar_lea.vmem %s5048_s14, 4096  ;;  %p5050_p3 = scmp.lt.s32.totalorder %s5853_s25, %s5048_s14 }
  0xe0   : > { %p5045_p13 = pnand %p5043_p12, %p5776_p6  ;;  %p5051_p1 = scmp.lt.s32.totalorder %s5049_s22, %s5042_s0 }
  0xe2   : > { %p5046_p7 = pneg %p5045_p13  ;;  %p5052_p4 = por %p5051_p1, %p5050_p3 }
  0xe4   : > { %p5053_p11 = pnand %p5052_p4, %p5046_p7 }
  0xe6   : > { %5056 = shalt.err (!%p5053_p11)
}
  0xe7   : > { %4599 = dma.hbm_to_vmem [thread:$0]  (!%p5747_p9), %s5850_s26, 2048, %s5853_s25, %s6771_s12, %s5391_s6, %s5391_s6, %s5392_s21  }
  0xe8   : > { %s4088_s9 = sshll.u32 %s5621_s4, 4  ;;  %s4259_s2 = sshll.u32 %s5379_s30, 8 }
  0xe9   : > { %s6861_s20 = sld [smem:[#allocation58_spill]]  ;;  %s739_s22 = scalar_lea.vmem [#allocation4], %s4088_s9 }
  0xea   : > { %s746_s18 = sshll.u32 %s739_s22, 4  ;;  %s780_s13 = scalar_lea.vmem [#allocation9], %s5621_s4  ;;  %s5889_s18 = int_to_ptr.vmem [resolvable:$true] %s746_s18 }
  0xeb   : > { %s5892_s5 = sshll.u32 %s780_s13, 4  ;;  %s736_s15 = scalar_lea.sflag [#allocation5], %s5621_s4  ;;  %s788_s5 = int_to_ptr.vmem [resolvable:$true] %s5892_s5 }
  0xec   : > { %p6862_p10 = scmp.ne.s32.totalorder %s6831_s11, 0 }
  0xef   : > { %s5887_s14 = scalar_lea.hbm %s6861_s20, %s4259_s2  ;;  %s5062_s3 = scalar_lea.hbm %s6861_s20, 512 }
  0xf0   : > { %s5057_s26 = scalar_lea.hbm %s5887_s14, 256  ;;  %p5063_p0 = scmp.lt.u32.totalorder %s5887_s14, %s6861_s20 }
  0xf1   : > { %p5058_p8 = scmp.ne.s32.totalorder %s5887_s14, %s5057_s26  ;;  %p5064_p12 = scmp.lt.u32.totalorder %s5062_s3, %s5057_s26 }
  0xf2   : > { %p5066_p7 = scmp.lt.u32.totalorder %s5057_s26, %s5887_s14 }
  0xf3   : > { %p5060_p2 = pnand %p5058_p8, %p6862_p10  ;;  %p5065_p13 = por %p5064_p12, %p5063_p0 }
  0xf5   : > { %p5061_p5 = pneg %p5060_p2  ;;  %p5067_p3 = por %p5066_p7, %p5065_p13 }
  0xf7   : > { %p5068_p1 = pnand %p5067_p3, %p5061_p5 }
  0xf9   : > { %5071 = shalt.err (!%p5068_p1)
}
  0xfa   : > { %s5072_s13 = scalar_lea.vmem %s5889_s18, 256  ;;  %s5394_s9 = smov [#allocation4]  }
  0xfb   : > { %p5073_p4 = scmp.ne.s32.totalorder %s5889_s18, %s5072_s13  ;;  %s5077_s22 = sshll.u32 %s5394_s9, 4  ;;  %s5078_s22 = int_to_ptr.vmem [resolvable:$false] %s5077_s22 }
  0xfc   : > { %s5079_s12 = scalar_lea.vmem %s5078_s22, 512  ;;  %p5080_p2 = scmp.lt.s32.totalorder %s5889_s18, %s5078_s22 }
  0xfd   : > { %p5075_p11 = pnand %p5073_p4, %p6862_p10  ;;  %p5081_p9 = scmp.lt.s32.totalorder %s5079_s12, %s5072_s13 }
  0xff   : > { %p5076_p8 = pneg %p5075_p11  ;;  %p5082_p0 = por %p5081_p9, %p5080_p2 }
 0x101   : > { %p5083_p12 = pnand %p5082_p0, %p5076_p8 }
 0x103   : > { %5086 = shalt.err (!%p5083_p12)
}
 0x104   : > { %p6863_p5 = scmp.ne.s32.totalorder %s6829_s23, 0  ;;  %s4541_s26 = smul.u32 192, %s5736_s17 }
 0x105   : > { %s5087_s25 = scalar_lea.hbm %s5680_s19, 16  ;;  %s5092_s4 = scalar_lea.hbm %s6833_s1, 32 }
 0x106   : > { %4572 = dma.hbm_to_vmem [thread:$0]  (!%p6863_p5), %s5887_s14, 256, %s5889_s18, %s736_s15, %s5391_s6, %s5391_s6, %s5392_s21  }
 0x107   : > { %p5088_p9 = scmp.ne.s32.totalorder %s5680_s19, %s5087_s25  ;;  %p5093_p3 = scmp.lt.u32.totalorder %s5680_s19, %s6833_s1 }
 0x108   : > { %p5094_p1 = scmp.lt.u32.totalorder %s5092_s4, %s5087_s25  ;;  %p5096_p11 = scmp.lt.u32.totalorder %s5087_s25, %s5680_s19 }
 0x109   : > { %p5090_p13 = pnand %p5088_p9, %p6862_p10 }
 0x10a   : > { %p5095_p4 = por %p5094_p1, %p5093_p3 }
 0x10b   : > { %p5091_p7 = pneg %p5090_p13 }
 0x10c   : > { %p5097_p8 = por %p5096_p11, %p5095_p4 }
 0x10e   : > { %p5098_p2 = pnand %p5097_p8, %p5091_p7 }
 0x110   : > { %5101 = shalt.err (!%p5098_p2)
}
 0x111   : > { %s5102_s18 = scalar_lea.vmem %s788_s5, 16  ;;  %s5395_s17 = smov [#allocation9]  }
 0x112   : > { %p5103_p0 = scmp.ne.s32.totalorder %s788_s5, %s5102_s18  ;;  %s5107_s15 = sshll.u32 %s5395_s17, 4  ;;  %s5108_s15 = int_to_ptr.vmem [resolvable:$false] %s5107_s15 }
 0x113   : > { %s5109_s6 = scalar_lea.vmem %s5108_s15, 32  ;;  %p5110_p13 = scmp.lt.s32.totalorder %s788_s5, %s5108_s15 }
 0x114   : > { %p5105_p12 = pnand %p5103_p0, %p6862_p10  ;;  %p5111_p6 = scmp.lt.s32.totalorder %s5109_s6, %s5102_s18 }
 0x116   : > { %p5106_p9 = pneg %p5105_p12  ;;  %p5112_p5 = por %p5111_p6, %p5110_p13 }
 0x118   : > { %p5113_p1 = pnand %p5112_p5, %p5106_p9 }
 0x11a   : > { %5116 = shalt.err (!%p5113_p1)
}
 0x11b   : > { %p6864_p3 = scmp.ne.s32.totalorder %s6829_s23, 0  ;;  %s6865_s21 = scalar_lea.sflag [#allocation8], %s5624_s28 }
 0x11c   : > { %s4542_s11 = smul.u32 3072, %s5375_s7  ;;  %s815_s14 = scalar_lea.vmem [#allocation12], %s4541_s26 }
 0x11d   : > { %4578 = dma.hbm_to_vmem [thread:$0]  (!%p6864_p3), %s5680_s19, 16, %s788_s5, %s6865_s21  }
 0x11e   : > { %s822_s9 = sshll.u32 %s815_s14, 4  ;;  %s6866_s25 = sld [smem:[#allocation62_spill]]  ;;  %s5948_s9 = int_to_ptr.vmem [resolvable:$true] %s822_s9 }
 0x11f   : > { %p6867_p10 = scmp.ne.s32.totalorder %s6853_s16, 0 }
 0x124   : > { %s5946_s2 = scalar_lea.hbm %s6866_s25, %s4542_s11  ;;  %s5122_s26 = scalar_lea.hbm %s6866_s25, 6144 }
 0x125   : > { %s5117_s23 = scalar_lea.hbm %s5946_s2, 3072  ;;  %p5123_p4 = scmp.lt.u32.totalorder %s5946_s2, %s6866_s25 }
 0x126   : > { %p5118_p6 = scmp.ne.s32.totalorder %s5946_s2, %s5117_s23  ;;  %p5124_p11 = scmp.lt.u32.totalorder %s5122_s26, %s5117_s23 }
 0x127   : > { %p5126_p2 = scmp.lt.u32.totalorder %s5117_s23, %s5946_s2 }
 0x128   : > { %p5120_p5 = pnand %p5118_p6, %p6867_p10  ;;  %p5125_p8 = por %p5124_p11, %p5123_p4 }
 0x12a   : > { %p5121_p7 = pneg %p5120_p5  ;;  %p5127_p0 = por %p5126_p2, %p5125_p8 }
 0x12c   : > { %p5128_p12 = pnand %p5127_p0, %p5121_p7 }
 0x12e   : > { %5131 = shalt.err (!%p5128_p12)
}
 0x12f   : > { %s5132_s0 = scalar_lea.vmem %s5948_s9, 3072  ;;  %s5396_s13 = smov [#allocation12]  }
 0x130   : > { %p5133_p9 = scmp.ne.s32.totalorder %s5948_s9, %s5132_s0  ;;  %s5137_s18 = sshll.u32 %s5396_s13, 4  ;;  %s5138_s18 = int_to_ptr.vmem [resolvable:$false] %s5137_s18 }
 0x131   : > { %s5139_s17 = scalar_lea.vmem %s5138_s18, 6144  ;;  %p5140_p3 = scmp.lt.s32.totalorder %s5948_s9, %s5138_s18 }
 0x132   : > { %p5135_p13 = pnand %p5133_p9, %p6867_p10  ;;  %p5141_p6 = scmp.lt.s32.totalorder %s5139_s17, %s5132_s0 }
 0x134   : > { %p5136_p1 = pneg %p5135_p13  ;;  %p5142_p5 = por %p5141_p6, %p5140_p3 }
 0x136   : > { %p5143_p4 = pnand %p5142_p5, %p5136_p1 }
 0x138   : > { %5146 = shalt.err (!%p5143_p4)
}
 0x139   : > { %s5397_s15 = smov 192   ;;  %s5398_s6 = smov 12  }
 0x13a   : > { %p6868_p7 = scmp.ne.s32.totalorder %s6849_s29, 0  ;;  %s6869_s21 = scalar_lea.sflag [#allocation11], %s5624_s28 }
 0x13b   : > { %s6870_s10 = sld [smem:[#allocation68_spill]]  ;;  %s882_s12 = scalar_lea.vmem [#allocation15], %s5752_s8 }
 0x13c   : > { %4584 = dma.hbm_to_vmem [thread:$0]  (!%p6868_p7), %s5946_s2, 3072, %s5948_s9, %s6869_s21, %s5397_s15, %s5397_s15, %s5398_s6  }
 0x13d   : > { %s889_s23 = sshll.u32 %s882_s12, 4  ;;  %s5980_s23 = int_to_ptr.vmem [resolvable:$true] %s889_s23 }
 0x141   : > { %s5977_s22 = scalar_lea.hbm %s6870_s10, %s5760_s24  ;;  %s5152_s2 = scalar_lea.hbm %s6870_s10, 2048 }
 0x142   : > { %s5147_s19 = scalar_lea.hbm %s5977_s22, 1024  ;;  %p5153_p0 = scmp.lt.u32.totalorder %s5977_s22, %s6870_s10 }
 0x143   : > { %p5148_p11 = scmp.ne.s32.totalorder %s5977_s22, %s5147_s19  ;;  %p5154_p12 = scmp.lt.u32.totalorder %s5152_s2, %s5147_s19 }
 0x144   : > { %p5156_p13 = scmp.lt.u32.totalorder %s5147_s19, %s5977_s22 }
 0x145   : > { %p5150_p8 = pnand %p5148_p11, %p6867_p10  ;;  %p5155_p9 = por %p5154_p12, %p5153_p0 }
 0x147   : > { %p5151_p2 = pneg %p5150_p8  ;;  %p5157_p1 = por %p5156_p13, %p5155_p9 }
 0x149   : > { %p5158_p3 = pnand %p5157_p1, %p5151_p2 }
 0x14b   : > { %5161 = shalt.err (!%p5158_p3)
}
 0x14c   : > { %s5162_s4 = scalar_lea.vmem %s5980_s23, 1024  ;;  %s5399_s0 = smov [#allocation15]  }
 0x14d   : > { %p5163_p6 = scmp.ne.s32.totalorder %s5980_s23, %s5162_s4  ;;  %s5167_s13 = sshll.u32 %s5399_s0, 4  ;;  %s5168_s13 = int_to_ptr.vmem [resolvable:$false] %s5167_s13 }
 0x14e   : > { %s5169_s18 = scalar_lea.vmem %s5168_s13, 2048  ;;  %p5170_p11 = scmp.lt.s32.totalorder %s5980_s23, %s5168_s13 }
 0x14f   : > { %p5165_p5 = pnand %p5163_p6, %p6867_p10  ;;  %p5171_p8 = scmp.lt.s32.totalorder %s5169_s18, %s5162_s4 }
 0x151   : > { %p5166_p4 = pneg %p5165_p5  ;;  %p5172_p0 = por %p5171_p8, %p5170_p11 }
 0x153   : > { %p5173_p12 = pnand %p5172_p0, %p5166_p4 }
 0x155   : > { %5176 = shalt.err (!%p5173_p12)
}
 0x156   : > { %s6871_s17 = smov 64   ;;  %s6872_s15 = scalar_lea.sflag [#allocation14], %s5624_s28 }
 0x157   : > { %4590 = dma.hbm_to_vmem [thread:$0]  (!%p6868_p7), %s5977_s22, 1024, %s5980_s23, %s6872_s15, %s6871_s17, %s6871_s17, %s6854_s27  }
 0x158   : > { %s6873_s11 = sld [smem:[#allocation72_spill]]  ;;  %s937_s12 = scalar_lea.vmem [#allocation18], %s5752_s8 }
 0x159   : > { %s944_s19 = sshll.u32 %s937_s12, 4  ;;  %s6015_s19 = int_to_ptr.vmem [resolvable:$true] %s944_s19 }
 0x15e   : > { %s6012_s14 = scalar_lea.hbm %s6873_s11, %s5760_s24  ;;  %s5182_s23 = scalar_lea.hbm %s6873_s11, 2048 }
 0x15f   : > { %s5177_s5 = scalar_lea.hbm %s6012_s14, 1024  ;;  %p5183_p1 = scmp.lt.u32.totalorder %s6012_s14, %s6873_s11 }
 0x160   : > { %p5178_p2 = scmp.ne.s32.totalorder %s6012_s14, %s5177_s5  ;;  %p5184_p3 = scmp.lt.u32.totalorder %s5182_s23, %s5177_s5 }
 0x161   : > { %p5186_p5 = scmp.lt.u32.totalorder %s5177_s5, %s6012_s14 }
 0x162   : > { %p5180_p9 = pnand %p5178_p2, %p6867_p10  ;;  %p5185_p6 = por %p5184_p3, %p5183_p1 }
 0x164   : > { %p5181_p13 = pneg %p5180_p9  ;;  %p5187_p4 = por %p5186_p5, %p5185_p6 }
 0x166   : > { %p5188_p11 = pnand %p5187_p4, %p5181_p13 }
 0x168   : > { %5191 = shalt.err (!%p5188_p11)
}
 0x169   : > { %s5192_s8 = scalar_lea.vmem %s6015_s19, 1024  ;;  %s5400_s26 = smov [#allocation18]  }
 0x16a   : > { %p5193_p8 = scmp.ne.s32.totalorder %s6015_s19, %s5192_s8  ;;  %s5197_s3 = sshll.u32 %s5400_s26, 4  ;;  %s5198_s3 = int_to_ptr.vmem [resolvable:$false] %s5197_s3 }
 0x16b   : > { %s5199_s4 = scalar_lea.vmem %s5198_s3, 2048  ;;  %p5200_p2 = scmp.lt.s32.totalorder %s6015_s19, %s5198_s3 }
 0x16c   : > { %p5195_p0 = pnand %p5193_p8, %p6867_p10  ;;  %p5201_p9 = scmp.lt.s32.totalorder %s5199_s4, %s5192_s8 }
 0x16e   : > { %p5196_p12 = pneg %p5195_p0  ;;  %p5202_p1 = por %p5201_p9, %p5200_p2 }
 0x170   : > { %p5203_p3 = pnand %p5202_p1, %p5196_p12 }
 0x172   : > { %5206 = shalt.err (!%p5203_p3)
}
 0x173   : > { %s6874_s0 = scalar_lea.sflag [#allocation17], %s5624_s28  ;;  %s6875_s13 = sld [smem:[#allocation52_spill]] }
 0x174   : > { %s6876_s18 = sld [smem:[#allocation51_spill]]  ;;  %s6877_s21 = sld [smem:[#allocation78_spill]] }
 0x175   : > { %4596 = dma.hbm_to_vmem [thread:$0]  (!%p6868_p7), %s6012_s14, 1024, %s6015_s19, %s6874_s0, %s6871_s17, %s6871_s17, %s6854_s27  }
 0x17a   : > { %s6047_s12 = scalar_lea.hbm %s6877_s21, %s6875_s13  ;;  %s1004_s5 = scalar_lea.vmem [#allocation21], %s6876_s18 }
 0x17b   : > { %s1011_s9 = sshll.u32 %s1004_s5, 4  ;;  %s5207_s22 = scalar_lea.hbm %s6047_s12, 2048  ;;  %s6050_s9 = int_to_ptr.vmem [resolvable:$true] %s1011_s9 }
 0x17c   : > { %p5208_p13 = scmp.ne.s32.totalorder %s6047_s12, %s5207_s22  ;;  %s5212_s19 = scalar_lea.hbm %s6877_s21, 4096 }
 0x17d   : > { %p5213_p4 = scmp.lt.u32.totalorder %s6047_s12, %s6877_s21  ;;  %p5214_p11 = scmp.lt.u32.totalorder %s5212_s19, %s5207_s22 }
 0x17e   : > { %p5210_p6 = pnand %p5208_p13, %p6867_p10  ;;  %p5216_p0 = scmp.lt.u32.totalorder %s5207_s22, %s6047_s12 }
 0x17f   : > { %p5215_p8 = por %p5214_p11, %p5213_p4 }
 0x180   : > { %p5211_p5 = pneg %p5210_p6 }
 0x181   : > { %p5217_p12 = por %p5216_p0, %p5215_p8 }
 0x183   : > { %p5218_p2 = pnand %p5217_p12, %p5211_p5 }
 0x185   : > { %5221 = shalt.err (!%p5218_p2)
}
 0x186   : > { %s5222_s8 = scalar_lea.vmem %s6050_s9, 2048  ;;  %s5401_s26 = smov [#allocation21]  }
 0x187   : > { %p5223_p9 = scmp.ne.s32.totalorder %s6050_s9, %s5222_s8  ;;  %s5227_s3 = sshll.u32 %s5401_s26, 4  ;;  %s5228_s3 = int_to_ptr.vmem [resolvable:$false] %s5227_s3 }
 0x188   : > { %s5229_s4 = scalar_lea.vmem %s5228_s3, 4096  ;;  %p5230_p13 = scmp.lt.s32.totalorder %s6050_s9, %s5228_s3 }
 0x189   : > { %p5225_p1 = pnand %p5223_p9, %p6867_p10  ;;  %p5231_p6 = scmp.lt.s32.totalorder %s5229_s4, %s5222_s8 }
 0x18b   : > { %p5226_p3 = pneg %p5225_p1  ;;  %p5232_p4 = por %p5231_p6, %p5230_p13 }
 0x18d   : > { %p5233_p11 = pnand %p5232_p4, %p5226_p3 }
 0x18f   : > { %5236 = shalt.err (!%p5233_p11)
}
 0x190   : > { %s6878_s0 = scalar_lea.sflag [#allocation20], %s5624_s28  ;;  %s6879_s16 = sld [smem:[#allocation45_spill]] }
 0x191   : > { %4602 = dma.hbm_to_vmem [thread:$0]  (!%p6868_p7), %s6047_s12, 2048, %s6050_s9, %s6878_s0, %s6871_s17, %s6871_s17, %s6854_s27  }
 0x196   : > { %p6880_p10 = scmp.ne.s32.totalorder %s6879_s16, 0 }
 0x198   : > { %1041 = sbr.rel (%p6880_p10) target bundleno = 5704 (0x1648), region = 116 }
 0x19f   : > { %s6881_s13 = sld [smem:[#allocation34_spill]]  ;;  %s6882_s18 = sld [smem:[#allocation42_spill]] }
 0x1a5   : > { %s6081_s15 = sand.u32 1, %s6881_s13   ;;  %p6883_p5 = scmp.ne.s32.totalorder %s6882_s18, 0 }
 0x1a6   : > { %s4116_s6 = sshll.u32 %s6081_s15, 4  ;;  %s1044_s5 = scalar_lea.sflag [#allocation5], %s6081_s15 }
 0x1a7   : > { %s6085_s29 = scalar_lea.vmem [#allocation4], %s4116_s6 }
 0x1a8   : > { %5310 = dma.done.wait (%p6883_p5), %s1044_s5, 256  }
 0x1a9   : > { %5312 = vsyncadd (%p6883_p5), %s1044_s5, 4294967040  ;;  %s6884_s28 = sld [smem:[#allocation41_spill]]  ;;  %s6776_s17 = sshll.u32 %s6081_s15, 3 }
 0x1aa   : > { %s6098_s9 = scalar_lea.vmem [#allocation7], %s6776_s17 }
 0x1ab   : > { %6885 = sst [smem:[#allocation53_spill]] %s6098_s9 }
 0x1af   : > { %s6092_s27 = sand.u32 1, %s6884_s28  }
 0x1b0   : > { %s1053_s12 = scalar_lea.sflag [#allocation8], %s6092_s27 }
 0x1b1   : > { %5314 = dma.done.wait (%p6883_p5), %s1053_s12, 144  }
 0x1b2   : > { %5316 = vsyncadd (%p6883_p5), %s1053_s12, 4294967152  ;;  %s1070_s23 = scalar_lea.sflag [#allocation11], %s6092_s27 }
 0x1b3   : > { %5318 = dma.done.wait (%p6883_p5), %s1070_s23, 16  }
 0x1b4   : > { %5320 = vsyncadd (%p6883_p5), %s1070_s23, 4294967280  ;;  %s6886_s19 = sld [smem:[#allocation31_spill]]  ;;  %s6887_s2 = sld [smem:[#allocation47_spill]] }
 0x1ba   : > { %s1079_s24 = sand.u32 1, %s6886_s19   ;;  %p6888_p7 = scmp.ne.s32.totalorder %s6887_s2, 0 }
 0x1bb   : > { %s4543_s8 = smul.u32 192, %s1079_s24 }
 0x1bd   : > { %s6112_s26 = scalar_lea.vmem [#allocation12], %s4543_s8 }
 0x1be   : > { %5322 = dma.done.wait (%p6888_p7), %s1070_s23, 3072  }
 0x1bf   : > { %5324 = vsyncadd (%p6888_p7), %s1070_s23, 4294964224  ;;  %s4118_s3 = sshll.u32 %s1079_s24, 6  ;;  %s1087_s4 = scalar_lea.sflag [#allocation14], %s6092_s27 }
 0x1c0   : > { %s6119_s0 = scalar_lea.vmem [#allocation13], %s4118_s3 }
 0x1c1   : > { %5326 = dma.done.wait (%p6888_p7), %s1087_s4, 2048  }
 0x1c2   : > { %5328 = vsyncadd (%p6888_p7), %s1087_s4, 4294965248  ;;  %s4120_s16 = sshll.u32 %s1079_s24, 7  ;;  %s6125_s13 = scalar_lea.vmem [#allocation15], %s4118_s3 }
 0x1c3   : > { %6889 = sst [smem:[#allocation54_spill]] %s6125_s13  ;;  %s1105_s18 = scalar_lea.sflag [#allocation17], %s6092_s27 }
 0x1c4   : > { %s6128_s6 = scalar_lea.vmem [#allocation16], %s4120_s16 }
 0x1c5   : > { %5330 = dma.done.wait (%p6888_p7), %s1105_s18, 3072  }
 0x1c6   : > { %5332 = vsyncadd (%p6888_p7), %s1105_s18, 4294964224  ;;  %s6134_s5 = scalar_lea.vmem [#allocation18], %s4118_s3  ;;  %s1123_s28 = scalar_lea.sflag [#allocation20], %s6092_s27 }
 0x1c7   : > { %6890 = sst [smem:[#allocation55_spill]] %s6134_s5  ;;  %s6137_s12 = scalar_lea.vmem [#allocation19], %s4120_s16 }
 0x1c8   : > { %6891 = sst [smem:[#allocation56_spill]] %s6137_s12 }
 0x1c9   : > { %5334 = dma.done.wait (%p6888_p7), %s1123_s28, 4096  }
 0x1ca   : > { %5336 = vsyncadd (%p6888_p7), %s1123_s28, 4294963200  ;;  %s6892_s23 = sld [smem:[#allocation36_spill]]  ;;  %s6896_s21 = sld [smem:[#allocation63_spill]] }
 0x1cb   : > { %s6899_s28 = sld [smem:[#allocation71_spill]]  ;;  %s6903_s12 = sld [smem:[#allocation77_spill]] }
 0x1cc   : > { %s6904_s8 = sld [smem:[#allocation79_spill]]  ;;  %s6906_s17 = sld [smem:[#allocation81_spill]] }
 0x1cd   : > { %s6204_s20 = scalar_lea.vmem [#allocation21], %s4120_s16  ;;  %s6907_s11 = sshll.u32 %s6081_s15, 3 }
 0x1d0   : > { %p1290_p8 = scmp.lt.s32.totalorder %s6892_s23, 1  ;;  %p4127_p0 = scmp.ne.s32.totalorder %s6892_s23, 0 }
 0x1d1   : > { %v1337_v0 = vld [vmem:[%s6085_s29] sm:$0xff] (!%p4127_p0)  ;;  %v1338_v1 = vld [vmem:[%s6085_s29 + $0x8] sm:$0xff] (!%p4127_p0) }
 0x1d2   : > { %s6145_s19 = scalar_select %p1290_p8, %s6892_s23, 1 }
 0x1d3   : > { %1339 = vst [vmem:[#allocation2] sm:$0xff] (!%p4127_p0), %v1337_v0  ;;  %1340 = vst [vmem:[#allocation2 + $0x8] sm:$0xff] (!%p4127_p0), %v1338_v1 }
 0x1d4   : > { %s4544_s27 = smul.u32 3, %s6145_s19  ;;  %s4125_s2 = sshll.u32 %s6145_s19, 1 }
 0x1d5   : > { %s6177_s14 = scalar_lea.vmem %s6899_s28, %s4125_s2  ;;  %s6190_s5 = scalar_lea.vmem %s6903_s12, %s4125_s2 }
 0x1d6   : > { %s6163_s25 = scalar_lea.vmem %s6896_s21, %s4544_s27  ;;  %6900 = sst [smem:[#allocation57_spill]] %s6177_s14 }
 0x1d7   : > { %s6902_s27 = sld [smem:[#allocation75_spill]]  ;;  %s1325_s9 = scalar_lea.vmem %s6904_s8, %s6145_s19 }
 0x1d8   : > { %s6905_s28 = sld [smem:[#allocation80_spill]]  ;;  %s1331_s22 = scalar_lea.vmem %s6906_s17, %s6145_s19 }
 0x1d9   : > { %s6208_s21 = scalar_lea.vmem [#allocation22], %s6907_s11  ;;  %1336 = sbr.rel (%p4127_p0) target bundleno = 480 (0x1e0), region = 164 }
 0x1dd   : > { %s1318_s10 = scalar_lea.vmem %s6902_s27, %s6145_s19 }
 0x1de   : > { %s1328_s14 = scalar_lea.vmem %s6905_s28, %s6145_s19 }
 0x1e0 PF: > { %v4710_v2 = vld [vmem:[%s6112_s26 + $0x4] ss:$12 sps:$4 sm:$0xff]   ;;  %v4712_v3 = vld [vmem:[%s6112_s26] ss:$12 sps:$4 sm:$0xff]   ;;  %v5402_v4 = vmov 0   ;;  %v5403_v5 = vmov 0.0   ;;  %v1347_v31 = vlaneseq }
 0x1e1   : > { %1575 = vmatprep.mubr.bf16.mxu0 %v5402_v4  ;;  %4365 = vmatprep.subr.bf16.mxu1 %v5403_v5  ;;  %v4713_v6 = vld [vmem:[%s6112_s26 + $0x1c] ss:$12 sps:$4 sm:$0xff]   ;;  %v4715_v7 = vld [vmem:[%s6112_s26 + $0x18] ss:$12 sps:$4 sm:$0xff]   ;;  %v4716_v8 = vld [vmem:[%s6112_s26 + $0x34] ss:$12 sps:$4 sm:$0xff]  }
 0x1e2   : > { %1543 = vmatprep.subr.bf16.mxu0 %v4710_v2  ;;  %v4718_v9 = vld [vmem:[%s6112_s26 + $0x30] ss:$12 sps:$4 sm:$0xff]   ;;  %v4719_v10 = vld [vmem:[%s6112_s26 + $0x4c] ss:$12 sps:$4 sm:$0xff]   ;;  %v4721_v11 = vld [vmem:[%s6112_s26 + $0x48] ss:$12 sps:$4 sm:$0xff]  }
 0x1e3   : > { %1544 = vmatpush1.bf16.msra.mxu0 %v4712_v3  ;;  %v4722_v12 = vld [vmem:[%s6112_s26 + $0x64] ss:$12 sps:$4 sm:$0xff]   ;;  %v4734_v13 = vld [vmem:[%s6112_s26 + $0x8] ss:$12 sps:$4 sm:$0xff]   ;;  %v4735_v14 = vld [vmem:[%s6112_s26 + $0x20] ss:$12 sps:$4 sm:$0xff]  }
 0x1e4   : > { %1545 = vmatprep.subr.bf16.mxu0 %v4713_v6  ;;  %4366 = vmatpush3.bf16.msra.mxu1 %v4734_v13  ;;  %v4724_v15 = vld [vmem:[%s6112_s26 + $0x60] ss:$12 sps:$4 sm:$0xff]   ;;  %v4725_v16 = vld [vmem:[%s6112_s26 + $0x7c] ss:$12 sps:$4 sm:$0xff]   ;;  %v4736_v17 = vld [vmem:[%s6112_s26 + $0x38] ss:$12 sps:$4 sm:$0xff]  }
 0x1e5   : > { %4367 = vmatprep.subr.bf16.mxu1 %v5403_v5  ;;  %v4727_v18 = vld [vmem:[%s6112_s26 + $0x78] ss:$12 sps:$4 sm:$0xff]   ;;  %v4728_v19 = vld [vmem:[%s6112_s26 + $0x94] ss:$12 sps:$4 sm:$0xff]   ;;  %v4730_v20 = vld [vmem:[%s6112_s26 + $0x90] ss:$12 sps:$4 sm:$0xff]  }
 0x1e6   : > { %v4737_v21 = vld [vmem:[%s6112_s26 + $0x50] ss:$12 sps:$4 sm:$0xff]   ;;  %v4731_v22 = vld [vmem:[%s6112_s26 + $0xac] ss:$12 sps:$4 sm:$0xff]   ;;  %v4738_v23 = vld [vmem:[%s6112_s26 + $0x68] ss:$12 sps:$4 sm:$0xff]  }
 0x1e7   : > { %1546 = vmatpush1.bf16.msra.mxu0 %v4715_v7  ;;  %v4733_v24 = vld [vmem:[%s6112_s26 + $0xa8] ss:$12 sps:$4 sm:$0xff]   ;;  %v6241_v26 = vld [vmem:[#allocation2 + $0x8] sm:$0xff]  ;;  %v4740_v29 = vld [vmem:[%s6112_s26 + $0x98] ss:$12 sps:$4 sm:$0xff]   ;;  %vm5404_vm0 = vmmov 0  }
 0x1e8   : > { %1547 = vmatprep.subr.bf16.mxu0 %v4716_v8  ;;  %4368 = vmatpush3.bf16.msra.mxu1 %v4735_v14  ;;  %v6239_v25 = vld [vmem:[#allocation2] sm:$0xff]  ;;  %v4739_v27 = vld [vmem:[%s6112_s26 + $0x80] ss:$12 sps:$4 sm:$0xff]   ;;  %v4741_v30 = vld [vmem:[%s6112_s26 + $0xb0] ss:$12 sps:$4 sm:$0xff]   ;;  %v1348_v32 = vshrl.u32 %v1347_v31, 7 }
 0x1e9   : > { %4369 = vmatprep.subr.bf16.mxu1 %v5403_v5  ;;  %v1365_v28 = vpack.c.bf16 %v6241_v26, %v6239_v25  ;;  %4381 = vmatprep.mubr.msk.bf16.mxu1 %vm5404_vm0, %v5403_v5  ;;  %v1398_v34 = vld [vmem:[%s6163_s25] sm:$0x7]  ;;  %vm1630_vm1 = vcmask 261120   ;;  %s6908_s25 = scalar_lea.vmem [#allocation9], %s6081_s15  ;;  %v1351_v60 = vand.u32 127, %v1347_v31  ;;  %vm1682_vm8 = vcmask 130048  }
 0x1ea   : > { %v6260_v33 = vsub.s32 0, %v1348_v32  ;;  %v6263_v35 = vsub.s32 1, %v1348_v32  ;;  %v1410_v49 = vsub.s32 2, %v1348_v32  ;;  %v1343_v58 = vld [vmem:[%s6908_s25] sm:$0x1]  ;;  %v1349_v62 = vadd.s32 8, %v1348_v32 }
 0x1eb   : > { %1548 = vmatpush1.bf16.msra.mxu0 %v4718_v9  ;;  %vm1344_vm2 = vcmp.gt.f32.partialorder %v1343_v58, 0.5  ;;  %vm1352_vm3 = vcmp.gt.s32.totalorder %v1351_v60, %v1348_v32  ;;  %s5405_s29 = smov 96   ;;  %s5406_s26 = smov 32   ;;  %vm1885_vm9 = vcmask 523520   ;;  %vm2017_vm10 = vcmask 785920  }
 0x1ec   : > { %1549 = vmatprep.subr.bf16.mxu0 %v4719_v10  ;;  %4370 = vmatpush3.bf16.msra.mxu1 %v4736_v17  ;;  %v1403_v36 = vrot.slane %v1398_v34, %v6260_v33  ;;  %v1407_v38 = vrot.slane %v1398_v34, %v6263_v35  ;;  %v1411_v50 = vrot.slane %v1398_v34, %v1410_v49  ;;  %v1354_v59 = vsel %vm1344_vm2, 1, %v5402_v4  ;;  %s5407_s16 = smov 64   ;;  %s6909_s23 = sld [smem:[#allocation65_spill]] }
 0x1ed   : > { %4371 = vmatprep.subr.bf16.mxu1 %v5403_v5  ;;  %v1358_v61 = vrot.slane %v1354_v59, %v6260_v33  ;;  %vm1353_vm5 = vcmp.gt.s32.totalorder %v1351_v60, %v1349_v62  ;;  %vm2149_vm11 = vcmask 1048320   ;;  %s6911_s27 = sld [smem:[#allocation54_spill]]  ;;  %s6912_s7 = sld [smem:[#allocation53_spill]] }
 0x1ee   : > { %s6914_s24 = sld [smem:[#allocation66_spill]]  ;;  %s6916_s18 = sld [smem:[#allocation67_spill]] }
 0x1ef   : > { %1550 = vmatpush1.bf16.msra.mxu0 %v4721_v11  ;;  %vm1359_vm4 = vcmp.eq.s32.totalorder %v1358_v61, 1  ;;  %s6918_s11 = sld [smem:[#allocation69_spill]]  ;;  %s6921_s13 = sld [smem:[#allocation55_spill]] }
 0x1f0   : > { %1551 = vmatprep.subr.bf16.mxu0 %v4722_v12  ;;  %4372 = vmatpush3.bf16.msra.mxu1 %v4737_v21  ;;  %vm1360_vm6 = vmor %vm1352_vm3, %vm1359_vm4  ;;  %s6925_s30 = sld [smem:[#allocation74_spill]] }
 0x1f1   : > { %4373 = vmatprep.subr.bf16.mxu1 %v5403_v5  ;;  %vm1361_vm7 = vmor %vm1353_vm5, %vm1359_vm4  ;;  %v6284_v0 = vsel %vm1360_vm6, -1e+09, %v5403_v5 }
 0x1f2   : > { %v6287_v6 = vsel %vm1361_vm7, -1e+09, %v5403_v5  ;;  %s6910_s2 = scalar_lea.vmem %s6909_s23, %s6145_s19 }
 0x1f3   : > { %1552 = vmatpush1.bf16.msra.mxu0 %v4724_v15 }
 0x1f4   : > { %1553 = vmatprep.subr.bf16.mxu0 %v4725_v16  ;;  %4374 = vmatpush3.bf16.msra.mxu1 %v4738_v23  ;;  %s6915_s3 = scalar_lea.vmem %s6914_s24, %s6145_s19  ;;  %s6917_s28 = scalar_lea.vmem %s6916_s18, %s6145_s19 }
 0x1f5   : > { %4375 = vmatprep.subr.bf16.mxu1 %v5403_v5  ;;  %s6919_s25 = scalar_lea.vmem %s6918_s11, %s6145_s19  ;;  %s6931_s11 = sld [smem:[#allocation36_spill]] }
 0x1f6   : > { %s6926_s12 = scalar_lea.vmem %s6925_s30, %s6145_s19 }
 0x1f7   : > { %1554 = vmatpush1.bf16.msra.mxu0 %v4727_v18 }
 0x1f8   : > { %1555 = vmatprep.subr.bf16.mxu0 %v4728_v19  ;;  %4376 = vmatpush3.bf16.msra.mxu1 %v4739_v27 }
 0x1f9   : > { %4377 = vmatprep.subr.bf16.mxu1 %v5403_v5 }
 0x1fb   : > { %1556 = vmatpush1.bf16.msra.mxu0 %v4730_v20  ;;  %p4251_p12 = scmp.ne.s32.totalorder %s6931_s11, 1 }
 0x1fc   : > { %1557 = vmatprep.subr.bf16.mxu0 %v4731_v22  ;;  %4378 = vmatpush3.bf16.msra.mxu1 %v4740_v29 }
 0x1fd   : > { %4379 = vmatprep.subr.bf16.mxu1 %v5403_v5 }
 0x1ff   : > { %1558 = vmatpush1.bf16.msra.mxu0 %v4733_v24 }
 0x200   : > { %4409 = vmatprep.subr.bf16.mxu0 %v5403_v5  ;;  %4380 = vmatpush3.bf16.msra.mxu1 %v4741_v30 }
 0x201   : > { %4385 = vmatprep.subr.bf16.mxu1 %v5403_v5 }
 0x202   : > { %1576 = vmatmul.mubr.bf16.vlgmr.msra.gmra.mrb[0].mxu0 %v1365_v28 }
 0x203   : > { %4411 = vmatprep.mubr.msk.bf16.mxu0 %vm5404_vm0, %v5403_v5  ;;  %4382 = vmatmul.mubr.bf16.vlgmr.msra.gmra.mrb[0].mxu1 %v1365_v28 }
 0x204   : > { %4387 = vmatprep.mubr.msk.bf16.mxu1 %vm5404_vm0, %v5403_v5 }
 0x2d5   : > { %v1577_v37 = vpop.f32.mrb[0].mxu0 }
 0x2d6   : > { %v1579_v39 = vpop.f32.mrb[1].mxu0  ;;  %v1578_v41 = vadd.f32 %v1577_v37, %v1403_v36  ;;  %v1620_v51 = vpop.f32.mrb[0].mxu1 }
 0x2d7   : > { %v1581_v40 = vpop.f32.mrb[2].mxu0  ;;  %v1580_v44 = vadd.f32 %v1579_v39, %v1407_v38  ;;  %v1621_v52 = vadd.f32 %v1620_v51, %v1411_v50  ;;  %v4383_v53 = vpop.f32.mrb[1].mxu1 }
 0x2d8   : > { %v1582_v42 = vadd.f32 %v1581_v40, %v1403_v36  ;;  %v1583_v43 = vpop.f32.mrb[3].mxu0  ;;  %v1623_v54 = vpop.f32.mrb[2].mxu1 }
 0x2d9   : > { %v1584_v45 = vadd.f32 %v1583_v43, %v1407_v38  ;;  %v1624_v55 = vadd.f32 %v1623_v54, %v1411_v50  ;;  %v4384_v56 = vpop.f32.mrb[3].mxu1 }
 0x2da   : > { %v6267_v46 = vpack.c.bf16 %v1582_v42, %v1578_v41 }
 0x2db   : > { %v1628_v47 = vpack.c.bf16 %v1584_v45, %v1580_v44  ;;  %v6275_v57 = vpack.c.bf16 %v1624_v55, %v1621_v52 }
 0x2dd   : > { %v1635_v48 = vsel %vm1630_vm1, %v1628_v47, 0 }
 0x2de   : > { %4386 = vmatpush3.bf16.xpose.msra.mxu1 %v1635_v48 }
 0x2df   : > { %4391 = vmatprep.subr.bf16.mxu1 %v5403_v5 }
 0x2e5   : > { %4388 = vmatmul.mubr.msk.bf16.vlgmr.msra.gmra.mrb[4].mxu1 %vm1630_vm1, %v6267_v46 }
 0x2e6   : > { %4393 = vmatprep.mubr.msk.bf16.mxu1 %vm5404_vm0, %v5403_v5  ;;  %4392 = vmatpush3.bf16.msra.mxu1 %v6275_v57 }
 0x2e7   : > { %4397 = vmatprep.subr.bf16.mxu1 %v5403_v5 }
 0x3b8   : > { %v1671_v63 = vpop.f32.mrb[4].mxu1 }
 0x3b9   : > { %v1678_v1 = vmul.f32 0.17677669, %v1671_v63  ;;  %v4389_v2 = vpop.f32.mrb[5].mxu1 }
 0x3ba   : > { %v1674_v3 = vpop.f32.mrb[6].mxu1 }
 0x3bb   : > { %v1679_v7 = vmul.f32 0.17677669, %v1674_v3  ;;  %v4390_v8 = vpop.f32.mrb[7].mxu1  ;;  %v1680_v9 = vadd.f32 %v1678_v1, %v6284_v0 }
 0x3bd   : > { %v1683_v10 = vsel %vm1682_vm8, %v1680_v9, -inf  ;;  %v1681_v11 = vadd.f32 %v1679_v7, %v6287_v6 }
 0x3be   : > { %1684 = vmax.xlane.f32.xlu0 %v1683_v10 }
 0x3bf   : > { %v1686_v12 = vsel %vm1682_vm8, %v1681_v11, -inf }
 0x3c2   : > { %1687 = vmax.xlane.f32.xlu0 %v1686_v12 }
 0x3d8   : > { %1756 = vrot.lane.b32.xlu0 %v1628_v47, %s5405_s29 }
 0x3dc   : > { %2021 = vrot.lane.b32.xlu0 %v1628_v47, %s5406_s26 }
 0x44b   : > { %v1685_v13 = vpop.xlane.xlu0 %1684 }
 0x44c   : > { %v1689_v14 = vsub.f32 %v1680_v9, %v1685_v13 }
 0x44e   : > { %v1691_v15 = vmul.f32 1.442695, %v1689_v14 }
 0x44f   : > { %v1688_v16 = vpop.xlane.xlu0 %1687 }
 0x450   : > { %4831 = vpow2.f32 %v1691_v15  ;;  %v1690_v17 = vsub.f32 %v1681_v11, %v1688_v16 }
 0x452   : > { %v1693_v18 = vmul.f32 1.442695, %v1690_v17 }
 0x453   : > { %v1757_v28 = vpop.permute.xlu0 %1756 }
 0x454   : > { %4833 = vpow2.f32 %v1693_v18  ;;  %v1762_v39 = vsel %vm1630_vm1, %v1757_v28, 0 }
 0x457   : > { %v2022_v37 = vpop.permute.xlu0 %2021 }
 0x458   : > { %v2027_v41 = vsel %vm1630_vm1, %v2022_v37, 0 }
 0x45a   : > { %v4832_v19 = vpop.eup %4831 }
 0x45b   : > { %v1695_v20 = vsel %vm1682_vm8, %v4832_v19, 0.0 }
 0x45c   : > { %1696 = vadd.xlane.f32.xlu1 %v1695_v20 }
 0x45e   : > { %v4834_v21 = vpop.eup %4833 }
 0x45f   : > { %v1698_v22 = vsel %vm1682_vm8, %v4834_v21, 0.0 }
 0x460   : > { %1699 = vadd.xlane.f32.xlu1 %v1698_v22 }
 0x471   : > { %1753 = vrot.lane.b32.xlu1 %v6267_v46, %s5405_s29 }
 0x475   : > { %1889 = vrot.lane.b32.xlu1 %v1628_v47, %s5407_s16 }
 0x479   : > { %1887 = vrot.lane.b32.xlu1 %v6267_v46, %s5407_s16 }
 0x47d   : > { %2019 = vrot.lane.b32.xlu1 %v6267_v46, %s5406_s26 }
 0x4e9   : > { %v1697_v23 = vpop.xlane.xlu1 %1696 }
 0x4ea   : > { %4835 = vrcp.f32 %v1697_v23 }
 0x4ed   : > { %v1700_v24 = vpop.xlane.xlu1 %1699 }
 0x4ee   : > { %4837 = vrcp.f32 %v1700_v24 }
 0x4f1   : > { %v1754_v27 = vpop.permute.xlu1 %1753 }
 0x4f4   : > { %v4836_v30 = vpop.eup %4835 }
 0x4f5   : > { %v1890_v29 = vpop.permute.xlu1 %1889  ;;  %v1703_v34 = vmul.f32 %v4836_v30, %v4832_v19 }
 0x4f6   : > { %v1895_v31 = vsel %vm1630_vm1, %v1890_v29, 0 }
 0x4f7   : > { %4410 = vmatpush3.bf16.xpose.msra.mxu0 %v1895_v31 }
 0x4f8   : > { %v4838_v32 = vpop.eup %4837  ;;  %4421 = vmatprep.subr.bf16.mxu0 %v5403_v5 }
 0x4f9   : > { %v1704_v36 = vmul.f32 %v4838_v32, %v4834_v21  ;;  %v1888_v40 = vpop.permute.xlu1 %1887 }
 0x4fb   : > { %v1705_v38 = vpack.c.bf16 %v1704_v36, %v1703_v34 }
 0x4fd   : > { %4394 = vmatmul.mubr.msk.bf16.vlgmr.msra.gmra.mrb[8].mxu1 %vm1682_vm8, %v1705_v38  ;;  %v2020_v42 = vpop.permute.xlu1 %2019 }
 0x4fe   : > { %4398 = vmatpush3.bf16.xpose.msra.mxu1 %v1762_v39  ;;  %4412 = vmatmul.mubr.msk.bf16.vlgmr.msra.gmra.mrb[4].mxu0 %vm1630_vm1, %v1888_v40 }
 0x4ff   : > { %4422 = vmatpush3.bf16.xpose.msra.mxu0 %v2027_v41  ;;  %4399 = vmatprep.mubr.msk.bf16.mxu1 %vm5404_vm0, %v5403_v5 }
 0x500   : > { %4423 = vmatprep.mubr.msk.bf16.mxu0 %vm5404_vm0, %v5403_v5  ;;  %4403 = vmatprep.subr.bf16.mxu1 %v5403_v5 }
 0x501   : > { %4433 = vmatprep.subr.bf16.mxu0 %v5403_v5 }
 0x505   : > { %4400 = vmatmul.mubr.msk.bf16.vlgmr.msra.gmra.mrb[12].mxu1 %vm1630_vm1, %v1754_v27 }
 0x506   : > { %4424 = vmatmul.mubr.msk.bf16.vlgmr.msra.gmra.mrb[8].mxu0 %vm1630_vm1, %v2020_v42  ;;  %4405 = vmatprep.mubr.msk.bf16.mxu1 %vm5404_vm0, %v5403_v5 }
 0x507   : > { %4449 = vmatprep.mubr.msk.bf16.mxu0 %vm5404_vm0, %v5403_v5 }
 0x5d0   : > { %v1743_v43 = vpop.f32.mrb[8].mxu1 }
 0x5d1   : > { %v4395_v44 = vpop.f32.mrb[9].mxu1  ;;  %v1931_v45 = vpop.f32.mrb[4].mxu0 }
 0x5d2   : > { %v1746_v46 = vpop.f32.mrb[10].mxu1  ;;  %v4413_v47 = vpop.f32.mrb[5].mxu0  ;;  %v1938_v53 = vmul.f32 0.17677669, %v1931_v45 }
 0x5d3   : > { %v1750_v48 = vpack.c.bf16 %v1746_v46, %v1743_v43  ;;  %v4396_v49 = vpop.f32.mrb[11].mxu1  ;;  %v1934_v50 = vpop.f32.mrb[6].mxu0 }
 0x5d4   : > { %v4414_v51 = vpop.f32.mrb[7].mxu0  ;;  %v1939_v3 = vmul.f32 0.17677669, %v1934_v50  ;;  %v1940_v9 = vadd.f32 %v1938_v53, %v6284_v0 }
 0x5d5   : > { %1751 = vst.msk [vmem:[#allocation3] sm:$0xff] %vm1630_vm1, %v1750_v48 }
 0x5d6   : > { %v1942_v13 = vsel %vm1682_vm8, %v1940_v9, -inf  ;;  %v1941_v14 = vadd.f32 %v1939_v3, %v6287_v6 }
 0x5d8   : > { %v1798_v52 = vpop.f32.mrb[12].mxu1  ;;  %v1945_v16 = vsel %vm1682_vm8, %v1941_v14, -inf }
 0x5d9   : > { %v1805_v54 = vmul.f32 0.17677669, %v1798_v52  ;;  %v4401_v55 = vpop.f32.mrb[13].mxu1  ;;  %v2063_v56 = vpop.f32.mrb[8].mxu0 }
 0x5da   : > { %v1801_v58 = vpop.f32.mrb[14].mxu1  ;;  %v4425_v59 = vpop.f32.mrb[9].mxu0  ;;  %v2070_v12 = vmul.f32 0.17677669, %v2063_v56 }
 0x5db   : > { %v1806_v60 = vmul.f32 0.17677669, %v1801_v58  ;;  %v4402_v61 = vpop.f32.mrb[15].mxu1  ;;  %v2066_v62 = vpop.f32.mrb[10].mxu0  ;;  %v1807_v63 = vadd.f32 %v1805_v54, %v6284_v0 }
 0x5dc   : > { %v2071_v1 = vmul.f32 0.17677669, %v2066_v62  ;;  %v4426_v2 = vpop.f32.mrb[11].mxu0  ;;  %v2072_v17 = vadd.f32 %v2070_v12, %v6284_v0 }
 0x5dd   : > { %v1809_v7 = vsel %vm1682_vm8, %v1807_v63, -inf  ;;  %v1808_v8 = vadd.f32 %v1806_v60, %v6287_v6 }
 0x5de   : > { %1810 = vmax.xlane.f32.xlu0 %v1809_v7  ;;  %v2073_v11 = vadd.f32 %v2071_v1, %v6287_v6  ;;  %v2074_v18 = vsel %vm1682_vm8, %v2072_v17, -inf }
 0x5df   : > { %v1812_v10 = vsel %vm1682_vm8, %v1808_v8, -inf }
 0x5e0   : > { %1813 = vmax.xlane.f32.xlu1 %v1812_v10  ;;  %v2077_v15 = vsel %vm1682_vm8, %v2073_v11, -inf }
 0x5e2   : > { %1943 = vmax.xlane.f32.xlu0 %v1942_v13 }
 0x5e4   : > { %2078 = vmax.xlane.f32.xlu1 %v2077_v15  ;;  %v4742_v15 = vld [vmem:[%s6119_s0] sm:$0xff]  }
 0x5e5   : > { %4434 = vmatpush3.bf16.msra.mxu0 %v4742_v15  ;;  %v4774_v15 = vld [vmem:[%s6128_s6 + $0x64] ss:$8 sps:$4 sm:$0xff]  }
 0x5e6   : > { %1946 = vmax.xlane.f32.xlu0 %v1945_v16  ;;  %v4743_v16 = vld [vmem:[%s6119_s0 + $0x8] sm:$0xff]   ;;  %4435 = vmatprep.subr.bf16.mxu0 %v5403_v5 }
 0x5e9   : > { %4436 = vmatpush3.bf16.msra.mxu0 %v4743_v16  ;;  %v4772_v16 = vld [vmem:[%s6128_s6 + $0x60] ss:$8 sps:$4 sm:$0xff]  }
 0x5ea   : > { %2075 = vmax.xlane.f32.xlu0 %v2074_v18  ;;  %4437 = vmatprep.subr.bf16.mxu0 %v5403_v5  ;;  %v4745_v18 = vld [vmem:[%s6119_s0 + $0x18] sm:$0xff]  }
 0x66b   : > { %v1811_v19 = vpop.xlane.xlu0 %1810 }
 0x66c   : > { %v1815_v29 = vsub.f32 %v1807_v63, %v1811_v19 }
 0x66d   : > { %v1814_v20 = vpop.xlane.xlu1 %1813 }
 0x66e   : > { %v1816_v30 = vsub.f32 %v1808_v8, %v1814_v20  ;;  %v1817_v36 = vmul.f32 1.442695, %v1815_v29  ;;  %v4746_v20 = vld [vmem:[%s6119_s0 + $0x20] sm:$0xff]  }
 0x66f   : > { %v1944_v21 = vpop.xlane.xlu0 %1943 }
 0x670   : > { %v1948_v22 = vsub.f32 %v1940_v9, %v1944_v21  ;;  %v1819_v37 = vmul.f32 1.442695, %v1816_v30 }
 0x671   : > { %v2079_v23 = vpop.xlane.xlu1 %2078 }
 0x672   : > { %v1950_v24 = vmul.f32 1.442695, %v1948_v22  ;;  %v2081_v27 = vsub.f32 %v2073_v11, %v2079_v23  ;;  %v4747_v23 = vld [vmem:[%s6119_s0 + $0x28] sm:$0xff]  }
 0x673   : > { %v1947_v6 = vpop.xlane.xlu0 %1946 }
 0x674   : > { %4839 = vpow2.f32 %v1950_v24  ;;  %v1949_v28 = vsub.f32 %v1941_v14, %v1947_v6  ;;  %v2084_v31 = vmul.f32 1.442695, %v2081_v27 }
 0x676   : > { %v1952_v32 = vmul.f32 1.442695, %v1949_v28  ;;  %v4748_v28 = vld [vmem:[%s6119_s0 + $0x30] sm:$0xff]  }
 0x677   : > { %v2076_v34 = vpop.xlane.xlu0 %2075 }
 0x678   : > { %4841 = vpow2.f32 %v1952_v32  ;;  %v2080_v0 = vsub.f32 %v2072_v17, %v2076_v34  ;;  %v4744_v17 = vld [vmem:[%s6119_s0 + $0x10] sm:$0xff]  }
 0x679   : > { %4843 = vpow2.f32 %v2084_v31  ;;  %4438 = vmatpush3.bf16.msra.mxu0 %v4744_v17  ;;  %v4749_v31 = vld [vmem:[%s6119_s0 + $0x38] sm:$0xff]   ;;  %s6920_s0 = scalar_lea.vmem [#allocation10], %s6081_s15 }
 0x67a   : > { %v2082_v38 = vmul.f32 1.442695, %v2080_v0  ;;  %4439 = vmatprep.subr.bf16.mxu0 %v5403_v5  ;;  %v4775_v17 = vld [vmem:[%s6911_s27 + $0x20] sm:$0xff]  }
 0x67c   : > { %4845 = vpow2.f32 %v2082_v38 }
 0x67d   : > { %4847 = vpow2.f32 %v1817_v36  ;;  %4440 = vmatpush3.bf16.msra.mxu0 %v4745_v18  ;;  %v4778_v18 = vld [vmem:[%s6128_s6 + $0x74] ss:$8 sps:$4 sm:$0xff]  }
 0x67e   : > { %v4840_v39 = vpop.eup %4839  ;;  %4849 = vpow2.f32 %v1819_v37  ;;  %4441 = vmatprep.subr.bf16.mxu0 %v5403_v5 }
 0x67f   : > { %v1954_v40 = vsel %vm1682_vm8, %v4840_v39, 0.0 }
 0x680   : > { %1955 = vadd.xlane.f32.xlu0 %v1954_v40 }
 0x681   : > { %4442 = vmatpush3.bf16.msra.mxu0 %v4746_v20  ;;  %v4779_v20 = vld [vmem:[%s6911_s27 + $0x28] sm:$0xff]  }
 0x682   : > { %v4842_v41 = vpop.eup %4841  ;;  %4443 = vmatprep.subr.bf16.mxu0 %v5403_v5 }
 0x683   : > { %v1957_v42 = vsel %vm1682_vm8, %v4842_v41, 0.0  ;;  %v4844_v43 = vpop.eup %4843 }
 0x684   : > { %1958 = vadd.xlane.f32.xlu1 %v1957_v42  ;;  %v2089_v47 = vsel %vm1682_vm8, %v4844_v43, 0.0 }
 0x685   : > { %4444 = vmatpush3.bf16.msra.mxu0 %v4747_v23  ;;  %v4782_v23 = vld [vmem:[%s6911_s27 + $0x38] sm:$0xff]  }
 0x686   : > { %v4846_v44 = vpop.eup %4845  ;;  %4445 = vmatprep.subr.bf16.mxu0 %v5403_v5 }
 0x687   : > { %v4848_v45 = vpop.eup %4847  ;;  %v2086_v46 = vsel %vm1682_vm8, %v4846_v44, 0.0 }
 0x688   : > { %v4850_v48 = vpop.eup %4849  ;;  %2087 = vadd.xlane.f32.xlu0 %v2086_v46  ;;  %2090 = vadd.xlane.f32.xlu1 %v2089_v47  ;;  %v1821_v49 = vsel %vm1682_vm8, %v4848_v45, 0.0 }
 0x689   : > { %v1824_v50 = vsel %vm1682_vm8, %v4850_v48, 0.0  ;;  %4446 = vmatpush3.bf16.msra.mxu0 %v4748_v28 }
 0x68a   : > { %4447 = vmatprep.subr.bf16.mxu0 %v5403_v5 }
 0x68c   : > { %1822 = vadd.xlane.f32.xlu0 %v1821_v49  ;;  %1825 = vadd.xlane.f32.xlu1 %v1824_v50 }
 0x68d   : > { %4448 = vmatpush3.bf16.msra.mxu0 %v4749_v31 }
 0x69d   : > { %1965 = vrot.lane.b32.xlu1 %v6275_v57, %s5407_s16 }
 0x6a1   : > { %2097 = vrot.lane.b32.xlu1 %v6275_v57, %s5406_s26 }
 0x6a2   : > { %1833 = vrot.lane.b32.xlu0 %v6275_v57, %s5405_s29 }
 0x70d   : > { %v1956_v51 = vpop.xlane.xlu0 %1955 }
 0x711   : > { %v1959_v52 = vpop.xlane.xlu1 %1958 }
 0x715   : > { %v2088_v53 = vpop.xlane.xlu0 %2087  ;;  %v2091_v54 = vpop.xlane.xlu1 %2090 }
 0x719   : > { %v1823_v55 = vpop.xlane.xlu0 %1822  ;;  %v1826_v56 = vpop.xlane.xlu1 %1825 }
 0x71a   : > { %4851 = vrcp.f32 %v1823_v55  ;;  %v4755_v55 = vld [vmem:[%s6128_s6 + $0x14] ss:$8 sps:$4 sm:$0xff]  }
 0x71b   : > { %4853 = vrcp.f32 %v1826_v56  ;;  %v4759_v56 = vld [vmem:[%s6911_s27] sm:$0xff]  }
 0x71c   : > { %4855 = vrcp.f32 %v1959_v52 }
 0x71d   : > { %v1834_v58 = vpop.permute.xlu0 %1833  ;;  %4857 = vrcp.f32 %v1956_v51  ;;  %v1966_v1 = vpop.permute.xlu1 %1965 }
 0x71e   : > { %4404 = vmatpush3.bf16.msra.mxu1 %v1834_v58  ;;  %4859 = vrcp.f32 %v2088_v53  ;;  %v4750_v53 = vld [vmem:[%s6128_s6] ss:$8 sps:$4 sm:$0xff]   ;;  %v4753_v58 = vld [vmem:[%s6128_s6 + $0x10] ss:$8 sps:$4 sm:$0xff]  }
 0x71f   : > { %4415 = vmatprep.subr.bf16.mxu1 %v5403_v5  ;;  %4861 = vrcp.f32 %v2091_v54  ;;  %v4752_v54 = vld [vmem:[%s6128_s6 + $0x4] ss:$8 sps:$4 sm:$0xff]  }
 0x720   : > { %2536 = vmatprep.subr.bf16.mxu0 %v4752_v54 }
 0x721   : > { %v2098_v11 = vpop.permute.xlu1 %2097 }
 0x724   : > { %v4852_v59 = vpop.eup %4851 }
 0x725   : > { %v4854_v60 = vpop.eup %4853  ;;  %v1829_v61 = vmul.f32 %v4852_v59, %v4848_v45  ;;  %v4758_v59 = vld [vmem:[%s6128_s6 + $0x24] ss:$8 sps:$4 sm:$0xff]  }
 0x726   : > { %v1830_v62 = vmul.f32 %v4854_v60, %v4850_v48  ;;  %v4856_v63 = vpop.eup %4855  ;;  %v4760_v60 = vld [vmem:[%s6128_s6 + $0x30] ss:$8 sps:$4 sm:$0xff]  }
 0x727   : > { %v4858_v2 = vpop.eup %4857  ;;  %v1963_v3 = vmul.f32 %v4856_v63, %v4842_v41 }
 0x728   : > { %v1831_v57 = vpack.c.bf16 %v1830_v62, %v1829_v61  ;;  %v1962_v7 = vmul.f32 %v4858_v2, %v4840_v39  ;;  %v4860_v8 = vpop.eup %4859 }
 0x729   : > { %v4862_v10 = vpop.eup %4861  ;;  %v2094_v12 = vmul.f32 %v4860_v8, %v4846_v44  ;;  %v4160_v44 = vld [vmem:[%s6910_s2] ss:$0 sm:$0xff]  ;;  %v4763_v8 = vld [vmem:[%s6911_s27 + $0x8] sm:$0xff]  }
 0x72a   : > { %4406 = vmatmul.mubr.msk.bf16.vlgmr.msra.gmra.mrb[16].mxu1 %vm1682_vm8, %v1831_v57  ;;  %v1964_v9 = vpack.c.bf16 %v1963_v3, %v1962_v7  ;;  %v2095_v13 = vmul.f32 %v4862_v10, %v4844_v43  ;;  %v4764_v10 = vld [vmem:[%s6128_s6 + $0x40] ss:$8 sps:$4 sm:$0xff]  }
 0x72b   : > { %4416 = vmatpush3.bf16.msra.mxu1 %v1966_v1  ;;  %4417 = vmatprep.mubr.msk.bf16.mxu1 %vm5404_vm0, %v5403_v5 }
 0x72c   : > { %4427 = vmatprep.subr.bf16.mxu1 %v5403_v5  ;;  %v2096_v14 = vpack.c.bf16 %v2095_v13, %v2094_v12  ;;  %v4770_v12 = vld [vmem:[%s6128_s6 + $0x54] ss:$8 sps:$4 sm:$0xff]   ;;  %v4768_v13 = vld [vmem:[%s6128_s6 + $0x50] ss:$8 sps:$4 sm:$0xff]  }
 0x732   : > { %4418 = vmatmul.mubr.msk.bf16.vlgmr.msra.gmra.mrb[20].mxu1 %vm1682_vm8, %v1964_v9  ;;  %v4766_v9 = vld [vmem:[%s6128_s6 + $0x44] ss:$8 sps:$4 sm:$0xff]  }
 0x733   : > { %4428 = vmatpush3.bf16.msra.mxu1 %v2098_v11  ;;  %4429 = vmatprep.mubr.msk.bf16.mxu1 %vm5404_vm0, %v5403_v5  ;;  %v4767_v11 = vld [vmem:[%s6911_s27 + $0x10] sm:$0xff]  }
 0x734   : > { %4453 = vmatprep.subr.bf16.mxu1 %v5403_v5 }
 0x73a   : > { %4430 = vmatmul.mubr.msk.bf16.vlgmr.msra.gmra.mrb[24].mxu1 %vm1682_vm8, %v2096_v14  ;;  %v4771_v14 = vld [vmem:[%s6911_s27 + $0x18] sm:$0xff]  }
 0x73b   : > { %4469 = vmatprep.mubr.msk.bf16.mxu1 %vm5404_vm0, %v5403_v5  ;;  %4454 = vmatpush3.bf16.msra.mxu1 %v4759_v56 }
 0x73c   : > { %4455 = vmatprep.subr.bf16.mxu1 %v5403_v5 }
 0x73f   : > { %4456 = vmatpush3.bf16.msra.mxu1 %v4763_v8 }
 0x740   : > { %4457 = vmatprep.subr.bf16.mxu1 %v5403_v5 }
 0x743   : > { %4458 = vmatpush3.bf16.msra.mxu1 %v4767_v11 }
 0x744   : > { %4459 = vmatprep.subr.bf16.mxu1 %v5403_v5 }
 0x747   : > { %4460 = vmatpush3.bf16.msra.mxu1 %v4771_v14 }
 0x748   : > { %4461 = vmatprep.subr.bf16.mxu1 %v5403_v5 }
 0x74b   : > { %4462 = vmatpush3.bf16.msra.mxu1 %v4775_v17 }
 0x74c   : > { %4463 = vmatprep.subr.bf16.mxu1 %v5403_v5 }
 0x74f   : > { %4464 = vmatpush3.bf16.msra.mxu1 %v4779_v20 }
 0x750   : > { %4465 = vmatprep.subr.bf16.mxu1 %v5403_v5 }
 0x7fd   : > { %v1873_v19 = vpop.f32.mrb[16].mxu1 }
 0x7fe   : > { %v4407_v21 = vpop.f32.mrb[17].mxu1 }
 0x7ff   : > { %v1876_v22 = vpop.f32.mrb[18].mxu1  ;;  %v4780_v21 = vld [vmem:[%s6912_s7] sm:$0xff]  }
 0x800   : > { %v1880_v24 = vpack.c.bf16 %v1876_v22, %v1873_v19  ;;  %v4408_v27 = vpop.f32.mrb[19].mxu1  ;;  %v4776_v19 = vld [vmem:[%s6128_s6 + $0x70] ss:$8 sps:$4 sm:$0xff]   ;;  %v4781_v22 = vld [vmem:[%s6911_s27 + $0x30] sm:$0xff]   ;;  %s6923_s27 = sld [smem:[#allocation73_spill]] }
 0x801   : > { %4466 = vmatpush3.bf16.msra.mxu1 %v4781_v22 }
 0x802   : > { %1882 = vrot.lane.b32.xlu1 %v1880_v24, %s5406_s26  ;;  %4467 = vmatprep.subr.bf16.mxu1 %v5403_v5 }
 0x805   : > { %v2005_v6 = vpop.f32.mrb[20].mxu1  ;;  %4468 = vmatpush3.bf16.msra.mxu1 %v4782_v23 }
 0x806   : > { %v4419_v29 = vpop.f32.mrb[21].mxu1  ;;  %4473 = vmatprep.subr.bf16.mxu1 %v5403_v5  ;;  %s6924_s7 = scalar_lea.vmem %s6923_s27, %s6145_s19 }
 0x807   : > { %v2008_v30 = vpop.f32.mrb[22].mxu1 }
 0x808   : > { %v2012_v32 = vpack.c.bf16 %v2008_v30, %v2005_v6  ;;  %v4420_v34 = vpop.f32.mrb[23].mxu1 }
 0x809   : > { %v4169_v34 = vld [vmem:[%s6915_s3] ss:$0 sm:$0xff] }
 0x80a   : > { %2014 = vrot.lane.b32.xlu0 %v2012_v32, %s5407_s16 }
 0x80d   : > { %v2137_v0 = vpop.f32.mrb[24].mxu1 }
 0x80e   : > { %v4431_v36 = vpop.f32.mrb[25].mxu1 }
 0x80f   : > { %v2140_v37 = vpop.f32.mrb[26].mxu1 }
 0x810   : > { %v2144_v38 = vpack.c.bf16 %v2140_v37, %v2137_v0  ;;  %v4432_v39 = vpop.f32.mrb[27].mxu1 }
 0x812   : > { %2146 = vrot.lane.b32.xlu1 %v2144_v38, %s5405_s29  ;;  %v4170_v38 = vld [vmem:[%s6917_s28] ss:$0 sm:$0xff] }
 0x874   : > { %v1883_v40 = vpop.permute.xlu1 %1882 }
 0x875   : > { %1886 = vst.msk [vmem:[#allocation3] sm:$0xff] %vm1885_vm9, %v1883_v40 }
 0x87c   : > { %v2015_v41 = vpop.permute.xlu0 %2014 }
 0x87d   : > { %2018 = vst.msk [vmem:[#allocation3] sm:$0xff] %vm2017_vm10, %v2015_v41 }
 0x884   : > { %v2147_v42 = vpop.permute.xlu1 %2146 }
 0x885   : > { %2150 = vst.msk [vmem:[#allocation3] sm:$0xff] %vm2149_vm11, %v2147_v42 }
 0x88c   : > { %v2151_v43 = vld [vmem:[#allocation3] sm:$0xff] }
 0x88d   : > { %4450 = vmatmul.mubr.bf16.vlgmr.msra.gmra.mrb[12].mxu0 %v2151_v43 }
 0x88e   : > { %2568 = vmatprep.mubr.bf16.mxu0 %v5402_v4  ;;  %2537 = vmatpush1.bf16.msra.mxu0 %v4750_v53 }
 0x88f   : > { %2538 = vmatprep.subr.bf16.mxu0 %v4755_v55 }
 0x892   : > { %2539 = vmatpush1.bf16.msra.mxu0 %v4753_v58  ;;  %v4171_v58 = vld [vmem:[%s6919_s25] ss:$0 sm:$0xff] }
 0x893   : > { %2540 = vmatprep.subr.bf16.mxu0 %v4758_v59 }
 0x960   : > { %v2257_v45 = vpop.f32.mrb[12].mxu0 }
 0x961   : > { %v2258_v46 = vadd.f32 %v4160_v44, %v2257_v45  ;;  %v4451_v47 = vpop.f32.mrb[13].mxu0 }
 0x962   : > { %v2260_v48 = vpop.f32.mrb[14].mxu0 }
 0x963   : > { %v2261_v49 = vadd.f32 %v4160_v44, %v2260_v48  ;;  %v4452_v50 = vpop.f32.mrb[15].mxu0  ;;  %v2264_v51 = vadd.f32 %v2258_v46, %v6239_v25  ;;  %v4756_v25 = vld [vmem:[%s6128_s6 + $0x20] ss:$8 sps:$4 sm:$0xff]  }
 0x964   : > { %2541 = vmatpush1.bf16.msra.mxu0 %v4756_v25 }
 0x965   : > { %2268 = vadd.xlane.f32.xlu0 %v2264_v51  ;;  %v2265_v52 = vadd.f32 %v2261_v49, %v6241_v26  ;;  %v4762_v26 = vld [vmem:[%s6128_s6 + $0x34] ss:$8 sps:$4 sm:$0xff]   ;;  %s6913_s6 = sld [smem:[#allocation57_spill]] }
 0x966   : > { %2542 = vmatprep.subr.bf16.mxu0 %v4762_v26 }
 0x967   : > { %2270 = vadd.xlane.f32.xlu1 %v2265_v52 }
 0x968   : > { %2543 = vmatpush1.bf16.msra.mxu0 %v4760_v60 }
 0x969   : > { %2544 = vmatprep.subr.bf16.mxu0 %v4766_v9 }
 0x96b   : > { %v2438_v43 = vld [vmem:[%s6913_s6] sm:$0x3] }
 0x96c   : > { %2545 = vmatpush1.bf16.msra.mxu0 %v4764_v10  ;;  %v2443_v44 = vrot.slane %v2438_v43, %v6260_v33  ;;  %v2447_v45 = vrot.slane %v2438_v43, %v6263_v35 }
 0x96d   : > { %2546 = vmatprep.subr.bf16.mxu0 %v4770_v12 }
 0x970   : > { %2547 = vmatpush1.bf16.msra.mxu0 %v4768_v13 }
 0x971   : > { %2548 = vmatprep.subr.bf16.mxu0 %v4774_v15 }
 0x974   : > { %2549 = vmatpush1.bf16.msra.mxu0 %v4772_v16 }
 0x975   : > { %2550 = vmatprep.subr.bf16.mxu0 %v4778_v18 }
 0x978   : > { %2551 = vmatpush1.bf16.msra.mxu0 %v4776_v19 }
 0x979   : > { %4497 = vmatprep.subr.bf16.mxu0 %v5403_v5 }
 0x97b   : > { %2569 = vmatmul.mubr.bf16.vlgmr.msra.gmra.mrb[16].mxu0 %v4780_v21 }
 0x97c   : > { %4499 = vmatprep.mubr.msk.bf16.mxu0 %vm5404_vm0, %v5403_v5 }
 0x9f2   : > { %v2269_v61 = vpop.xlane.xlu0 %2268 }
 0x9f3   : > { %v2273_v62 = vmul.f32 0.0078125, %v2269_v61 }
 0x9f4   : > { %v2271_v57 = vpop.xlane.xlu1 %2270 }
 0x9f5   : > { %v2275_v63 = vsub.f32 %v2264_v51, %v2273_v62  ;;  %v2274_v1 = vmul.f32 0.0078125, %v2271_v57 }
 0x9f7   : > { %v2276_v2 = vsub.f32 %v2265_v52, %v2274_v1  ;;  %v2277_v3 = vmul.f32 %v2275_v63, %v2275_v63 }
 0x9f9   : > { %2279 = vadd.xlane.f32.xlu0 %v2277_v3  ;;  %v2278_v7 = vmul.f32 %v2276_v2, %v2276_v2 }
 0x9fd   : > { %2281 = vadd.xlane.f32.xlu0 %v2278_v7 }
 0xa4e   : > { %v2570_v46 = vpop.f32.mrb[16].mxu0 }
 0xa4f   : > { %v2571_v47 = vadd.f32 %v2570_v46, %v2443_v44  ;;  %v2572_v48 = vpop.f32.mrb[17].mxu0 }
 0xa50   : > { %v2573_v49 = vadd.f32 %v2572_v48, %v2447_v45  ;;  %v2574_v50 = vpop.f32.mrb[18].mxu0 }
 0xa51   : > { %v2575_v51 = vadd.f32 %v2574_v50, %v2443_v44  ;;  %v2576_v52 = vpop.f32.mrb[19].mxu0 }
 0xa52   : > { %v2577_v53 = vadd.f32 %v2576_v52, %v2447_v45 }
 0xa53   : > { %v2580_v54 = vpack.c.bf16 %v2575_v51, %v2571_v47 }
 0xa54   : > { %v6445_v55 = vpack.c.bf16 %v2577_v53, %v2573_v49 }
 0xa55   : > { %v2586_v56 = vsel %vm1630_vm1, %v2580_v54, 0 }
 0xa86   : > { %v2280_v24 = vpop.xlane.xlu0 %2279 }
 0xa87   : > { %v2283_v27 = vmul.f32 0.0078125, %v2280_v24 }
 0xa89   : > { %v2285_v6 = vadd.f32 1e-05, %v2283_v27 }
 0xa8a   : > { %v2282_v28 = vpop.xlane.xlu0 %2281 }
 0xa8b   : > { %4863 = vrsqrt.f32 %v2285_v6  ;;  %v2284_v29 = vmul.f32 0.0078125, %v2282_v28 }
 0xa8d   : > { %v2286_v30 = vadd.f32 1e-05, %v2284_v29 }
 0xa8f   : > { %4865 = vrsqrt.f32 %v2286_v30 }
 0xa95   : > { %v4864_v31 = vpop.eup %4863 }
 0xa96   : > { %v2289_v32 = vmul.f32 %v4864_v31, %v2275_v63  ;;  %v1345_v63 = vld [vmem:[%s6920_s0] sm:$0x1] }
 0xa97   : > { %vm1346_vm12 = vcmp.gt.f32.partialorder %v1345_v63, 0.5 }
 0xa98   : > { %v2297_v37 = vmul.f32 %v4169_v34, %v2289_v32  ;;  %v1364_v1 = vsel %vm1346_vm12, -1e+09, %v5403_v5 }
 0xa99   : > { %v4866_v0 = vpop.eup %4865 }
 0xa9a   : > { %v2290_v36 = vmul.f32 %v4866_v0, %v2276_v2  ;;  %v6434_v40 = vadd.f32 %v4170_v38, %v2297_v37  ;;  %v6463_v2 = vrot.slane %v1364_v1, %v6260_v33 }
 0xa9c   : > { %v2298_v39 = vmul.f32 %v4169_v34, %v2290_v36 }
 0xa9e   : > { %v6436_v41 = vadd.f32 %v4170_v38, %v2298_v39 }
 0xaa0   : > { %v2307_v42 = vpack.c.bf16 %v6436_v41, %v6434_v40 }
 0xaa2   : > { %4470 = vmatmul.mubr.bf16.vlgmr.msra.gmra.mrb[28].mxu1 %v2307_v42 }
 0xaa3   : > { %4475 = vmatprep.mubr.msk.bf16.mxu1 %vm5404_vm0, %v5403_v5  ;;  %4474 = vmatpush3.bf16.xpose.msra.mxu1 %v2586_v56 }
 0xaa4   : > { %4479 = vmatprep.subr.bf16.mxu1 %v5403_v5 }
 0xb75   : > { %v2413_v59 = vpop.f32.mrb[28].mxu1 }
 0xb76   : > { %v4471_v25 = vpop.f32.mrb[29].mxu1  ;;  %v2414_v60 = vadd.f32 %v4171_v58, %v2413_v59 }
 0xb77   : > { %v2416_v26 = vpop.f32.mrb[30].mxu1 }
 0xb78   : > { %v2417_v61 = vadd.f32 %v4171_v58, %v2416_v26  ;;  %v4472_v62 = vpop.f32.mrb[31].mxu1 }
 0xb7a   : > { %v2579_v57 = vpack.c.bf16 %v2417_v61, %v2414_v60 }
 0xb7c   : > { %4476 = vmatmul.mubr.msk.bf16.vlgmr.msra.gmra.mrb[32].mxu1 %vm1630_vm1, %v2579_v57 }
 0xb7d   : > { %4480 = vmatpush3.bf16.msra.mxu1 %v6445_v55  ;;  %4481 = vmatprep.mubr.msk.bf16.mxu1 %vm5404_vm0, %v5403_v5 }
 0xb7e   : > { %4485 = vmatprep.subr.bf16.mxu1 %v5403_v5 }
 0xc4f   : > { %v2622_v3 = vpop.f32.mrb[32].mxu1 }
 0xc50   : > { %v2629_v7 = vmul.f32 0.17677669, %v2622_v3  ;;  %v4477_v8 = vpop.f32.mrb[33].mxu1 }
 0xc51   : > { %v2625_v9 = vpop.f32.mrb[34].mxu1 }
 0xc52   : > { %v2630_v10 = vmul.f32 0.17677669, %v2625_v9  ;;  %v4478_v11 = vpop.f32.mrb[35].mxu1  ;;  %v2637_v12 = vadd.f32 %v6463_v2, %v2629_v7 }
 0xc54   : > { %v2639_v13 = vsel %vm1682_vm8, %v2637_v12, -inf  ;;  %v2638_v14 = vadd.f32 %v6463_v2, %v2630_v10 }
 0xc55   : > { %2640 = vmax.xlane.f32.xlu0 %v2639_v13 }
 0xc56   : > { %v2642_v15 = vsel %vm1682_vm8, %v2638_v14, -inf }
 0xc57   : > { %2643 = vmax.xlane.f32.xlu1 %v2642_v15 }
 0xce2   : > { %v2641_v16 = vpop.xlane.xlu0 %2640 }
 0xce3   : > { %v2645_v17 = vsub.f32 %v2637_v12, %v2641_v16 }
 0xce4   : > { %v2644_v18 = vpop.xlane.xlu1 %2643 }
 0xce5   : > { %v2647_v19 = vmul.f32 1.442695, %v2645_v17  ;;  %v2646_v20 = vsub.f32 %v2638_v14, %v2644_v18 }
 0xce7   : > { %4867 = vpow2.f32 %v2647_v19  ;;  %v2649_v21 = vmul.f32 1.442695, %v2646_v20 }
 0xce9   : > { %4869 = vpow2.f32 %v2649_v21 }
 0xcf1   : > { %v4868_v22 = vpop.eup %4867 }
 0xcf2   : > { %v2651_v23 = vsel %vm1682_vm8, %v4868_v22, 0.0 }
 0xcf3   : > { %v4870_v24 = vpop.eup %4869  ;;  %2652 = vadd.xlane.f32.xlu0 %v2651_v23 }
 0xcf4   : > { %v2654_v27 = vsel %vm1682_vm8, %v4870_v24, 0.0 }
 0xcf5   : > { %2655 = vadd.xlane.f32.xlu1 %v2654_v27 }
 0xd06   : > { %2709 = vrot.lane.b32.xlu1 %v2579_v57, %s5405_s29 }
 0xd09   : > { %2712 = vrot.lane.b32.xlu0 %v2580_v54, %s5405_s29 }
 0xd0a   : > { %2844 = vrot.lane.b32.xlu1 %v2580_v54, %s5407_s16 }
 0xd0d   : > { %2975 = vrot.lane.b32.xlu0 %v2580_v54, %s5406_s26 }
 0xd0e   : > { %2842 = vrot.lane.b32.xlu1 %v2579_v57, %s5407_s16 }
 0xd12   : > { %2973 = vrot.lane.b32.xlu1 %v2579_v57, %s5406_s26 }
 0xd80   : > { %v2653_v6 = vpop.xlane.xlu0 %2652 }
 0xd81   : > { %4871 = vrcp.f32 %v2653_v6 }
 0xd82   : > { %v2656_v28 = vpop.xlane.xlu1 %2655 }
 0xd83   : > { %4873 = vrcp.f32 %v2656_v28 }
 0xd84   : > { %v2713_v30 = vpop.permute.xlu0 %2712 }
 0xd85   : > { %v2718_v42 = vsel %vm1630_vm1, %v2713_v30, 0 }
 0xd86   : > { %v2710_v29 = vpop.permute.xlu1 %2709 }
 0xd88   : > { %v2976_v38 = vpop.permute.xlu0 %2975 }
 0xd89   : > { %v2981_v44 = vsel %vm1630_vm1, %v2976_v38, 0 }
 0xd8a   : > { %v2845_v31 = vpop.permute.xlu1 %2844 }
 0xd8b   : > { %v4872_v32 = vpop.eup %4871  ;;  %v2850_v34 = vsel %vm1630_vm1, %v2845_v31, 0 }
 0xd8c   : > { %4498 = vmatpush3.bf16.xpose.msra.mxu0 %v2850_v34  ;;  %v2659_v36 = vmul.f32 %v4872_v32, %v4868_v22 }
 0xd8d   : > { %v4874_v0 = vpop.eup %4873  ;;  %4509 = vmatprep.subr.bf16.mxu0 %v5403_v5 }
 0xd8e   : > { %v2660_v37 = vmul.f32 %v4874_v0, %v4870_v24  ;;  %v2843_v43 = vpop.permute.xlu1 %2842 }
 0xd90   : > { %v2661_v39 = vpack.c.bf16 %v2660_v37, %v2659_v36 }
 0xd92   : > { %4482 = vmatmul.mubr.msk.bf16.vlgmr.msra.gmra.mrb[36].mxu1 %vm1682_vm8, %v2661_v39  ;;  %v2974_v45 = vpop.permute.xlu1 %2973 }
 0xd93   : > { %4486 = vmatpush3.bf16.xpose.msra.mxu1 %v2718_v42  ;;  %4500 = vmatmul.mubr.msk.bf16.vlgmr.msra.gmra.mrb[20].mxu0 %vm1630_vm1, %v2843_v43 }
 0xd94   : > { %4510 = vmatpush3.bf16.xpose.msra.mxu0 %v2981_v44  ;;  %4487 = vmatprep.mubr.msk.bf16.mxu1 %vm5404_vm0, %v5403_v5 }
 0xd95   : > { %4511 = vmatprep.mubr.msk.bf16.mxu0 %vm5404_vm0, %v5403_v5  ;;  %4491 = vmatprep.subr.bf16.mxu1 %v5403_v5 }
 0xd96   : > { %4521 = vmatprep.subr.bf16.mxu0 %v5403_v5 }
 0xd9a   : > { %4488 = vmatmul.mubr.msk.bf16.vlgmr.msra.gmra.mrb[40].mxu1 %vm1630_vm1, %v2710_v29 }
 0xd9b   : > { %4512 = vmatmul.mubr.msk.bf16.vlgmr.msra.gmra.mrb[24].mxu0 %vm1630_vm1, %v2974_v45  ;;  %4493 = vmatprep.mubr.msk.bf16.mxu1 %vm5404_vm0, %v5403_v5 }
 0xd9c   : > { %4537 = vmatprep.mubr.msk.bf16.mxu0 %vm5404_vm0, %v5403_v5 }
 0xe65   : > { %v2699_v46 = vpop.f32.mrb[36].mxu1 }
 0xe66   : > { %v4483_v47 = vpop.f32.mrb[37].mxu1  ;;  %v2886_v48 = vpop.f32.mrb[20].mxu0 }
 0xe67   : > { %v2702_v49 = vpop.f32.mrb[38].mxu1  ;;  %v4501_v50 = vpop.f32.mrb[21].mxu0  ;;  %v2893_v58 = vmul.f32 0.17677669, %v2886_v48 }
 0xe68   : > { %v2706_v51 = vpack.c.bf16 %v2702_v49, %v2699_v46  ;;  %v4484_v52 = vpop.f32.mrb[39].mxu1  ;;  %v2889_v53 = vpop.f32.mrb[22].mxu0 }
 0xe69   : > { %v4502_v54 = vpop.f32.mrb[23].mxu0  ;;  %v2894_v8 = vmul.f32 0.17677669, %v2889_v53  ;;  %v2895_v11 = vadd.f32 %v2893_v58, %v6463_v2 }
 0xe6a   : > { %2707 = vst.msk [vmem:[#allocation3] sm:$0xff] %vm1630_vm1, %v2706_v51 }
 0xe6b   : > { %v2897_v15 = vsel %vm1682_vm8, %v2895_v11, -inf  ;;  %v2896_v16 = vadd.f32 %v2894_v8, %v6463_v2 }
 0xe6d   : > { %v2754_v56 = vpop.f32.mrb[40].mxu1  ;;  %v2900_v18 = vsel %vm1682_vm8, %v2896_v16, -inf }
 0xe6e   : > { %v2761_v59 = vmul.f32 0.17677669, %v2754_v56  ;;  %v4489_v25 = vpop.f32.mrb[41].mxu1  ;;  %v3017_v26 = vpop.f32.mrb[24].mxu0 }
 0xe6f   : > { %v2757_v60 = vpop.f32.mrb[42].mxu1  ;;  %v4513_v61 = vpop.f32.mrb[25].mxu0  ;;  %v3024_v14 = vmul.f32 0.17677669, %v3017_v26 }
 0xe70   : > { %v2762_v62 = vmul.f32 0.17677669, %v2757_v60  ;;  %v4490_v57 = vpop.f32.mrb[43].mxu1  ;;  %v3020_v63 = vpop.f32.mrb[26].mxu0  ;;  %v2763_v1 = vadd.f32 %v2761_v59, %v6463_v2 }
 0xe71   : > { %v3025_v3 = vmul.f32 0.17677669, %v3020_v63  ;;  %v4514_v7 = vpop.f32.mrb[27].mxu0  ;;  %v3026_v19 = vadd.f32 %v3024_v14, %v6463_v2 }
 0xe72   : > { %v2765_v9 = vsel %vm1682_vm8, %v2763_v1, -inf  ;;  %v2764_v10 = vadd.f32 %v2762_v62, %v6463_v2 }
 0xe73   : > { %2766 = vmax.xlane.f32.xlu0 %v2765_v9  ;;  %v3027_v13 = vadd.f32 %v3025_v3, %v6463_v2  ;;  %v3028_v20 = vsel %vm1682_vm8, %v3026_v19, -inf }
 0xe74   : > { %v2768_v12 = vsel %vm1682_vm8, %v2764_v10, -inf }
 0xe75   : > { %2769 = vmax.xlane.f32.xlu1 %v2768_v12  ;;  %v3031_v17 = vsel %vm1682_vm8, %v3027_v13, -inf }
 0xe77   : > { %2898 = vmax.xlane.f32.xlu0 %v2897_v15 }
 0xe79   : > { %3032 = vmax.xlane.f32.xlu1 %v3031_v17  ;;  %v4783_v17 = vld [vmem:[%s6921_s13] sm:$0xff]  }
 0xe7a   : > { %4522 = vmatpush3.bf16.msra.mxu0 %v4783_v17  ;;  %v4817_v17 = vld [vmem:[%s6204_s20 + $0x48] sm:$0xff]  }
 0xe7b   : > { %2901 = vmax.xlane.f32.xlu0 %v2900_v18  ;;  %v4784_v18 = vld [vmem:[%s6921_s13 + $0x8] sm:$0xff]   ;;  %4523 = vmatprep.subr.bf16.mxu0 %v5403_v5 }
 0xe7e   : > { %4524 = vmatpush3.bf16.msra.mxu0 %v4784_v18  ;;  %v4818_v18 = vld [vmem:[%s6204_s20 + $0x8] sm:$0xff]  }
 0xe7f   : > { %3029 = vmax.xlane.f32.xlu0 %v3028_v20  ;;  %4525 = vmatprep.subr.bf16.mxu0 %v5403_v5  ;;  %v4786_v20 = vld [vmem:[%s6921_s13 + $0x18] sm:$0xff]  }
 0xf00   : > { %v2767_v21 = vpop.xlane.xlu0 %2766 }
 0xf01   : > { %v2771_v31 = vsub.f32 %v2763_v1, %v2767_v21 }
 0xf02   : > { %v2770_v22 = vpop.xlane.xlu1 %2769 }
 0xf03   : > { %v2772_v32 = vsub.f32 %v2764_v10, %v2770_v22  ;;  %v2773_v37 = vmul.f32 1.442695, %v2771_v31 }
 0xf04   : > { %v2899_v23 = vpop.xlane.xlu0 %2898 }
 0xf05   : > { %v2903_v24 = vsub.f32 %v2895_v11, %v2899_v23  ;;  %v2775_v38 = vmul.f32 1.442695, %v2772_v32  ;;  %v4790_v32 = vld [vmem:[%s6921_s13 + $0x38] sm:$0xff]  }
 0xf06   : > { %v3033_v27 = vpop.xlane.xlu1 %3032 }
 0xf07   : > { %v2905_v6 = vmul.f32 1.442695, %v2903_v24  ;;  %v3035_v28 = vsub.f32 %v3027_v13, %v3033_v27  ;;  %v4788_v24 = vld [vmem:[%s6921_s13 + $0x28] sm:$0xff]  }
 0xf08   : > { %v2902_v29 = vpop.xlane.xlu0 %2901 }
 0xf09   : > { %4875 = vpow2.f32 %v2905_v6  ;;  %v2904_v30 = vsub.f32 %v2896_v16, %v2902_v29  ;;  %v3038_v34 = vmul.f32 1.442695, %v3035_v28  ;;  %v4789_v29 = vld [vmem:[%s6921_s13 + $0x30] sm:$0xff]  }
 0xf0b   : > { %v2907_v0 = vmul.f32 1.442695, %v2904_v30 }
 0xf0c   : > { %v3030_v36 = vpop.xlane.xlu0 %3029 }
 0xf0d   : > { %4877 = vpow2.f32 %v2907_v0  ;;  %v3034_v2 = vsub.f32 %v3026_v19, %v3030_v36  ;;  %v4785_v19 = vld [vmem:[%s6921_s13 + $0x10] sm:$0xff]  }
 0xf0e   : > { %4879 = vpow2.f32 %v3038_v34  ;;  %4526 = vmatpush3.bf16.msra.mxu0 %v4785_v19  ;;  %v4819_v19 = vld [vmem:[%s6204_s20 + $0x50] sm:$0xff]  }
 0xf0f   : > { %v3036_v39 = vmul.f32 1.442695, %v3034_v2  ;;  %4527 = vmatprep.subr.bf16.mxu0 %v5403_v5 }
 0xf11   : > { %4881 = vpow2.f32 %v3036_v39 }
 0xf12   : > { %4883 = vpow2.f32 %v2773_v37  ;;  %4528 = vmatpush3.bf16.msra.mxu0 %v4786_v20  ;;  %v4820_v20 = vld [vmem:[%s6204_s20 + $0x10] sm:$0xff]  }
 0xf13   : > { %v4876_v42 = vpop.eup %4875  ;;  %4885 = vpow2.f32 %v2775_v38  ;;  %4529 = vmatprep.subr.bf16.mxu0 %v5403_v5 }
 0xf14   : > { %v2909_v43 = vsel %vm1682_vm8, %v4876_v42, 0.0 }
 0xf15   : > { %2910 = vadd.xlane.f32.xlu0 %v2909_v43 }
 0xf17   : > { %v4878_v44 = vpop.eup %4877 }
 0xf18   : > { %v2912_v45 = vsel %vm1682_vm8, %v4878_v44, 0.0  ;;  %v4880_v46 = vpop.eup %4879 }
 0xf19   : > { %2913 = vadd.xlane.f32.xlu1 %v2912_v45  ;;  %v3043_v50 = vsel %vm1682_vm8, %v4880_v46, 0.0  ;;  %v4205_v45 = vld [vmem:[%s6924_s7] ss:$0 sm:$0xff] }
 0xf1b   : > { %v4882_v47 = vpop.eup %4881 }
 0xf1c   : > { %v4884_v48 = vpop.eup %4883  ;;  %v3040_v49 = vsel %vm1682_vm8, %v4882_v47, 0.0 }
 0xf1d   : > { %v4886_v51 = vpop.eup %4885  ;;  %3041 = vadd.xlane.f32.xlu0 %v3040_v49  ;;  %3044 = vadd.xlane.f32.xlu1 %v3043_v50  ;;  %v2777_v52 = vsel %vm1682_vm8, %v4884_v48, 0.0 }
 0xf1e   : > { %v2780_v53 = vsel %vm1682_vm8, %v4886_v51, 0.0 }
 0xf21   : > { %2778 = vadd.xlane.f32.xlu0 %v2777_v52  ;;  %2781 = vadd.xlane.f32.xlu1 %v2780_v53 }
 0xf32   : > { %2920 = vrot.lane.b32.xlu1 %v6445_v55, %s5407_s16 }
 0xf36   : > { %3051 = vrot.lane.b32.xlu1 %v6445_v55, %s5406_s26 }
 0xf37   : > { %2789 = vrot.lane.b32.xlu0 %v6445_v55, %s5405_s29 }
 0xfa2   : > { %v2911_v54 = vpop.xlane.xlu0 %2910 }
 0xfa6   : > { %v2914_v56 = vpop.xlane.xlu1 %2913 }
 0xfaa   : > { %v3042_v58 = vpop.xlane.xlu0 %3041  ;;  %v3045_v59 = vpop.xlane.xlu1 %3044 }
 0xfae   : > { %v2779_v25 = vpop.xlane.xlu0 %2778  ;;  %v2782_v26 = vpop.xlane.xlu1 %2781 }
 0xfaf   : > { %4887 = vrcp.f32 %v2779_v25 }
 0xfb0   : > { %4889 = vrcp.f32 %v2782_v26 }
 0xfb1   : > { %4891 = vrcp.f32 %v2914_v56 }
 0xfb2   : > { %v2790_v60 = vpop.permute.xlu0 %2789  ;;  %4893 = vrcp.f32 %v2911_v54  ;;  %v2921_v3 = vpop.permute.xlu1 %2920 }
 0xfb3   : > { %4492 = vmatpush3.bf16.msra.mxu1 %v2790_v60  ;;  %4895 = vrcp.f32 %v3042_v58 }
 0xfb4   : > { %4503 = vmatprep.subr.bf16.mxu1 %v5403_v5  ;;  %4897 = vrcp.f32 %v3045_v59 }
 0xfb6   : > { %v3052_v13 = vpop.permute.xlu1 %3051 }
 0xfb9   : > { %v4888_v61 = vpop.eup %4887 }
 0xfba   : > { %v4890_v62 = vpop.eup %4889  ;;  %v2785_v57 = vmul.f32 %v4888_v61, %v4884_v48 }
 0xfbb   : > { %v2786_v63 = vmul.f32 %v4890_v62, %v4886_v51  ;;  %v4892_v1 = vpop.eup %4891 }
 0xfbc   : > { %v4894_v7 = vpop.eup %4893  ;;  %v2918_v8 = vmul.f32 %v4892_v1, %v4878_v44 }
 0xfbd   : > { %v2787_v55 = vpack.c.bf16 %v2786_v63, %v2785_v57  ;;  %v2917_v9 = vmul.f32 %v4894_v7, %v4876_v42  ;;  %v4896_v10 = vpop.eup %4895 }
 0xfbe   : > { %v4898_v12 = vpop.eup %4897  ;;  %v3048_v14 = vmul.f32 %v4896_v10, %v4882_v47 }
 0xfbf   : > { %4494 = vmatmul.mubr.msk.bf16.vlgmr.msra.gmra.mrb[44].mxu1 %vm1682_vm8, %v2787_v55  ;;  %v2919_v11 = vpack.c.bf16 %v2918_v8, %v2917_v9  ;;  %v3049_v15 = vmul.f32 %v4898_v12, %v4880_v46 }
 0xfc0   : > { %4504 = vmatpush3.bf16.msra.mxu1 %v2921_v3  ;;  %4505 = vmatprep.mubr.msk.bf16.mxu1 %vm5404_vm0, %v5403_v5 }
 0xfc1   : > { %4515 = vmatprep.subr.bf16.mxu1 %v5403_v5  ;;  %v3050_v16 = vpack.c.bf16 %v3049_v15, %v3048_v14  ;;  %v4815_v15 = vld [vmem:[%s6204_s20 + $0x40] sm:$0xff]  }
 0xfc7   : > { %4506 = vmatmul.mubr.msk.bf16.vlgmr.msra.gmra.mrb[48].mxu1 %vm1682_vm8, %v2919_v11 }
 0xfc8   : > { %4516 = vmatpush3.bf16.msra.mxu1 %v3052_v13  ;;  %4517 = vmatprep.mubr.msk.bf16.mxu1 %vm5404_vm0, %v5403_v5 }
 0xfcf   : > { %4518 = vmatmul.mubr.msk.bf16.vlgmr.msra.gmra.mrb[52].mxu1 %vm1682_vm8, %v3050_v16  ;;  %v4816_v16 = vld [vmem:[%s6204_s20] sm:$0xff]  }
 0xfd0   : > { %3400 = vmatprep.mubr.bf16.mxu1 %v5402_v4  ;;  %v4787_v4 = vld [vmem:[%s6921_s13 + $0x20] sm:$0xff]  }
 0xfd1   : > { %4530 = vmatpush3.bf16.msra.mxu0 %v4787_v4  ;;  %v4822_v4 = vld [vmem:[%s6204_s20 + $0x18] sm:$0xff]  }
 0xfd2   : > { %4531 = vmatprep.subr.bf16.mxu0 %v5403_v5 }
 0xfd5   : > { %4532 = vmatpush3.bf16.msra.mxu0 %v4788_v24  ;;  %v4825_v24 = vld [vmem:[%s6204_s20 + $0x68] sm:$0xff]  }
 0xfd6   : > { %4533 = vmatprep.subr.bf16.mxu0 %v5403_v5 }
 0xfd9   : > { %4534 = vmatpush3.bf16.msra.mxu0 %v4789_v29 }
 0xfda   : > { %4535 = vmatprep.subr.bf16.mxu0 %v5403_v5 }
 0xfdd   : > { %4536 = vmatpush3.bf16.msra.mxu0 %v4790_v32 }
 0xfde   : > { %4343 = vmatprep.subr.bf16.mxu0 %v4815_v15 }
0x1092   : > { %v2829_v21 = vpop.f32.mrb[44].mxu1 }
0x1093   : > { %v4495_v22 = vpop.f32.mrb[45].mxu1 }
0x1094   : > { %v2832_v23 = vpop.f32.mrb[46].mxu1  ;;  %v4823_v22 = vld [vmem:[%s6204_s20 + $0x60] sm:$0xff]  }
0x1095   : > { %v2836_v27 = vpack.c.bf16 %v2832_v23, %v2829_v21  ;;  %v4496_v6 = vpop.f32.mrb[47].mxu1  ;;  %v4821_v21 = vld [vmem:[%s6204_s20 + $0x58] sm:$0xff]   ;;  %v4824_v23 = vld [vmem:[%s6204_s20 + $0x20] sm:$0xff]  }
0x1097   : > { %2838 = vrot.lane.b32.xlu1 %v2836_v27, %s5406_s26  ;;  %s6922_s26 = sld [smem:[#allocation56_spill]] }
0x109a   : > { %v2960_v28 = vpop.f32.mrb[48].mxu1 }
0x109b   : > { %v4507_v30 = vpop.f32.mrb[49].mxu1 }
0x109c   : > { %v2963_v31 = vpop.f32.mrb[50].mxu1 }
0x109d   : > { %v2967_v34 = vpack.c.bf16 %v2963_v31, %v2960_v28  ;;  %v4508_v0 = vpop.f32.mrb[51].mxu1  ;;  %v4791_v54 = vld [vmem:[%s6922_s26] ss:$8 sps:$4 sm:$0xff]   ;;  %v4793_v56 = vld [vmem:[%s6922_s26 + $0x4] ss:$8 sps:$4 sm:$0xff]  }
0x109e   : > { %v4796_v58 = vld [vmem:[%s6922_s26 + $0x14] ss:$8 sps:$4 sm:$0xff]   ;;  %3368 = vmatprep.subr.bf16.mxu1 %v4793_v56  ;;  %v4794_v59 = vld [vmem:[%s6922_s26 + $0x10] ss:$8 sps:$4 sm:$0xff]   ;;  %v4799_v63 = vld [vmem:[%s6922_s26 + $0x24] ss:$8 sps:$4 sm:$0xff]  }
0x109f   : > { %2969 = vrot.lane.b32.xlu0 %v2967_v34, %s5407_s16  ;;  %3369 = vmatpush1.bf16.msra.mxu1 %v4791_v54  ;;  %v4797_v55 = vld [vmem:[%s6922_s26 + $0x20] ss:$8 sps:$4 sm:$0xff]   ;;  %v4802_v1 = vld [vmem:[%s6922_s26 + $0x34] ss:$8 sps:$4 sm:$0xff]   ;;  %v4800_v3 = vld [vmem:[%s6922_s26 + $0x30] ss:$8 sps:$4 sm:$0xff]  }
0x10a0   : > { %3370 = vmatprep.subr.bf16.mxu1 %v4796_v58  ;;  %v4805_v7 = vld [vmem:[%s6922_s26 + $0x44] ss:$8 sps:$4 sm:$0xff]   ;;  %v4803_v8 = vld [vmem:[%s6922_s26 + $0x40] ss:$8 sps:$4 sm:$0xff]   ;;  %v4808_v9 = vld [vmem:[%s6922_s26 + $0x54] ss:$8 sps:$4 sm:$0xff]  }
0x10a1   : > { %v4806_v10 = vld [vmem:[%s6922_s26 + $0x50] ss:$8 sps:$4 sm:$0xff]   ;;  %v4811_v11 = vld [vmem:[%s6922_s26 + $0x64] ss:$8 sps:$4 sm:$0xff]   ;;  %v4809_v12 = vld [vmem:[%s6922_s26 + $0x60] ss:$8 sps:$4 sm:$0xff]  }
0x10a2   : > { %v3091_v36 = vpop.f32.mrb[52].mxu1  ;;  %v4814_v13 = vld [vmem:[%s6922_s26 + $0x74] ss:$8 sps:$4 sm:$0xff]   ;;  %v4812_v14 = vld [vmem:[%s6922_s26 + $0x70] ss:$8 sps:$4 sm:$0xff]  }
0x10a3   : > { %v4519_v2 = vpop.f32.mrb[53].mxu1  ;;  %3371 = vmatpush1.bf16.msra.mxu1 %v4794_v59  ;;  %v4214_v0 = vld [vmem:[%s6926_s12] ss:$0 sm:$0xff] }
0x10a4   : > { %v3094_v37 = vpop.f32.mrb[54].mxu1  ;;  %3372 = vmatprep.subr.bf16.mxu1 %v4799_v63 }
0x10a5   : > { %v3098_v38 = vpack.c.bf16 %v3094_v37, %v3091_v36  ;;  %v4520_v39 = vpop.f32.mrb[55].mxu1 }
0x10a7   : > { %3100 = vrot.lane.b32.xlu1 %v3098_v38, %s5405_s29  ;;  %3373 = vmatpush1.bf16.msra.mxu1 %v4797_v55  ;;  %v4215_v38 = vld [vmem:[%s1318_s10] ss:$0 sm:$0xff] }
0x10a8   : > { %3374 = vmatprep.subr.bf16.mxu1 %v4802_v1 }
0x10ab   : > { %3375 = vmatpush1.bf16.msra.mxu1 %v4800_v3 }
0x10ac   : > { %3376 = vmatprep.subr.bf16.mxu1 %v4805_v7 }
0x10af   : > { %3377 = vmatpush1.bf16.msra.mxu1 %v4803_v8 }
0x10b0   : > { %3378 = vmatprep.subr.bf16.mxu1 %v4808_v9 }
0x10b3   : > { %3379 = vmatpush1.bf16.msra.mxu1 %v4806_v10 }
0x10b4   : > { %3380 = vmatprep.subr.bf16.mxu1 %v4811_v11 }
0x10b7   : > { %3381 = vmatpush1.bf16.msra.mxu1 %v4809_v12 }
0x10b8   : > { %3382 = vmatprep.subr.bf16.mxu1 %v4814_v13 }
0x10bb   : > { %3383 = vmatpush1.bf16.msra.mxu1 %v4812_v14 }
0x1109   : > { %v2839_v42 = vpop.permute.xlu1 %2838 }
0x110a   : > { %2841 = vst.msk [vmem:[#allocation3] sm:$0xff] %vm1885_vm9, %v2839_v42 }
0x1111   : > { %v2970_v43 = vpop.permute.xlu0 %2969 }
0x1112   : > { %2972 = vst.msk [vmem:[#allocation3] sm:$0xff] %vm2017_vm10, %v2970_v43 }
0x1119   : > { %v3101_v44 = vpop.permute.xlu1 %3100 }
0x111a   : > { %3103 = vst.msk [vmem:[#allocation3] sm:$0xff] %vm2149_vm11, %v3101_v44 }
0x1121   : > { %v3104_v5 = vld [vmem:[#allocation3] sm:$0xff] }
0x1122   : > { %4538 = vmatmul.mubr.bf16.vlgmr.msra.gmra.mrb[28].mxu0 %v3104_v5  ;;  %v4826_v5 = vld [vmem:[%s6204_s20 + $0x28] sm:$0xff]  }
0x1123   : > { %4344 = vmatpush3.bf16.msra.mxu0 %v4816_v16 }
0x1124   : > { %4345 = vmatprep.subr.bf16.mxu0 %v4817_v17 }
0x1127   : > { %4346 = vmatpush3.bf16.msra.mxu0 %v4818_v18 }
0x1128   : > { %4347 = vmatprep.subr.bf16.mxu0 %v4819_v19 }
0x112b   : > { %4348 = vmatpush3.bf16.msra.mxu0 %v4820_v20 }
0x112c   : > { %4349 = vmatprep.subr.bf16.mxu0 %v4821_v21 }
0x112f   : > { %4350 = vmatpush3.bf16.msra.mxu0 %v4822_v4 }
0x1130   : > { %4351 = vmatprep.subr.bf16.mxu0 %v4823_v22 }
0x1133   : > { %4352 = vmatpush3.bf16.msra.mxu0 %v4824_v23 }
0x1134   : > { %4353 = vmatprep.subr.bf16.mxu0 %v4825_v24 }
0x1137   : > { %4354 = vmatpush3.bf16.msra.mxu0 %v4826_v5 }
0x11f5   : > { %v3210_v46 = vpop.f32.mrb[28].mxu0 }
0x11f6   : > { %v3211_v47 = vadd.f32 %v4205_v45, %v3210_v46  ;;  %v4539_v48 = vpop.f32.mrb[29].mxu0  ;;  %v4828_v46 = vld [vmem:[%s6204_s20 + $0x30] sm:$0xff]  }
0x11f7   : > { %v3213_v49 = vpop.f32.mrb[30].mxu0  ;;  %v4830_v48 = vld [vmem:[%s6204_s20 + $0x38] sm:$0xff]  }
0x11f8   : > { %v3214_v50 = vadd.f32 %v4205_v45, %v3213_v49  ;;  %v4540_v51 = vpop.f32.mrb[31].mxu0  ;;  %v3217_v52 = vadd.f32 %v3211_v47, %v6434_v40  ;;  %v4827_v45 = vld [vmem:[%s6204_s20 + $0x70] sm:$0xff]   ;;  %v4829_v47 = vld [vmem:[%s6204_s20 + $0x78] sm:$0xff]  }
0x11f9   : > { %4355 = vmatprep.subr.bf16.mxu0 %v4827_v45  ;;  %v3276_v49 = vld [vmem:[%s6190_s5] sm:$0x3] }
0x11fa   : > { %3221 = vadd.xlane.f32.xlu0 %v3217_v52  ;;  %v3218_v53 = vadd.f32 %v3214_v50, %v6436_v41  ;;  %4356 = vmatpush3.bf16.msra.mxu0 %v4828_v46  ;;  %v3281_v50 = vrot.slane %v3276_v49, %v6260_v33  ;;  %v3285_v51 = vrot.slane %v3276_v49, %v6263_v35  ;;  %v4232_v35 = vld [vmem:[%s1325_s9] ss:$0 sm:$0xff] }
0x11fb   : > { %4357 = vmatprep.subr.bf16.mxu0 %v4829_v47 }
0x11fc   : > { %3223 = vadd.xlane.f32.xlu1 %v3218_v53 }
0x11fe   : > { %4358 = vmatpush3.bf16.msra.mxu0 %v4830_v48 }
0x1287   : > { %v3222_v25 = vpop.xlane.xlu0 %3221 }
0x1288   : > { %v3225_v26 = vmul.f32 0.0078125, %v3222_v25 }
0x1289   : > { %v3224_v60 = vpop.xlane.xlu1 %3223 }
0x128a   : > { %v3227_v40 = vsub.f32 %v3217_v52, %v3225_v26  ;;  %v3226_v41 = vmul.f32 0.0078125, %v3224_v60 }
0x128c   : > { %v6562_v61 = vsub.f32 %v3218_v53, %v3226_v41  ;;  %v3229_v62 = vmul.f32 %v3227_v40, %v3227_v40 }
0x128e   : > { %3231 = vadd.xlane.f32.xlu0 %v3229_v62  ;;  %v3230_v57 = vmul.f32 %v6562_v61, %v6562_v61 }
0x1292   : > { %3233 = vadd.xlane.f32.xlu0 %v3230_v57 }
0x131b   : > { %v3232_v27 = vpop.xlane.xlu0 %3231 }
0x131c   : > { %v3235_v6 = vmul.f32 0.0078125, %v3232_v27 }
0x131e   : > { %v3237_v28 = vadd.f32 1e-05, %v3235_v6  ;;  %v4249_v6 = vld [vmem:[%s1328_s14] ss:$0 sm:$0xff] }
0x131f   : > { %v3234_v29 = vpop.xlane.xlu0 %3233 }
0x1320   : > { %4899 = vrsqrt.f32 %v3237_v28  ;;  %v3236_v30 = vmul.f32 0.0078125, %v3234_v29 }
0x1322   : > { %v3238_v31 = vadd.f32 1e-05, %v3236_v30  ;;  %v4250_v30 = vld [vmem:[%s1331_s22] ss:$0 sm:$0xff] }
0x1324   : > { %4901 = vrsqrt.f32 %v3238_v31 }
0x132a   : > { %v4900_v32 = vpop.eup %4899 }
0x132b   : > { %v3241_v34 = vmul.f32 %v4900_v32, %v3227_v40 }
0x132d   : > { %v3249_v37 = vmul.f32 %v4214_v0, %v3241_v34 }
0x132e   : > { %v4902_v36 = vpop.eup %4901 }
0x132f   : > { %v3242_v2 = vmul.f32 %v4902_v36, %v6562_v61  ;;  %v3257_v42 = vadd.f32 %v4215_v38, %v3249_v37 }
0x1331   : > { %v3250_v39 = vmul.f32 %v4214_v0, %v3242_v2 }
0x1333   : > { %v3258_v43 = vadd.f32 %v4215_v38, %v3250_v39 }
0x1335   : > { %v3259_v44 = vpack.c.bf16 %v3258_v43, %v3257_v42 }
0x1337   : > { %3401 = vmatmul.mubr.bf16.vlgmr.msra.gmra.mrb[56].mxu1 %v3259_v44 }
0x140a   : > { %v3402_v52 = vpop.f32.mrb[56].mxu1 }
0x140b   : > { %v3403_v53 = vadd.f32 %v3402_v52, %v3281_v50  ;;  %v3404_v54 = vpop.f32.mrb[57].mxu1 }
0x140c   : > { %v3405_v56 = vadd.f32 %v3404_v54, %v3285_v51  ;;  %v3406_v58 = vpop.f32.mrb[58].mxu1 }
0x140d   : > { %v3407_v59 = vadd.f32 %v3406_v58, %v3281_v50  ;;  %v3408_v25 = vpop.f32.mrb[59].mxu1  ;;  %v3411_v60 = vmax.f32 %v3403_v53, 0.0 }
0x140e   : > { %v3409_v26 = vadd.f32 %v3408_v25, %v3285_v51  ;;  %v3412_v41 = vmax.f32 %v3405_v56, 0.0 }
0x140f   : > { %v3413_v40 = vmax.f32 %v3407_v59, 0.0 }
0x1410   : > { %v3414_v61 = vmax.f32 %v3409_v26, 0.0 }
0x1411   : > { %v3415_v62 = vpack.c.bf16 %v3413_v40, %v3411_v60 }
0x1412   : > { %v3416_v57 = vpack.c.bf16 %v3414_v61, %v3412_v41 }
0x1414   : > { %3584 = vmatprep.mubr.bf16.mxu0 %v3416_v57 }
0x1415   : > { %3585 = vmatmul.mubr.bf16.vlgmr.msra.gmra.mrb[32].mxu0 %v3415_v62 }
0x14e8   : > { %v4359_v33 = vpop.f32.mrb[32].mxu0 }
0x14e9   : > { %v4360_v63 = vpop.f32.mrb[33].mxu0 }
0x14ea   : > { %v4361_v55 = vadd.f32 %v4360_v63, %v4359_v33  ;;  %v4362_v1 = vpop.f32.mrb[34].mxu0 }
0x14eb   : > { %v4363_v3 = vpop.f32.mrb[35].mxu0 }
0x14ec   : > { %v3587_v7 = vadd.f32 %v4361_v55, %v4232_v35  ;;  %v4364_v8 = vadd.f32 %v4363_v3, %v4362_v1 }
0x14ee   : > { %v3590_v9 = vadd.f32 %v4364_v8, %v4232_v35  ;;  %v3593_v10 = vadd.f32 %v3587_v7, %v3257_v42 }
0x14f0   : > { %3597 = vadd.xlane.f32.xlu0 %v3593_v10  ;;  %v3594_v11 = vadd.f32 %v3590_v9, %v3258_v43 }
0x14f2   : > { %3599 = vadd.xlane.f32.xlu1 %v3594_v11 }
0x157d   : > { %v3598_v12 = vpop.xlane.xlu0 %3597 }
0x157e   : > { %v3601_v13 = vmul.f32 0.0078125, %v3598_v12 }
0x157f   : > { %v3600_v14 = vpop.xlane.xlu1 %3599 }
0x1580   : > { %v3603_v15 = vsub.f32 %v3593_v10, %v3601_v13  ;;  %v3602_v16 = vmul.f32 0.0078125, %v3600_v14 }
0x1582   : > { %v3604_v17 = vsub.f32 %v3594_v11, %v3602_v16  ;;  %v3605_v18 = vmul.f32 %v3603_v15, %v3603_v15 }
0x1584   : > { %3607 = vadd.xlane.f32.xlu0 %v3605_v18  ;;  %v3606_v19 = vmul.f32 %v3604_v17, %v3604_v17 }
0x1586   : > { %3609 = vadd.xlane.f32.xlu1 %v3606_v19 }
0x1611   : > { %v3608_v20 = vpop.xlane.xlu0 %3607 }
0x1612   : > { %v3611_v21 = vmul.f32 0.0078125, %v3608_v20 }
0x1613   : > { %v3610_v4 = vpop.xlane.xlu1 %3609 }
0x1614   : > { %v3613_v22 = vadd.f32 1e-05, %v3611_v21  ;;  %v3612_v23 = vmul.f32 0.0078125, %v3610_v4 }
0x1616   : > { %4903 = vrsqrt.f32 %v3613_v22  ;;  %v3614_v24 = vadd.f32 1e-05, %v3612_v23 }
0x1618   : > { %4905 = vrsqrt.f32 %v3614_v24 }
0x1620   : > { %v4904_v27 = vpop.eup %4903 }
0x1621   : > { %v3617_v28 = vmul.f32 %v4904_v27, %v3603_v15 }
0x1622   : > { %v4906_v29 = vpop.eup %4905 }
0x1623   : > { %v3625_v31 = vmul.f32 %v4249_v6, %v3617_v28  ;;  %v3618_v32 = vmul.f32 %v4906_v29, %v3604_v17  ;;  %3640 = sbr.rel (%p4251_p12) target bundleno = 5676 (0x162c), region = 168 }
0x1625   : > { %v3633_v34 = vadd.f32 %v4250_v30, %v3625_v31  ;;  %v3626_v0 = vmul.f32 %v4249_v6, %v3618_v32 }
0x1627   : > { %3635 = vst [vmem:[#allocation2] sm:$0xff] %v3633_v34  ;;  %v3634_v36 = vadd.f32 %v4250_v30, %v3626_v0 }
0x1629   : > { %3636 = vst [vmem:[#allocation2 + $0x8] sm:$0xff] %v3634_v36  ;;  %v4273_v2 = vpack.c.bf16 (!%p4251_p12), %v3634_v36, %v3633_v34 }
0x162b   : > { %4274 = vst [vmem:[%s6208_s21] sm:$0xff] %v4273_v2  }
0x162c PF: > { %s6932_s14 = sld [smem:[#allocation37_spill]]  ;;  %s6933_s25 = sld [smem:[#allocation43_spill]] }
0x162d   : > { %s6934_s13 = sld [smem:[#allocation82_spill]]  ;;  %s3665_s23 = sshll.u32 %s6208_s21, 4  ;;  %s6632_s23 = int_to_ptr.vmem [resolvable:$true] %s3665_s23 }
0x162e   : > { %s3652_s2 = scalar_lea.sflag [#allocation6], %s6081_s15  ;;  %s5237_s27 = scalar_lea.vmem %s6632_s23, 128 }
0x162f   : > { %p5238_p2 = scmp.ne.s32.totalorder %s6632_s23, %s5237_s27  ;;  %s5408_s7 = smov [#allocation22]  }
0x1630   : > { %s5241_s29 = sshll.u32 %s5408_s7, 4  ;;  %s5242_s29 = int_to_ptr.vmem [resolvable:$false] %s5241_s29 }
0x1631   : > { %s5243_s6 = scalar_lea.vmem %s5242_s29, 256  ;;  %p5244_p13 = scmp.lt.s32.totalorder %s6632_s23, %s5242_s29 }
0x1632   : > { %s4269_s19 = sshll.u32 %s6932_s14, 7  ;;  %p6935_p9 = scmp.ne.s32.totalorder %s6933_s25, 0 }
0x1633   : > { %s6629_s26 = scalar_lea.hbm %s6934_s13, %s4269_s19  ;;  %p5245_p6 = scmp.lt.s32.totalorder %s5243_s6, %s5237_s27 }
0x1634   : > { %p5239_p1 = pnand %p5238_p2, %p6935_p9 }
0x1635   : > { %p5246_p4 = por %p5245_p6, %p5244_p13 }
0x1636   : > { %p5240_p3 = pneg %p5239_p1 }
0x1638   : > { %p5247_p11 = pnand %p5246_p4, %p5240_p3 }
0x163a   : > { %5250 = shalt.err (!%p5247_p11)
}
0x163b   : > { %s5251_s21 = scalar_lea.hbm %s6629_s26, 128  ;;  %s5255_s24 = scalar_lea.hbm %s6934_s13, 256 }
0x163c   : > { %p5252_p10 = scmp.ne.s32.totalorder %s6629_s26, %s5251_s21  ;;  %p5256_p8 = scmp.lt.u32.totalorder %s6629_s26, %s6934_s13 }
0x163d   : > { %p5257_p0 = scmp.lt.u32.totalorder %s5255_s24, %s5251_s21  ;;  %p5259_p2 = scmp.lt.u32.totalorder %s5251_s21, %s6629_s26 }
0x163e   : > { %p5253_p5 = pnand %p5252_p10, %p6935_p9 }
0x163f   : > { %p5258_p12 = por %p5257_p0, %p5256_p8 }
0x1640   : > { %p5254_p7 = pneg %p5253_p5 }
0x1641   : > { %p5260_p1 = por %p5259_p2, %p5258_p12 }
0x1643   : > { %p5261_p3 = pnand %p5260_p1, %p5254_p7 }
0x1645   : > { %5264 = shalt.err (!%p5261_p3)
}
0x1646   : > { %s5409_s10 = smov 4  }
0x1647   : > { %4567 = dma.vmem_to_hbm [thread:$0]  (%p6935_p9), %s6632_s23, 128, %s6629_s26, %s3652_s2, %s5407_s16, %s5407_s16, %s5409_s10  }
0x1648 PF: > { %s6936_s5 = sld [smem:[#allocation40_spill]]  ;;  %s6937_s20 = sld [smem:[#allocation33_spill]] }
0x1649   : > { %s6938_s9 = sld [smem:[#allocation44_spill]] }
0x164e   : > { %p4608_p13 = scmp.ge.s32.totalorder %s6936_s5, 2  ;;  %s3680_s4 = sand.u32 1, %s6937_s20  }
0x164f   : > { %p6939_p6 = scmp.ne.s32.totalorder %s6938_s9, 0  ;;  %s3681_s18 = scalar_lea.sflag [#allocation6], %s3680_s4 }
0x1651   : > { %p4604_p4 = pnand %p4608_p13, %p6939_p6 }
0x1653   : > { %5338 = dma.done.wait (!%p4604_p4), %s3681_s18, 128  }
0x1654   : > { %5340 = vsyncadd (!%p4604_p4), %s3681_s18, 4294967168  ;;  %s55_s3 = sadd.s32 1, %s6936_s5   ;;  %s6940_s5 = sld [smem:[#allocation31_spill]] }
0x1655   : > { %p52_p11 = scmp.ge.s32.totalorder %s55_s3, 6   ;;  %s6941_s26 = sld [smem:[#allocation32_spill]] }
0x1656   : > { %s6942_s27 = sld [smem:[#allocation49_spill]]  ;;  %s6943_s28 = sld [smem:[#allocation34_spill]] }
0x1657   : > { %s6944_s6 = sld [smem:[#allocation35_spill]]  ;;  %s6945_s2 = sld [smem:[#allocation50_spill]] }
0x1658   : > { %s6946_s29 = sld [smem:[#allocation38_spill]]  ;;  %s6947_s0 = sld [smem:[#allocation39_spill]] }
0x1659   : > { %s6948_s7 = sld [smem:[#allocation46_spill]]  ;;  %s6949_s30 = sld [smem:[#allocation48_spill]] }
0x165a   :  { %54 = sbr.rel (!%p52_p11) target bundleno = 45 (0x2d), region = 328 }
0x1661   :  { %3686 = vsyncpa [#allocation5], 1 }
0x1662   :  { %3688 = vsyncpa [#allocation5 + $0x1], 1 }
0x1663   :  { %3689 = vsyncpa [#allocation8], 1 }
0x1664   :  { %3691 = vsyncpa [#allocation8 + $0x1], 1 }
0x1665   :  { %3692 = vsyncpa [#allocation11], 1 }
0x1666   :  { %3694 = vsyncpa [#allocation11 + $0x1], 1 }
0x1667   :  { %3695 = vsyncpa [#allocation14], 1 }
0x1668   :  { %3697 = vsyncpa [#allocation14 + $0x1], 1 }
0x1669   :  { %3698 = vsyncpa [#allocation17], 1 }
0x166a   :  { %3700 = vsyncpa [#allocation17 + $0x1], 1 }
0x166b   :  { %3701 = vsyncpa [#allocation20], 1 }
0x166c   :  { %3703 = vsyncpa [#allocation20 + $0x1], 1 }
0x166d   :  { %3704 = vsyncpa [#allocation6], 1 }
0x166e   :  { %3706 = vsyncpa [#allocation6 + $0x1], 1 }

</bundles_post_ra>
